<compile_context>
chip_gen: v7x
topology: tpu7x:2x2x1
jax: 0.10.0
libtpu: 0.0.40
codegen_flags: <defaults>
</compile_context>

<pallas_src>
import jax
import jax.numpy as jnp
from jax.experimental import pallas as pl
from jax.experimental.pallas import tpu as pltpu


# ----------------------------- shape helpers --------------------------------

def conv_out_hw(hw, k, s):
    h, w = hw
    return ((h - k) // s + 1, (w - k) // s + 1)


def im2col_posmajor(x, k, s):
    """x: (B, H, W, C) -> (Ho*Wo*B, k*k*C); rows ordered (spatial pos, batch),
    columns ordered (kh, kw, ci).  Pure XLA glue (only used for conv1)."""
    B, H, W, C = x.shape
    Ho = (H - k) // s + 1
    Wo = (W - k) // s + 1
    cols = []
    for kh in range(k):
        for kw in range(k):
            cols.append(x[:, kh:kh + s * Ho:s, kw:kw + s * Wo:s, :])
    p = jnp.stack(cols, axis=-2)               # (B, Ho, Wo, k*k, C)
    p = jnp.transpose(p, (1, 2, 0, 3, 4))      # (Ho, Wo, B, k*k, C)
    return p.reshape(Ho * Wo * B, k * k * C), Ho, Wo


# ----------------------------- fused Pallas kernel ---------------------------

def _conv_step(hp_ref, Wp, w_ref, b_ref, k, s, Ho, Wo, gat_ref, B2):
    """Conv(+bias+ReLU).  Input rows in hp_ref ordered (i*Wp + j)*B2 + b.
    Output value rows ordered (ho*Wo + wo)*B2 + b."""
    acc = None
    for kh in range(k):
        for kw in range(k):
            # Gather the (pos, batch) rows needed by this tap into VMEM scratch.
            for ho in range(Ho):
                for wo in range(Wo):
                    src = ((s * ho + kh) * Wp + (s * wo + kw)) * B2
                    dst = (ho * Wo + wo) * B2
                    gat_ref[dst:dst + B2, :] = hp_ref[src:src + B2, :]
            tap = jnp.dot(gat_ref[...], w_ref[kh * k + kw],
                          preferred_element_type=jnp.float32)
            acc = tap if acc is None else acc + tap
    return jnp.maximum(acc + b_ref[...], 0.0)


def _build_kernel(N, B2, H1, W1, C1, k2, s2, C2, k3, s3, C3):
    H2, W2 = conv_out_hw((H1, W1), k2, s2)
    H3, W3 = conv_out_hw((H2, W2), k3, s3)

    def kernel(p1_ref, w1_ref, b1_ref, w2_ref, b2_ref, w3_ref, b3_ref,
               l1w_ref, l1b_ref, l2w_ref, l2b_ref, l3w_ref, l3b_ref,
               o_ref, h1_s, h2_s, g2_s, g3_s):
        # conv1 (+bias+ReLU): one big im2col matmul, result kept in VMEM.
        h1_s[...] = jnp.maximum(
            jnp.dot(p1_ref[...], w1_ref[...],
                    preferred_element_type=jnp.float32) + b1_ref[...], 0.0)

        # conv2 / conv3 (+bias+ReLU): fully VMEM-resident per-tap accumulation.
        h2_s[...] = _conv_step(h1_s, W1, w2_ref, b2_ref, k2, s2, H2, W2,
                               g2_s, B2)
        h3 = _conv_step(h2_s, W2, w3_ref, b3_ref, k3, s3, H3, W3, g3_s, B2)

        # head: 0.5*(x + x_g); NCHW flatten folded into l1w; 3 linears.
        z = None
        for pos in range(H3 * W3):
            blk = h3[pos * B2:(pos + 1) * B2, :]
            avg = 0.5 * (blk[:N, :] + blk[N:, :])
            zp = jnp.dot(avg, l1w_ref[pos * C3:(pos + 1) * C3, :],
                         preferred_element_type=jnp.float32)
            z = zp if z is None else z + zp
        z = z + l1b_ref[...]
        z = jnp.dot(z, l2w_ref[...],
                    preferred_element_type=jnp.float32) + l2b_ref[...]
        o_ref[...] = jnp.dot(z, l3w_ref[...],
                             preferred_element_type=jnp.float32) + l3b_ref[...]

    return kernel, (H2, W2, H3, W3)


_VMEM = pl.BlockSpec(memory_space=pltpu.MemorySpace.VMEM)


# ----------------------------- model ----------------------------------------

def init_params(key, num_actions, lin_in_hw):
    ks = jax.random.split(key, 12)

    def nrm(k, shape, scale=0.05):
        return (scale * jax.random.normal(k, shape)).astype(jnp.float32)

    lin_in = 64 * lin_in_hw[0] * lin_in_hw[1]
    return {
        "conv1_w": nrm(ks[0], (8, 8, 4, 32)),   # HWIO
        "conv1_b": nrm(ks[1], (32,)),
        "conv2_w": nrm(ks[2], (4, 4, 32, 64)),
        "conv2_b": nrm(ks[3], (64,)),
        "conv3_w": nrm(ks[4], (3, 3, 64, 64)),
        "conv3_b": nrm(ks[5], (64,)),
        "lin1_w": nrm(ks[6], (lin_in, 512)),    # rows in PyTorch NCHW-flatten order
        "lin1_b": nrm(ks[7], (512,)),
        "lin2_w": nrm(ks[8], (512, 128)),
        "lin2_b": nrm(ks[9], (128,)),
        "lin3_w": nrm(ks[10], (128, num_actions)),
        "lin3_b": nrm(ks[11], (num_actions,)),
    }


def forward(params, x_nchw, xg_nchw):
    N = x_nchw.shape[0]
    num_actions = params["lin3_w"].shape[1]

    # Branch fusion: both inputs through the shared conv stack as one 2N batch.
    xx = jnp.concatenate([x_nchw, xg_nchw], axis=0)     # (2N, C, H, W)
    xx = jnp.transpose(xx, (0, 2, 3, 1))                # NHWC
    B2 = 2 * N

    k1, s1 = params["conv1_w"].shape[0], 4
    k2, s2 = params["conv2_w"].shape[0], 2
    k3, s3 = params["conv3_w"].shape[0], 1
    cin = xx.shape[-1]
    C1 = params["conv1_w"].shape[-1]
    C2 = params["conv2_w"].shape[-1]
    C3 = params["conv3_w"].shape[-1]

    patches1, H1, W1 = im2col_posmajor(xx, k1, s1)

    kernel, (H2, W2, H3, W3) = _build_kernel(N, B2, H1, W1, C1,
                                             k2, s2, C2, k3, s3, C3)

    # One-time weight layout prep (all on the weights, free at runtime).
    w1 = params["conv1_w"].reshape(k1 * k1 * cin, C1)
    w2 = params["conv2_w"].reshape(k2 * k2, C1, C2)
    w3 = params["conv3_w"].reshape(k3 * k3, C2, C3)
    # Fold the PyTorch NCHW flatten into lin1_w (identity when H3*W3 == 1).
    l1w = params["lin1_w"].reshape(C3, H3, W3, -1)
    l1w = jnp.transpose(l1w, (1, 2, 0, 3)).reshape(H3 * W3 * C3, -1)

    args = (patches1, w1, params["conv1_b"].reshape(1, -1),
            w2, params["conv2_b"].reshape(1, -1),
            w3, params["conv3_b"].reshape(1, -1),
            l1w, params["lin1_b"].reshape(1, -1),
            params["lin2_w"], params["lin2_b"].reshape(1, -1),
            params["lin3_w"], params["lin3_b"].reshape(1, -1))

    flops = (2 * patches1.shape[0] * patches1.shape[1] * C1
             + k2 * k2 * 2 * (H2 * W2 * B2) * C1 * C2
             + k3 * k3 * 2 * (H3 * W3 * B2) * C2 * C3
             + 2 * N * (H3 * W3 * C3) * l1w.shape[1]
             + 2 * N * params["lin2_w"].shape[0] * params["lin2_w"].shape[1]
             + 2 * N * params["lin3_w"].shape[0] * num_actions)
    bytes_accessed = sum(int(a.size) * 4 for a in args) + N * num_actions * 4

    return pl.pallas_call(
        kernel,
        out_shape=jax.ShapeDtypeStruct((N, num_actions), jnp.float32),
        in_specs=[_VMEM] * len(args),
        out_specs=_VMEM,
        scratch_shapes=[
            pltpu.VMEM((H1 * W1 * B2, C1), jnp.float32),   # conv1 output
            pltpu.VMEM((H2 * W2 * B2, C2), jnp.float32),   # conv2 output
            pltpu.VMEM((H2 * W2 * B2, C1), jnp.float32),   # conv2 tap gather
            pltpu.VMEM((H3 * W3 * B2, C2), jnp.float32),   # conv3 tap gather
        ],
        cost_estimate=pl.CostEstimate(flops=flops, transcendentals=0,
                                      bytes_accessed=bytes_accessed),
    )(*args)


# ----------------------------- pure-JAX reference ----------------------------

def reference_forward(params, x, xg):
    dn = ('NCHW', 'HWIO', 'NCHW')

    def branch(v):
        h = jax.lax.conv_general_dilated(v, params["conv1_w"], (4, 4), 'VALID',
                                         dimension_numbers=dn)
        h = jnp.maximum(h + params["conv1_b"].reshape(1, -1, 1, 1), 0.0)
        h = jax.lax.conv_general_dilated(h, params["conv2_w"], (2, 2), 'VALID',
                                         dimension_numbers=dn)
        h = jnp.maximum(h + params["conv2_b"].reshape(1, -1, 1, 1), 0.0)
        h = jax.lax.conv_general_dilated(h, params["conv3_w"], (1, 1), 'VALID',
                                         dimension_numbers=dn)
        h = jnp.maximum(h + params["conv3_b"].reshape(1, -1, 1, 1), 0.0)
        return h.reshape(h.shape[0], -1)                 # NCHW flatten

    z = 0.5 * (branch(x) + branch(xg))
    z = z @ params["lin1_w"] + params["lin1_b"]
    z = z @ params["lin2_w"] + params["lin2_b"]
    z = z @ params["lin3_w"] + params["lin3_b"]
    return z


# ----------------------------- main ------------------------------------------

if __name__ == "__main__":
    batch = 2
    in_channels = 4
    input_shape = (36, 36)
    num_actions = 18

    # Replicate lin_in_shape(): conv1(k8,s4) -> conv2(k4,s2) -> conv3(k3,s1)
    hw = conv_out_hw(input_shape, 8, 4)   # (8, 8)
    hw = conv_out_hw(hw, 4, 2)            # (3, 3)
    hw = conv_out_hw(hw, 3, 1)            # (1, 1)

    key = jax.random.PRNGKey(0)
    k_p, k_x, k_g = jax.random.split(key, 3)
    params = init_params(k_p, num_actions, hw)

    x = jax.random.normal(k_x, (batch, in_channels) + input_shape, dtype=jnp.float32)
    x_g = jax.random.normal(k_g, (batch, in_channels) + input_shape, dtype=jnp.float32)

    out = jax.jit(forward)(params, x, x_g)
    out = jax.block_until_ready(out)
    assert out.shape == (batch, num_actions), out.shape
    assert out.dtype == jnp.float32

    ref = jax.block_until_ready(jax.jit(reference_forward)(params, x, x_g))
    err = float(jnp.max(jnp.abs(out - ref)))
    assert err < 1e-3, f"max abs err {err}"

    print("KERNEL_OK")
</pallas_src>

<mosaic_0001>
module attributes {stable_mosaic.version = 11 : i64} {
  func.func @kernel(%arg0: memref<256x256xf32, #tpu.memory_space<vmem>>, %arg1: memref<256x32xf32, #tpu.memory_space<vmem>>, %arg2: memref<1x32xf32, #tpu.memory_space<vmem>>, %arg3: memref<16x32x64xf32, #tpu.memory_space<vmem>>, %arg4: memref<1x64xf32, #tpu.memory_space<vmem>>, %arg5: memref<9x64x64xf32, #tpu.memory_space<vmem>>, %arg6: memref<1x64xf32, #tpu.memory_space<vmem>>, %arg7: memref<64x512xf32, #tpu.memory_space<vmem>>, %arg8: memref<1x512xf32, #tpu.memory_space<vmem>>, %arg9: memref<512x128xf32, #tpu.memory_space<vmem>>, %arg10: memref<1x128xf32, #tpu.memory_space<vmem>>, %arg11: memref<128x18xf32, #tpu.memory_space<vmem>>, %arg12: memref<1x18xf32, #tpu.memory_space<vmem>>, %arg13: memref<2x18xf32, #tpu.memory_space<vmem>>, %arg14: memref<256x32xf32, #tpu.memory_space<vmem>>, %arg15: memref<36x64xf32, #tpu.memory_space<vmem>>, %arg16: memref<36x32xf32, #tpu.memory_space<vmem>>, %arg17: memref<4x64xf32, #tpu.memory_space<vmem>>) attributes {dimension_semantics = [], scalar_prefetch = 0 : i64, scratch_operands = 4 : i64, tpu.core_type = #tpu.core_type<tc>} {
    %c0 = arith.constant 0 : index
    %c0_0 = arith.constant 0 : index
    %0 = vector.load %arg0[%c0, %c0_0] : memref<256x256xf32, #tpu.memory_space<vmem>>, vector<256x256xf32>
    %c0_1 = arith.constant 0 : index
    %c0_2 = arith.constant 0 : index
    %1 = vector.load %arg1[%c0_1, %c0_2] : memref<256x32xf32, #tpu.memory_space<vmem>>, vector<256x32xf32>
    %cst = arith.constant dense<0.000000e+00> : vector<256x32xf32>
    %2 = tpu.matmul %0, %1, %cst {dimension_numbers = #tpu.dot_dimension_numbers<[1], [0], [0], [1], [0, 0, 1, 1], [], []>} : vector<256x256xf32>, vector<256x32xf32>, vector<256x32xf32> -> vector<256x32xf32>
    %c0_3 = arith.constant 0 : index
    %c0_4 = arith.constant 0 : index
    %3 = vector.load %arg2[%c0_3, %c0_4] : memref<1x32xf32, #tpu.memory_space<vmem>>, vector<1x32xf32>
    %4 = vector.broadcast %3 : vector<1x32xf32> to vector<256x32xf32>
    %5 = arith.addf %2, %4 : vector<256x32xf32>
    %cst_5 = arith.constant 0.000000e+00 : f32
    %6 = vector.broadcast %cst_5 : f32 to vector<256x32xf32>
    %7 = arith.maximumf %5, %6 : vector<256x32xf32>
    %c0_6 = arith.constant 0 : index
    %c0_7 = arith.constant 0 : index
    %8 = vector.load %arg14[%c0_6, %c0_7] : memref<256x32xf32, #tpu.memory_space<vmem>>, vector<256x32xf32>
    tpu.vector_store %arg14[%c0_6, %c0_7], %7 {strides = array<i32>} : memref<256x32xf32, #tpu.memory_space<vmem>>, vector<256x32xf32>,
    %c0_8 = arith.constant 0 : index
    %c0_9 = arith.constant 0 : index
    %9 = vector.load %arg14[%c0_8, %c0_9] : memref<256x32xf32, #tpu.memory_space<vmem>>, vector<4x32xf32>
    %c0_10 = arith.constant 0 : index
    %c0_11 = arith.constant 0 : index
    %10 = vector.load %arg16[%c0_10, %c0_11] : memref<36x32xf32, #tpu.memory_space<vmem>>, vector<4x32xf32>
    tpu.vector_store %arg16[%c0_10, %c0_11], %9 {strides = array<i32>} : memref<36x32xf32, #tpu.memory_space<vmem>>, vector<4x32xf32>,
    %c8 = arith.constant 8 : index
    %c0_12 = arith.constant 0 : index
    %11 = vector.load %arg14[%c8, %c0_12] : memref<256x32xf32, #tpu.memory_space<vmem>>, vector<4x32xf32>
    %c4 = arith.constant 4 : index
    %c0_13 = arith.constant 0 : index
    %12 = vector.load %arg16[%c4, %c0_13] : memref<36x32xf32, #tpu.memory_space<vmem>>, vector<4x32xf32>
    tpu.vector_store %arg16[%c4, %c0_13], %11 {strides = array<i32>} : memref<36x32xf32, #tpu.memory_space<vmem>>, vector<4x32xf32>,
    %c16 = arith.constant 16 : index
    %c0_14 = arith.constant 0 : index
    %13 = vector.load %arg14[%c16, %c0_14] : memref<256x32xf32, #tpu.memory_space<vmem>>, vector<4x32xf32>
    %c8_15 = arith.constant 8 : index
    %c0_16 = arith.constant 0 : index
    %14 = vector.load %arg16[%c8_15, %c0_16] : memref<36x32xf32, #tpu.memory_space<vmem>>, vector<4x32xf32>
    tpu.vector_store %arg16[%c8_15, %c0_16], %13 {strides = array<i32>} : memref<36x32xf32, #tpu.memory_space<vmem>>, vector<4x32xf32>,
    %c64 = arith.constant 64 : index
    %c0_17 = arith.constant 0 : index
    %15 = vector.load %arg14[%c64, %c0_17] : memref<256x32xf32, #tpu.memory_space<vmem>>, vector<4x32xf32>
    %c12 = arith.constant 12 : index
    %c0_18 = arith.constant 0 : index
    %16 = vector.load %arg16[%c12, %c0_18] : memref<36x32xf32, #tpu.memory_space<vmem>>, vector<4x32xf32>
    tpu.vector_store %arg16[%c12, %c0_18], %15 {strides = array<i32>} : memref<36x32xf32, #tpu.memory_space<vmem>>, vector<4x32xf32>,
    %c72 = arith.constant 72 : index
    %c0_19 = arith.constant 0 : index
    %17 = vector.load %arg14[%c72, %c0_19] : memref<256x32xf32, #tpu.memory_space<vmem>>, vector<4x32xf32>
    %c16_20 = arith.constant 16 : index
    %c0_21 = arith.constant 0 : index
    %18 = vector.load %arg16[%c16_20, %c0_21] : memref<36x32xf32, #tpu.memory_space<vmem>>, vector<4x32xf32>
    tpu.vector_store %arg16[%c16_20, %c0_21], %17 {strides = array<i32>} : memref<36x32xf32, #tpu.memory_space<vmem>>, vector<4x32xf32>,
    %c80 = arith.constant 80 : index
    %c0_22 = arith.constant 0 : index
    %19 = vector.load %arg14[%c80, %c0_22] : memref<256x32xf32, #tpu.memory_space<vmem>>, vector<4x32xf32>
    %c20 = arith.constant 20 : index
    %c0_23 = arith.constant 0 : index
    %20 = vector.load %arg16[%c20, %c0_23] : memref<36x32xf32, #tpu.memory_space<vmem>>, vector<4x32xf32>
    tpu.vector_store %arg16[%c20, %c0_23], %19 {strides = array<i32>} : memref<36x32xf32, #tpu.memory_space<vmem>>, vector<4x32xf32>,
    %c128 = arith.constant 128 : index
    %c0_24 = arith.constant 0 : index
    %21 = vector.load %arg14[%c128, %c0_24] : memref<256x32xf32, #tpu.memory_space<vmem>>, vector<4x32xf32>
    %c24 = arith.constant 24 : index
    %c0_25 = arith.constant 0 : index
    %22 = vector.load %arg16[%c24, %c0_25] : memref<36x32xf32, #tpu.memory_space<vmem>>, vector<4x32xf32>
    tpu.vector_store %arg16[%c24, %c0_25], %21 {strides = array<i32>} : memref<36x32xf32, #tpu.memory_space<vmem>>, vector<4x32xf32>,
    %c136 = arith.constant 136 : index
    %c0_26 = arith.constant 0 : index
    %23 = vector.load %arg14[%c136, %c0_26] : memref<256x32xf32, #tpu.memory_space<vmem>>, vector<4x32xf32>
    %c28 = arith.constant 28 : index
    %c0_27 = arith.constant 0 : index
    %24 = vector.load %arg16[%c28, %c0_27] : memref<36x32xf32, #tpu.memory_space<vmem>>, vector<4x32xf32>
    tpu.vector_store %arg16[%c28, %c0_27], %23 {strides = array<i32>} : memref<36x32xf32, #tpu.memory_space<vmem>>, vector<4x32xf32>,
    %c144 = arith.constant 144 : index
    %c0_28 = arith.constant 0 : index
    %25 = vector.load %arg14[%c144, %c0_28] : memref<256x32xf32, #tpu.memory_space<vmem>>, vector<4x32xf32>
    %c32 = arith.constant 32 : index
    %c0_29 = arith.constant 0 : index
    %26 = vector.load %arg16[%c32, %c0_29] : memref<36x32xf32, #tpu.memory_space<vmem>>, vector<4x32xf32>
    tpu.vector_store %arg16[%c32, %c0_29], %25 {strides = array<i32>} : memref<36x32xf32, #tpu.memory_space<vmem>>, vector<4x32xf32>,
    %c0_30 = arith.constant 0 : index
    %c0_31 = arith.constant 0 : index
    %27 = vector.load %arg16[%c0_30, %c0_31] : memref<36x32xf32, #tpu.memory_space<vmem>>, vector<36x32xf32>
    %c0_32 = arith.constant 0 : index
    %c0_33 = arith.constant 0 : index
    %c0_34 = arith.constant 0 : index
    %28 = vector.load %arg3[%c0_32, %c0_33, %c0_34] : memref<16x32x64xf32, #tpu.memory_space<vmem>>, vector<1x32x64xf32>
    %29 = vector.shape_cast %28 : vector<1x32x64xf32> to vector<32x64xf32>
    %cst_35 = arith.constant dense<0.000000e+00> : vector<36x64xf32>
    %30 = tpu.matmul %27, %29, %cst_35 {dimension_numbers = #tpu.dot_dimension_numbers<[1], [0], [0], [1], [0, 0, 1, 1], [], []>} : vector<36x32xf32>, vector<32x64xf32>, vector<36x64xf32> -> vector<36x64xf32>
    %c4_36 = arith.constant 4 : index
    %c0_37 = arith.constant 0 : index
    %31 = vector.load %arg14[%c4_36, %c0_37] : memref<256x32xf32, #tpu.memory_space<vmem>>, vector<4x32xf32>
    %c0_38 = arith.constant 0 : index
    %c0_39 = arith.constant 0 : index
    %32 = vector.load %arg16[%c0_38, %c0_39] : memref<36x32xf32, #tpu.memory_space<vmem>>, vector<4x32xf32>
    tpu.vector_store %arg16[%c0_38, %c0_39], %31 {strides = array<i32>} : memref<36x32xf32, #tpu.memory_space<vmem>>, vector<4x32xf32>,
    %c12_40 = arith.constant 12 : index
    %c0_41 = arith.constant 0 : index
    %33 = vector.load %arg14[%c12_40, %c0_41] : memref<256x32xf32, #tpu.memory_space<vmem>>, vector<4x32xf32>
    %c4_42 = arith.constant 4 : index
    %c0_43 = arith.constant 0 : index
    %34 = vector.load %arg16[%c4_42, %c0_43] : memref<36x32xf32, #tpu.memory_space<vmem>>, vector<4x32xf32>
    tpu.vector_store %arg16[%c4_42, %c0_43], %33 {strides = array<i32>} : memref<36x32xf32, #tpu.memory_space<vmem>>, vector<4x32xf32>,
    %c20_44 = arith.constant 20 : index
    %c0_45 = arith.constant 0 : index
    %35 = vector.load %arg14[%c20_44, %c0_45] : memref<256x32xf32, #tpu.memory_space<vmem>>, vector<4x32xf32>
    %c8_46 = arith.constant 8 : index
    %c0_47 = arith.constant 0 : index
    %36 = vector.load %arg16[%c8_46, %c0_47] : memref<36x32xf32, #tpu.memory_space<vmem>>, vector<4x32xf32>
    tpu.vector_store %arg16[%c8_46, %c0_47], %35 {strides = array<i32>} : memref<36x32xf32, #tpu.memory_space<vmem>>, vector<4x32xf32>,
    %c68 = arith.constant 68 : index
    %c0_48 = arith.constant 0 : index
    %37 = vector.load %arg14[%c68, %c0_48] : memref<256x32xf32, #tpu.memory_space<vmem>>, vector<4x32xf32>
    %c12_49 = arith.constant 12 : index
    %c0_50 = arith.constant 0 : index
    %38 = vector.load %arg16[%c12_49, %c0_50] : memref<36x32xf32, #tpu.memory_space<vmem>>, vector<4x32xf32>
    tpu.vector_store %arg16[%c12_49, %c0_50], %37 {strides = array<i32>} : memref<36x32xf32, #tpu.memory_space<vmem>>, vector<4x32xf32>,
    %c76 = arith.constant 76 : index
    %c0_51 = arith.constant 0 : index
    %39 = vector.load %arg14[%c76, %c0_51] : memref<256x32xf32, #tpu.memory_space<vmem>>, vector<4x32xf32>
    %c16_52 = arith.constant 16 : index
    %c0_53 = arith.constant 0 : index
    %40 = vector.load %arg16[%c16_52, %c0_53] : memref<36x32xf32, #tpu.memory_space<vmem>>, vector<4x32xf32>
    tpu.vector_store %arg16[%c16_52, %c0_53], %39 {strides = array<i32>} : memref<36x32xf32, #tpu.memory_space<vmem>>, vector<4x32xf32>,
    %c84 = arith.constant 84 : index
    %c0_54 = arith.constant 0 : index
    %41 = vector.load %arg14[%c84, %c0_54] : memref<256x32xf32, #tpu.memory_space<vmem>>, vector<4x32xf32>
    %c20_55 = arith.constant 20 : index
    %c0_56 = arith.constant 0 : index
    %42 = vector.load %arg16[%c20_55, %c0_56] : memref<36x32xf32, #tpu.memory_space<vmem>>, vector<4x32xf32>
    tpu.vector_store %arg16[%c20_55, %c0_56], %41 {strides = array<i32>} : memref<36x32xf32, #tpu.memory_space<vmem>>, vector<4x32xf32>,
    %c132 = arith.constant 132 : index
    %c0_57 = arith.constant 0 : index
    %43 = vector.load %arg14[%c132, %c0_57] : memref<256x32xf32, #tpu.memory_space<vmem>>, vector<4x32xf32>
    %c24_58 = arith.constant 24 : index
    %c0_59 = arith.constant 0 : index
    %44 = vector.load %arg16[%c24_58, %c0_59] : memref<36x32xf32, #tpu.memory_space<vmem>>, vector<4x32xf32>
    tpu.vector_store %arg16[%c24_58, %c0_59], %43 {strides = array<i32>} : memref<36x32xf32, #tpu.memory_space<vmem>>, vector<4x32xf32>,
    %c140 = arith.constant 140 : index
    %c0_60 = arith.constant 0 : index
    %45 = vector.load %arg14[%c140, %c0_60] : memref<256x32xf32, #tpu.memory_space<vmem>>, vector<4x32xf32>
    %c28_61 = arith.constant 28 : index
    %c0_62 = arith.constant 0 : index
    %46 = vector.load %arg16[%c28_61, %c0_62] : memref<36x32xf32, #tpu.memory_space<vmem>>, vector<4x32xf32>
    tpu.vector_store %arg16[%c28_61, %c0_62], %45 {strides = array<i32>} : memref<36x32xf32, #tpu.memory_space<vmem>>, vector<4x32xf32>,
    %c148 = arith.constant 148 : index
    %c0_63 = arith.constant 0 : index
    %47 = vector.load %arg14[%c148, %c0_63] : memref<256x32xf32, #tpu.memory_space<vmem>>, vector<4x32xf32>
    %c32_64 = arith.constant 32 : index
    %c0_65 = arith.constant 0 : index
    %48 = vector.load %arg16[%c32_64, %c0_65] : memref<36x32xf32, #tpu.memory_space<vmem>>, vector<4x32xf32>
    tpu.vector_store %arg16[%c32_64, %c0_65], %47 {strides = array<i32>} : memref<36x32xf32, #tpu.memory_space<vmem>>, vector<4x32xf32>,
    %c0_66 = arith.constant 0 : index
    %c0_67 = arith.constant 0 : index
    %49 = vector.load %arg16[%c0_66, %c0_67] : memref<36x32xf32, #tpu.memory_space<vmem>>, vector<36x32xf32>
    %c1 = arith.constant 1 : index
    %c0_68 = arith.constant 0 : index
    %c0_69 = arith.constant 0 : index
    %50 = vector.load %arg3[%c1, %c0_68, %c0_69] : memref<16x32x64xf32, #tpu.memory_space<vmem>>, vector<1x32x64xf32>
    %51 = vector.shape_cast %50 : vector<1x32x64xf32> to vector<32x64xf32>
    %cst_70 = arith.constant dense<0.000000e+00> : vector<36x64xf32>
    %52 = tpu.matmul %49, %51, %cst_70 {dimension_numbers = #tpu.dot_dimension_numbers<[1], [0], [0], [1], [0, 0, 1, 1], [], []>} : vector<36x32xf32>, vector<32x64xf32>, vector<36x64xf32> -> vector<36x64xf32>
    %53 = arith.addf %30, %52 : vector<36x64xf32>
    %c8_71 = arith.constant 8 : index
    %c0_72 = arith.constant 0 : index
    %54 = vector.load %arg14[%c8_71, %c0_72] : memref<256x32xf32, #tpu.memory_space<vmem>>, vector<4x32xf32>
    %c0_73 = arith.constant 0 : index
    %c0_74 = arith.constant 0 : index
    %55 = vector.load %arg16[%c0_73, %c0_74] : memref<36x32xf32, #tpu.memory_space<vmem>>, vector<4x32xf32>
    tpu.vector_store %arg16[%c0_73, %c0_74], %54 {strides = array<i32>} : memref<36x32xf32, #tpu.memory_space<vmem>>, vector<4x32xf32>,
    %c16_75 = arith.constant 16 : index
    %c0_76 = arith.constant 0 : index
    %56 = vector.load %arg14[%c16_75, %c0_76] : memref<256x32xf32, #tpu.memory_space<vmem>>, vector<4x32xf32>
    %c4_77 = arith.constant 4 : index
    %c0_78 = arith.constant 0 : index
    %57 = vector.load %arg16[%c4_77, %c0_78] : memref<36x32xf32, #tpu.memory_space<vmem>>, vector<4x32xf32>
    tpu.vector_store %arg16[%c4_77, %c0_78], %56 {strides = array<i32>} : memref<36x32xf32, #tpu.memory_space<vmem>>, vector<4x32xf32>,
    %c24_79 = arith.constant 24 : index
    %c0_80 = arith.constant 0 : index
    %58 = vector.load %arg14[%c24_79, %c0_80] : memref<256x32xf32, #tpu.memory_space<vmem>>, vector<4x32xf32>
    %c8_81 = arith.constant 8 : index
    %c0_82 = arith.constant 0 : index
    %59 = vector.load %arg16[%c8_81, %c0_82] : memref<36x32xf32, #tpu.memory_space<vmem>>, vector<4x32xf32>
    tpu.vector_store %arg16[%c8_81, %c0_82], %58 {strides = array<i32>} : memref<36x32xf32, #tpu.memory_space<vmem>>, vector<4x32xf32>,
    %c72_83 = arith.constant 72 : index
    %c0_84 = arith.constant 0 : index
    %60 = vector.load %arg14[%c72_83, %c0_84] : memref<256x32xf32, #tpu.memory_space<vmem>>, vector<4x32xf32>
    %c12_85 = arith.constant 12 : index
    %c0_86 = arith.constant 0 : index
    %61 = vector.load %arg16[%c12_85, %c0_86] : memref<36x32xf32, #tpu.memory_space<vmem>>, vector<4x32xf32>
    tpu.vector_store %arg16[%c12_85, %c0_86], %60 {strides = array<i32>} : memref<36x32xf32, #tpu.memory_space<vmem>>, vector<4x32xf32>,
    %c80_87 = arith.constant 80 : index
    %c0_88 = arith.constant 0 : index
    %62 = vector.load %arg14[%c80_87, %c0_88] : memref<256x32xf32, #tpu.memory_space<vmem>>, vector<4x32xf32>
    %c16_89 = arith.constant 16 : index
    %c0_90 = arith.constant 0 : index
    %63 = vector.load %arg16[%c16_89, %c0_90] : memref<36x32xf32, #tpu.memory_space<vmem>>, vector<4x32xf32>
    tpu.vector_store %arg16[%c16_89, %c0_90], %62 {strides = array<i32>} : memref<36x32xf32, #tpu.memory_space<vmem>>, vector<4x32xf32>,
    %c88 = arith.constant 88 : index
    %c0_91 = arith.constant 0 : index
    %64 = vector.load %arg14[%c88, %c0_91] : memref<256x32xf32, #tpu.memory_space<vmem>>, vector<4x32xf32>
    %c20_92 = arith.constant 20 : index
    %c0_93 = arith.constant 0 : index
    %65 = vector.load %arg16[%c20_92, %c0_93] : memref<36x32xf32, #tpu.memory_space<vmem>>, vector<4x32xf32>
    tpu.vector_store %arg16[%c20_92, %c0_93], %64 {strides = array<i32>} : memref<36x32xf32, #tpu.memory_space<vmem>>, vector<4x32xf32>,
    %c136_94 = arith.constant 136 : index
    %c0_95 = arith.constant 0 : index
    %66 = vector.load %arg14[%c136_94, %c0_95] : memref<256x32xf32, #tpu.memory_space<vmem>>, vector<4x32xf32>
    %c24_96 = arith.constant 24 : index
    %c0_97 = arith.constant 0 : index
    %67 = vector.load %arg16[%c24_96, %c0_97] : memref<36x32xf32, #tpu.memory_space<vmem>>, vector<4x32xf32>
    tpu.vector_store %arg16[%c24_96, %c0_97], %66 {strides = array<i32>} : memref<36x32xf32, #tpu.memory_space<vmem>>, vector<4x32xf32>,
    %c144_98 = arith.constant 144 : index
    %c0_99 = arith.constant 0 : index
    %68 = vector.load %arg14[%c144_98, %c0_99] : memref<256x32xf32, #tpu.memory_space<vmem>>, vector<4x32xf32>
    %c28_100 = arith.constant 28 : index
    %c0_101 = arith.constant 0 : index
    %69 = vector.load %arg16[%c28_100, %c0_101] : memref<36x32xf32, #tpu.memory_space<vmem>>, vector<4x32xf32>
    tpu.vector_store %arg16[%c28_100, %c0_101], %68 {strides = array<i32>} : memref<36x32xf32, #tpu.memory_space<vmem>>, vector<4x32xf32>,
    %c152 = arith.constant 152 : index
    %c0_102 = arith.constant 0 : index
    %70 = vector.load %arg14[%c152, %c0_102] : memref<256x32xf32, #tpu.memory_space<vmem>>, vector<4x32xf32>
    %c32_103 = arith.constant 32 : index
    %c0_104 = arith.constant 0 : index
    %71 = vector.load %arg16[%c32_103, %c0_104] : memref<36x32xf32, #tpu.memory_space<vmem>>, vector<4x32xf32>
    tpu.vector_store %arg16[%c32_103, %c0_104], %70 {strides = array<i32>} : memref<36x32xf32, #tpu.memory_space<vmem>>, vector<4x32xf32>,
    %c0_105 = arith.constant 0 : index
    %c0_106 = arith.constant 0 : index
    %72 = vector.load %arg16[%c0_105, %c0_106] : memref<36x32xf32, #tpu.memory_space<vmem>>, vector<36x32xf32>
    %c2 = arith.constant 2 : index
    %c0_107 = arith.constant 0 : index
    %c0_108 = arith.constant 0 : index
    %73 = vector.load %arg3[%c2, %c0_107, %c0_108] : memref<16x32x64xf32, #tpu.memory_space<vmem>>, vector<1x32x64xf32>
    %74 = vector.shape_cast %73 : vector<1x32x64xf32> to vector<32x64xf32>
    %cst_109 = arith.constant dense<0.000000e+00> : vector<36x64xf32>
    %75 = tpu.matmul %72, %74, %cst_109 {dimension_numbers = #tpu.dot_dimension_numbers<[1], [0], [0], [1], [0, 0, 1, 1], [], []>} : vector<36x32xf32>, vector<32x64xf32>, vector<36x64xf32> -> vector<36x64xf32>
    %76 = arith.addf %53, %75 : vector<36x64xf32>
    %c12_110 = arith.constant 12 : index
    %c0_111 = arith.constant 0 : index
    %77 = vector.load %arg14[%c12_110, %c0_111] : memref<256x32xf32, #tpu.memory_space<vmem>>, vector<4x32xf32>
    %c0_112 = arith.constant 0 : index
    %c0_113 = arith.constant 0 : index
    %78 = vector.load %arg16[%c0_112, %c0_113] : memref<36x32xf32, #tpu.memory_space<vmem>>, vector<4x32xf32>
    tpu.vector_store %arg16[%c0_112, %c0_113], %77 {strides = array<i32>} : memref<36x32xf32, #tpu.memory_space<vmem>>, vector<4x32xf32>,
    %c20_114 = arith.constant 20 : index
    %c0_115 = arith.constant 0 : index
    %79 = vector.load %arg14[%c20_114, %c0_115] : memref<256x32xf32, #tpu.memory_space<vmem>>, vector<4x32xf32>
    %c4_116 = arith.constant 4 : index
    %c0_117 = arith.constant 0 : index
    %80 = vector.load %arg16[%c4_116, %c0_117] : memref<36x32xf32, #tpu.memory_space<vmem>>, vector<4x32xf32>
    tpu.vector_store %arg16[%c4_116, %c0_117], %79 {strides = array<i32>} : memref<36x32xf32, #tpu.memory_space<vmem>>, vector<4x32xf32>,
    %c28_118 = arith.constant 28 : index
    %c0_119 = arith.constant 0 : index
    %81 = vector.load %arg14[%c28_118, %c0_119] : memref<256x32xf32, #tpu.memory_space<vmem>>, vector<4x32xf32>
    %c8_120 = arith.constant 8 : index
    %c0_121 = arith.constant 0 : index
    %82 = vector.load %arg16[%c8_120, %c0_121] : memref<36x32xf32, #tpu.memory_space<vmem>>, vector<4x32xf32>
    tpu.vector_store %arg16[%c8_120, %c0_121], %81 {strides = array<i32>} : memref<36x32xf32, #tpu.memory_space<vmem>>, vector<4x32xf32>,
    %c76_122 = arith.constant 76 : index
    %c0_123 = arith.constant 0 : index
    %83 = vector.load %arg14[%c76_122, %c0_123] : memref<256x32xf32, #tpu.memory_space<vmem>>, vector<4x32xf32>
    %c12_124 = arith.constant 12 : index
    %c0_125 = arith.constant 0 : index
    %84 = vector.load %arg16[%c12_124, %c0_125] : memref<36x32xf32, #tpu.memory_space<vmem>>, vector<4x32xf32>
    tpu.vector_store %arg16[%c12_124, %c0_125], %83 {strides = array<i32>} : memref<36x32xf32, #tpu.memory_space<vmem>>, vector<4x32xf32>,
    %c84_126 = arith.constant 84 : index
    %c0_127 = arith.constant 0 : index
    %85 = vector.load %arg14[%c84_126, %c0_127] : memref<256x32xf32, #tpu.memory_space<vmem>>, vector<4x32xf32>
    %c16_128 = arith.constant 16 : index
    %c0_129 = arith.constant 0 : index
    %86 = vector.load %arg16[%c16_128, %c0_129] : memref<36x32xf32, #tpu.memory_space<vmem>>, vector<4x32xf32>
    tpu.vector_store %arg16[%c16_128, %c0_129], %85 {strides = array<i32>} : memref<36x32xf32, #tpu.memory_space<vmem>>, vector<4x32xf32>,
    %c92 = arith.constant 92 : index
    %c0_130 = arith.constant 0 : index
    %87 = vector.load %arg14[%c92, %c0_130] : memref<256x32xf32, #tpu.memory_space<vmem>>, vector<4x32xf32>
    %c20_131 = arith.constant 20 : index
    %c0_132 = arith.constant 0 : index
    %88 = vector.load %arg16[%c20_131, %c0_132] : memref<36x32xf32, #tpu.memory_space<vmem>>, vector<4x32xf32>
    tpu.vector_store %arg16[%c20_131, %c0_132], %87 {strides = array<i32>} : memref<36x32xf32, #tpu.memory_space<vmem>>, vector<4x32xf32>,
    %c140_133 = arith.constant 140 : index
    %c0_134 = arith.constant 0 : index
    %89 = vector.load %arg14[%c140_133, %c0_134] : memref<256x32xf32, #tpu.memory_space<vmem>>, vector<4x32xf32>
    %c24_135 = arith.constant 24 : index
    %c0_136 = arith.constant 0 : index
    %90 = vector.load %arg16[%c24_135, %c0_136] : memref<36x32xf32, #tpu.memory_space<vmem>>, vector<4x32xf32>
    tpu.vector_store %arg16[%c24_135, %c0_136], %89 {strides = array<i32>} : memref<36x32xf32, #tpu.memory_space<vmem>>, vector<4x32xf32>,
    %c148_137 = arith.constant 148 : index
    %c0_138 = arith.constant 0 : index
    %91 = vector.load %arg14[%c148_137, %c0_138] : memref<256x32xf32, #tpu.memory_space<vmem>>, vector<4x32xf32>
    %c28_139 = arith.constant 28 : index
    %c0_140 = arith.constant 0 : index
    %92 = vector.load %arg16[%c28_139, %c0_140] : memref<36x32xf32, #tpu.memory_space<vmem>>, vector<4x32xf32>
    tpu.vector_store %arg16[%c28_139, %c0_140], %91 {strides = array<i32>} : memref<36x32xf32, #tpu.memory_space<vmem>>, vector<4x32xf32>,
    %c156 = arith.constant 156 : index
    %c0_141 = arith.constant 0 : index
    %93 = vector.load %arg14[%c156, %c0_141] : memref<256x32xf32, #tpu.memory_space<vmem>>, vector<4x32xf32>
    %c32_142 = arith.constant 32 : index
    %c0_143 = arith.constant 0 : index
    %94 = vector.load %arg16[%c32_142, %c0_143] : memref<36x32xf32, #tpu.memory_space<vmem>>, vector<4x32xf32>
    tpu.vector_store %arg16[%c32_142, %c0_143], %93 {strides = array<i32>} : memref<36x32xf32, #tpu.memory_space<vmem>>, vector<4x32xf32>,
    %c0_144 = arith.constant 0 : index
    %c0_145 = arith.constant 0 : index
    %95 = vector.load %arg16[%c0_144, %c0_145] : memref<36x32xf32, #tpu.memory_space<vmem>>, vector<36x32xf32>
    %c3 = arith.constant 3 : index
    %c0_146 = arith.constant 0 : index
    %c0_147 = arith.constant 0 : index
    %96 = vector.load %arg3[%c3, %c0_146, %c0_147] : memref<16x32x64xf32, #tpu.memory_space<vmem>>, vector<1x32x64xf32>
    %97 = vector.shape_cast %96 : vector<1x32x64xf32> to vector<32x64xf32>
    %cst_148 = arith.constant dense<0.000000e+00> : vector<36x64xf32>
    %98 = tpu.matmul %95, %97, %cst_148 {dimension_numbers = #tpu.dot_dimension_numbers<[1], [0], [0], [1], [0, 0, 1, 1], [], []>} : vector<36x32xf32>, vector<32x64xf32>, vector<36x64xf32> -> vector<36x64xf32>
    %99 = arith.addf %76, %98 : vector<36x64xf32>
    %c32_149 = arith.constant 32 : index
    %c0_150 = arith.constant 0 : index
    %100 = vector.load %arg14[%c32_149, %c0_150] : memref<256x32xf32, #tpu.memory_space<vmem>>, vector<4x32xf32>
    %c0_151 = arith.constant 0 : index
    %c0_152 = arith.constant 0 : index
    %101 = vector.load %arg16[%c0_151, %c0_152] : memref<36x32xf32, #tpu.memory_space<vmem>>, vector<4x32xf32>
    tpu.vector_store %arg16[%c0_151, %c0_152], %100 {strides = array<i32>} : memref<36x32xf32, #tpu.memory_space<vmem>>, vector<4x32xf32>,
    %c40 = arith.constant 40 : index
    %c0_153 = arith.constant 0 : index
    %102 = vector.load %arg14[%c40, %c0_153] : memref<256x32xf32, #tpu.memory_space<vmem>>, vector<4x32xf32>
    %c4_154 = arith.constant 4 : index
    %c0_155 = arith.constant 0 : index
    %103 = vector.load %arg16[%c4_154, %c0_155] : memref<36x32xf32, #tpu.memory_space<vmem>>, vector<4x32xf32>
    tpu.vector_store %arg16[%c4_154, %c0_155], %102 {strides = array<i32>} : memref<36x32xf32, #tpu.memory_space<vmem>>, vector<4x32xf32>,
    %c48 = arith.constant 48 : index
    %c0_156 = arith.constant 0 : index
    %104 = vector.load %arg14[%c48, %c0_156] : memref<256x32xf32, #tpu.memory_space<vmem>>, vector<4x32xf32>
    %c8_157 = arith.constant 8 : index
    %c0_158 = arith.constant 0 : index
    %105 = vector.load %arg16[%c8_157, %c0_158] : memref<36x32xf32, #tpu.memory_space<vmem>>, vector<4x32xf32>
    tpu.vector_store %arg16[%c8_157, %c0_158], %104 {strides = array<i32>} : memref<36x32xf32, #tpu.memory_space<vmem>>, vector<4x32xf32>,
    %c96 = arith.constant 96 : index
    %c0_159 = arith.constant 0 : index
    %106 = vector.load %arg14[%c96, %c0_159] : memref<256x32xf32, #tpu.memory_space<vmem>>, vector<4x32xf32>
    %c12_160 = arith.constant 12 : index
    %c0_161 = arith.constant 0 : index
    %107 = vector.load %arg16[%c12_160, %c0_161] : memref<36x32xf32, #tpu.memory_space<vmem>>, vector<4x32xf32>
    tpu.vector_store %arg16[%c12_160, %c0_161], %106 {strides = array<i32>} : memref<36x32xf32, #tpu.memory_space<vmem>>, vector<4x32xf32>,
    %c104 = arith.constant 104 : index
    %c0_162 = arith.constant 0 : index
    %108 = vector.load %arg14[%c104, %c0_162] : memref<256x32xf32, #tpu.memory_space<vmem>>, vector<4x32xf32>
    %c16_163 = arith.constant 16 : index
    %c0_164 = arith.constant 0 : index
    %109 = vector.load %arg16[%c16_163, %c0_164] : memref<36x32xf32, #tpu.memory_space<vmem>>, vector<4x32xf32>
    tpu.vector_store %arg16[%c16_163, %c0_164], %108 {strides = array<i32>} : memref<36x32xf32, #tpu.memory_space<vmem>>, vector<4x32xf32>,
    %c112 = arith.constant 112 : index
    %c0_165 = arith.constant 0 : index
    %110 = vector.load %arg14[%c112, %c0_165] : memref<256x32xf32, #tpu.memory_space<vmem>>, vector<4x32xf32>
    %c20_166 = arith.constant 20 : index
    %c0_167 = arith.constant 0 : index
    %111 = vector.load %arg16[%c20_166, %c0_167] : memref<36x32xf32, #tpu.memory_space<vmem>>, vector<4x32xf32>
    tpu.vector_store %arg16[%c20_166, %c0_167], %110 {strides = array<i32>} : memref<36x32xf32, #tpu.memory_space<vmem>>, vector<4x32xf32>,
    %c160 = arith.constant 160 : index
    %c0_168 = arith.constant 0 : index
    %112 = vector.load %arg14[%c160, %c0_168] : memref<256x32xf32, #tpu.memory_space<vmem>>, vector<4x32xf32>
    %c24_169 = arith.constant 24 : index
    %c0_170 = arith.constant 0 : index
    %113 = vector.load %arg16[%c24_169, %c0_170] : memref<36x32xf32, #tpu.memory_space<vmem>>, vector<4x32xf32>
    tpu.vector_store %arg16[%c24_169, %c0_170], %112 {strides = array<i32>} : memref<36x32xf32, #tpu.memory_space<vmem>>, vector<4x32xf32>,
    %c168 = arith.constant 168 : index
    %c0_171 = arith.constant 0 : index
    %114 = vector.load %arg14[%c168, %c0_171] : memref<256x32xf32, #tpu.memory_space<vmem>>, vector<4x32xf32>
    %c28_172 = arith.constant 28 : index
    %c0_173 = arith.constant 0 : index
    %115 = vector.load %arg16[%c28_172, %c0_173] : memref<36x32xf32, #tpu.memory_space<vmem>>, vector<4x32xf32>
    tpu.vector_store %arg16[%c28_172, %c0_173], %114 {strides = array<i32>} : memref<36x32xf32, #tpu.memory_space<vmem>>, vector<4x32xf32>,
    %c176 = arith.constant 176 : index
    %c0_174 = arith.constant 0 : index
    %116 = vector.load %arg14[%c176, %c0_174] : memref<256x32xf32, #tpu.memory_space<vmem>>, vector<4x32xf32>
    %c32_175 = arith.constant 32 : index
    %c0_176 = arith.constant 0 : index
    %117 = vector.load %arg16[%c32_175, %c0_176] : memref<36x32xf32, #tpu.memory_space<vmem>>, vector<4x32xf32>
    tpu.vector_store %arg16[%c32_175, %c0_176], %116 {strides = array<i32>} : memref<36x32xf32, #tpu.memory_space<vmem>>, vector<4x32xf32>,
    %c0_177 = arith.constant 0 : index
    %c0_178 = arith.constant 0 : index
    %118 = vector.load %arg16[%c0_177, %c0_178] : memref<36x32xf32, #tpu.memory_space<vmem>>, vector<36x32xf32>
    %c4_179 = arith.constant 4 : index
    %c0_180 = arith.constant 0 : index
    %c0_181 = arith.constant 0 : index
    %119 = vector.load %arg3[%c4_179, %c0_180, %c0_181] : memref<16x32x64xf32, #tpu.memory_space<vmem>>, vector<1x32x64xf32>
    %120 = vector.shape_cast %119 : vector<1x32x64xf32> to vector<32x64xf32>
    %cst_182 = arith.constant dense<0.000000e+00> : vector<36x64xf32>
    %121 = tpu.matmul %118, %120, %cst_182 {dimension_numbers = #tpu.dot_dimension_numbers<[1], [0], [0], [1], [0, 0, 1, 1], [], []>} : vector<36x32xf32>, vector<32x64xf32>, vector<36x64xf32> -> vector<36x64xf32>
    %122 = arith.addf %99, %121 : vector<36x64xf32>
    %c36 = arith.constant 36 : index
    %c0_183 = arith.constant 0 : index
    %123 = vector.load %arg14[%c36, %c0_183] : memref<256x32xf32, #tpu.memory_space<vmem>>, vector<4x32xf32>
    %c0_184 = arith.constant 0 : index
    %c0_185 = arith.constant 0 : index
    %124 = vector.load %arg16[%c0_184, %c0_185] : memref<36x32xf32, #tpu.memory_space<vmem>>, vector<4x32xf32>
    tpu.vector_store %arg16[%c0_184, %c0_185], %123 {strides = array<i32>} : memref<36x32xf32, #tpu.memory_space<vmem>>, vector<4x32xf32>,
    %c44 = arith.constant 44 : index
    %c0_186 = arith.constant 0 : index
    %125 = vector.load %arg14[%c44, %c0_186] : memref<256x32xf32, #tpu.memory_space<vmem>>, vector<4x32xf32>
    %c4_187 = arith.constant 4 : index
    %c0_188 = arith.constant 0 : index
    %126 = vector.load %arg16[%c4_187, %c0_188] : memref<36x32xf32, #tpu.memory_space<vmem>>, vector<4x32xf32>
    tpu.vector_store %arg16[%c4_187, %c0_188], %125 {strides = array<i32>} : memref<36x32xf32, #tpu.memory_space<vmem>>, vector<4x32xf32>,
    %c52 = arith.constant 52 : index
    %c0_189 = arith.constant 0 : index
    %127 = vector.load %arg14[%c52, %c0_189] : memref<256x32xf32, #tpu.memory_space<vmem>>, vector<4x32xf32>
    %c8_190 = arith.constant 8 : index
    %c0_191 = arith.constant 0 : index
    %128 = vector.load %arg16[%c8_190, %c0_191] : memref<36x32xf32, #tpu.memory_space<vmem>>, vector<4x32xf32>
    tpu.vector_store %arg16[%c8_190, %c0_191], %127 {strides = array<i32>} : memref<36x32xf32, #tpu.memory_space<vmem>>, vector<4x32xf32>,
    %c100 = arith.constant 100 : index
    %c0_192 = arith.constant 0 : index
    %129 = vector.load %arg14[%c100, %c0_192] : memref<256x32xf32, #tpu.memory_space<vmem>>, vector<4x32xf32>
    %c12_193 = arith.constant 12 : index
    %c0_194 = arith.constant 0 : index
    %130 = vector.load %arg16[%c12_193, %c0_194] : memref<36x32xf32, #tpu.memory_space<vmem>>, vector<4x32xf32>
    tpu.vector_store %arg16[%c12_193, %c0_194], %129 {strides = array<i32>} : memref<36x32xf32, #tpu.memory_space<vmem>>, vector<4x32xf32>,
    %c108 = arith.constant 108 : index
    %c0_195 = arith.constant 0 : index
    %131 = vector.load %arg14[%c108, %c0_195] : memref<256x32xf32, #tpu.memory_space<vmem>>, vector<4x32xf32>
    %c16_196 = arith.constant 16 : index
    %c0_197 = arith.constant 0 : index
    %132 = vector.load %arg16[%c16_196, %c0_197] : memref<36x32xf32, #tpu.memory_space<vmem>>, vector<4x32xf32>
    tpu.vector_store %arg16[%c16_196, %c0_197], %131 {strides = array<i32>} : memref<36x32xf32, #tpu.memory_space<vmem>>, vector<4x32xf32>,
    %c116 = arith.constant 116 : index
    %c0_198 = arith.constant 0 : index
    %133 = vector.load %arg14[%c116, %c0_198] : memref<256x32xf32, #tpu.memory_space<vmem>>, vector<4x32xf32>
    %c20_199 = arith.constant 20 : index
    %c0_200 = arith.constant 0 : index
    %134 = vector.load %arg16[%c20_199, %c0_200] : memref<36x32xf32, #tpu.memory_space<vmem>>, vector<4x32xf32>
    tpu.vector_store %arg16[%c20_199, %c0_200], %133 {strides = array<i32>} : memref<36x32xf32, #tpu.memory_space<vmem>>, vector<4x32xf32>,
    %c164 = arith.constant 164 : index
    %c0_201 = arith.constant 0 : index
    %135 = vector.load %arg14[%c164, %c0_201] : memref<256x32xf32, #tpu.memory_space<vmem>>, vector<4x32xf32>
    %c24_202 = arith.constant 24 : index
    %c0_203 = arith.constant 0 : index
    %136 = vector.load %arg16[%c24_202, %c0_203] : memref<36x32xf32, #tpu.memory_space<vmem>>, vector<4x32xf32>
    tpu.vector_store %arg16[%c24_202, %c0_203], %135 {strides = array<i32>} : memref<36x32xf32, #tpu.memory_space<vmem>>, vector<4x32xf32>,
    %c172 = arith.constant 172 : index
    %c0_204 = arith.constant 0 : index
    %137 = vector.load %arg14[%c172, %c0_204] : memref<256x32xf32, #tpu.memory_space<vmem>>, vector<4x32xf32>
    %c28_205 = arith.constant 28 : index
    %c0_206 = arith.constant 0 : index
    %138 = vector.load %arg16[%c28_205, %c0_206] : memref<36x32xf32, #tpu.memory_space<vmem>>, vector<4x32xf32>
    tpu.vector_store %arg16[%c28_205, %c0_206], %137 {strides = array<i32>} : memref<36x32xf32, #tpu.memory_space<vmem>>, vector<4x32xf32>,
    %c180 = arith.constant 180 : index
    %c0_207 = arith.constant 0 : index
    %139 = vector.load %arg14[%c180, %c0_207] : memref<256x32xf32, #tpu.memory_space<vmem>>, vector<4x32xf32>
    %c32_208 = arith.constant 32 : index
    %c0_209 = arith.constant 0 : index
    %140 = vector.load %arg16[%c32_208, %c0_209] : memref<36x32xf32, #tpu.memory_space<vmem>>, vector<4x32xf32>
    tpu.vector_store %arg16[%c32_208, %c0_209], %139 {strides = array<i32>} : memref<36x32xf32, #tpu.memory_space<vmem>>, vector<4x32xf32>,
    %c0_210 = arith.constant 0 : index
    %c0_211 = arith.constant 0 : index
    %141 = vector.load %arg16[%c0_210, %c0_211] : memref<36x32xf32, #tpu.memory_space<vmem>>, vector<36x32xf32>
    %c5 = arith.constant 5 : index
    %c0_212 = arith.constant 0 : index
    %c0_213 = arith.constant 0 : index
    %142 = vector.load %arg3[%c5, %c0_212, %c0_213] : memref<16x32x64xf32, #tpu.memory_space<vmem>>, vector<1x32x64xf32>
    %143 = vector.shape_cast %142 : vector<1x32x64xf32> to vector<32x64xf32>
    %cst_214 = arith.constant dense<0.000000e+00> : vector<36x64xf32>
    %144 = tpu.matmul %141, %143, %cst_214 {dimension_numbers = #tpu.dot_dimension_numbers<[1], [0], [0], [1], [0, 0, 1, 1], [], []>} : vector<36x32xf32>, vector<32x64xf32>, vector<36x64xf32> -> vector<36x64xf32>
    %145 = arith.addf %122, %144 : vector<36x64xf32>
    %c40_215 = arith.constant 40 : index
    %c0_216 = arith.constant 0 : index
    %146 = vector.load %arg14[%c40_215, %c0_216] : memref<256x32xf32, #tpu.memory_space<vmem>>, vector<4x32xf32>
    %c0_217 = arith.constant 0 : index
    %c0_218 = arith.constant 0 : index
    %147 = vector.load %arg16[%c0_217, %c0_218] : memref<36x32xf32, #tpu.memory_space<vmem>>, vector<4x32xf32>
    tpu.vector_store %arg16[%c0_217, %c0_218], %146 {strides = array<i32>} : memref<36x32xf32, #tpu.memory_space<vmem>>, vector<4x32xf32>,
    %c48_219 = arith.constant 48 : index
    %c0_220 = arith.constant 0 : index
    %148 = vector.load %arg14[%c48_219, %c0_220] : memref<256x32xf32, #tpu.memory_space<vmem>>, vector<4x32xf32>
    %c4_221 = arith.constant 4 : index
    %c0_222 = arith.constant 0 : index
    %149 = vector.load %arg16[%c4_221, %c0_222] : memref<36x32xf32, #tpu.memory_space<vmem>>, vector<4x32xf32>
    tpu.vector_store %arg16[%c4_221, %c0_222], %148 {strides = array<i32>} : memref<36x32xf32, #tpu.memory_space<vmem>>, vector<4x32xf32>,
    %c56 = arith.constant 56 : index
    %c0_223 = arith.constant 0 : index
    %150 = vector.load %arg14[%c56, %c0_223] : memref<256x32xf32, #tpu.memory_space<vmem>>, vector<4x32xf32>
    %c8_224 = arith.constant 8 : index
    %c0_225 = arith.constant 0 : index
    %151 = vector.load %arg16[%c8_224, %c0_225] : memref<36x32xf32, #tpu.memory_space<vmem>>, vector<4x32xf32>
    tpu.vector_store %arg16[%c8_224, %c0_225], %150 {strides = array<i32>} : memref<36x32xf32, #tpu.memory_space<vmem>>, vector<4x32xf32>,
    %c104_226 = arith.constant 104 : index
    %c0_227 = arith.constant 0 : index
    %152 = vector.load %arg14[%c104_226, %c0_227] : memref<256x32xf32, #tpu.memory_space<vmem>>, vector<4x32xf32>
    %c12_228 = arith.constant 12 : index
    %c0_229 = arith.constant 0 : index
    %153 = vector.load %arg16[%c12_228, %c0_229] : memref<36x32xf32, #tpu.memory_space<vmem>>, vector<4x32xf32>
    tpu.vector_store %arg16[%c12_228, %c0_229], %152 {strides = array<i32>} : memref<36x32xf32, #tpu.memory_space<vmem>>, vector<4x32xf32>,
    %c112_230 = arith.constant 112 : index
    %c0_231 = arith.constant 0 : index
    %154 = vector.load %arg14[%c112_230, %c0_231] : memref<256x32xf32, #tpu.memory_space<vmem>>, vector<4x32xf32>
    %c16_232 = arith.constant 16 : index
    %c0_233 = arith.constant 0 : index
    %155 = vector.load %arg16[%c16_232, %c0_233] : memref<36x32xf32, #tpu.memory_space<vmem>>, vector<4x32xf32>
    tpu.vector_store %arg16[%c16_232, %c0_233], %154 {strides = array<i32>} : memref<36x32xf32, #tpu.memory_space<vmem>>, vector<4x32xf32>,
    %c120 = arith.constant 120 : index
    %c0_234 = arith.constant 0 : index
    %156 = vector.load %arg14[%c120, %c0_234] : memref<256x32xf32, #tpu.memory_space<vmem>>, vector<4x32xf32>
    %c20_235 = arith.constant 20 : index
    %c0_236 = arith.constant 0 : index
    %157 = vector.load %arg16[%c20_235, %c0_236] : memref<36x32xf32, #tpu.memory_space<vmem>>, vector<4x32xf32>
    tpu.vector_store %arg16[%c20_235, %c0_236], %156 {strides = array<i32>} : memref<36x32xf32, #tpu.memory_space<vmem>>, vector<4x32xf32>,
    %c168_237 = arith.constant 168 : index
    %c0_238 = arith.constant 0 : index
    %158 = vector.load %arg14[%c168_237, %c0_238] : memref<256x32xf32, #tpu.memory_space<vmem>>, vector<4x32xf32>
    %c24_239 = arith.constant 24 : index
    %c0_240 = arith.constant 0 : index
    %159 = vector.load %arg16[%c24_239, %c0_240] : memref<36x32xf32, #tpu.memory_space<vmem>>, vector<4x32xf32>
    tpu.vector_store %arg16[%c24_239, %c0_240], %158 {strides = array<i32>} : memref<36x32xf32, #tpu.memory_space<vmem>>, vector<4x32xf32>,
    %c176_241 = arith.constant 176 : index
    %c0_242 = arith.constant 0 : index
    %160 = vector.load %arg14[%c176_241, %c0_242] : memref<256x32xf32, #tpu.memory_space<vmem>>, vector<4x32xf32>
    %c28_243 = arith.constant 28 : index
    %c0_244 = arith.constant 0 : index
    %161 = vector.load %arg16[%c28_243, %c0_244] : memref<36x32xf32, #tpu.memory_space<vmem>>, vector<4x32xf32>
    tpu.vector_store %arg16[%c28_243, %c0_244], %160 {strides = array<i32>} : memref<36x32xf32, #tpu.memory_space<vmem>>, vector<4x32xf32>,
    %c184 = arith.constant 184 : index
    %c0_245 = arith.constant 0 : index
    %162 = vector.load %arg14[%c184, %c0_245] : memref<256x32xf32, #tpu.memory_space<vmem>>, vector<4x32xf32>
    %c32_246 = arith.constant 32 : index
    %c0_247 = arith.constant 0 : index
    %163 = vector.load %arg16[%c32_246, %c0_247] : memref<36x32xf32, #tpu.memory_space<vmem>>, vector<4x32xf32>
    tpu.vector_store %arg16[%c32_246, %c0_247], %162 {strides = array<i32>} : memref<36x32xf32, #tpu.memory_space<vmem>>, vector<4x32xf32>,
    %c0_248 = arith.constant 0 : index
    %c0_249 = arith.constant 0 : index
    %164 = vector.load %arg16[%c0_248, %c0_249] : memref<36x32xf32, #tpu.memory_space<vmem>>, vector<36x32xf32>
    %c6 = arith.constant 6 : index
    %c0_250 = arith.constant 0 : index
    %c0_251 = arith.constant 0 : index
    %165 = vector.load %arg3[%c6, %c0_250, %c0_251] : memref<16x32x64xf32, #tpu.memory_space<vmem>>, vector<1x32x64xf32>
    %166 = vector.shape_cast %165 : vector<1x32x64xf32> to vector<32x64xf32>
    %cst_252 = arith.constant dense<0.000000e+00> : vector<36x64xf32>
    %167 = tpu.matmul %164, %166, %cst_252 {dimension_numbers = #tpu.dot_dimension_numbers<[1], [0], [0], [1], [0, 0, 1, 1], [], []>} : vector<36x32xf32>, vector<32x64xf32>, vector<36x64xf32> -> vector<36x64xf32>
    %168 = arith.addf %145, %167 : vector<36x64xf32>
    %c44_253 = arith.constant 44 : index
    %c0_254 = arith.constant 0 : index
    %169 = vector.load %arg14[%c44_253, %c0_254] : memref<256x32xf32, #tpu.memory_space<vmem>>, vector<4x32xf32>
    %c0_255 = arith.constant 0 : index
    %c0_256 = arith.constant 0 : index
    %170 = vector.load %arg16[%c0_255, %c0_256] : memref<36x32xf32, #tpu.memory_space<vmem>>, vector<4x32xf32>
    tpu.vector_store %arg16[%c0_255, %c0_256], %169 {strides = array<i32>} : memref<36x32xf32, #tpu.memory_space<vmem>>, vector<4x32xf32>,
    %c52_257 = arith.constant 52 : index
    %c0_258 = arith.constant 0 : index
    %171 = vector.load %arg14[%c52_257, %c0_258] : memref<256x32xf32, #tpu.memory_space<vmem>>, vector<4x32xf32>
    %c4_259 = arith.constant 4 : index
    %c0_260 = arith.constant 0 : index
    %172 = vector.load %arg16[%c4_259, %c0_260] : memref<36x32xf32, #tpu.memory_space<vmem>>, vector<4x32xf32>
    tpu.vector_store %arg16[%c4_259, %c0_260], %171 {strides = array<i32>} : memref<36x32xf32, #tpu.memory_space<vmem>>, vector<4x32xf32>,
    %c60 = arith.constant 60 : index
    %c0_261 = arith.constant 0 : index
    %173 = vector.load %arg14[%c60, %c0_261] : memref<256x32xf32, #tpu.memory_space<vmem>>, vector<4x32xf32>
    %c8_262 = arith.constant 8 : index
    %c0_263 = arith.constant 0 : index
    %174 = vector.load %arg16[%c8_262, %c0_263] : memref<36x32xf32, #tpu.memory_space<vmem>>, vector<4x32xf32>
    tpu.vector_store %arg16[%c8_262, %c0_263], %173 {strides = array<i32>} : memref<36x32xf32, #tpu.memory_space<vmem>>, vector<4x32xf32>,
    %c108_264 = arith.constant 108 : index
    %c0_265 = arith.constant 0 : index
    %175 = vector.load %arg14[%c108_264, %c0_265] : memref<256x32xf32, #tpu.memory_space<vmem>>, vector<4x32xf32>
    %c12_266 = arith.constant 12 : index
    %c0_267 = arith.constant 0 : index
    %176 = vector.load %arg16[%c12_266, %c0_267] : memref<36x32xf32, #tpu.memory_space<vmem>>, vector<4x32xf32>
    tpu.vector_store %arg16[%c12_266, %c0_267], %175 {strides = array<i32>} : memref<36x32xf32, #tpu.memory_space<vmem>>, vector<4x32xf32>,
    %c116_268 = arith.constant 116 : index
    %c0_269 = arith.constant 0 : index
    %177 = vector.load %arg14[%c116_268, %c0_269] : memref<256x32xf32, #tpu.memory_space<vmem>>, vector<4x32xf32>
    %c16_270 = arith.constant 16 : index
    %c0_271 = arith.constant 0 : index
    %178 = vector.load %arg16[%c16_270, %c0_271] : memref<36x32xf32, #tpu.memory_space<vmem>>, vector<4x32xf32>
    tpu.vector_store %arg16[%c16_270, %c0_271], %177 {strides = array<i32>} : memref<36x32xf32, #tpu.memory_space<vmem>>, vector<4x32xf32>,
    %c124 = arith.constant 124 : index
    %c0_272 = arith.constant 0 : index
    %179 = vector.load %arg14[%c124, %c0_272] : memref<256x32xf32, #tpu.memory_space<vmem>>, vector<4x32xf32>
    %c20_273 = arith.constant 20 : index
    %c0_274 = arith.constant 0 : index
    %180 = vector.load %arg16[%c20_273, %c0_274] : memref<36x32xf32, #tpu.memory_space<vmem>>, vector<4x32xf32>
    tpu.vector_store %arg16[%c20_273, %c0_274], %179 {strides = array<i32>} : memref<36x32xf32, #tpu.memory_space<vmem>>, vector<4x32xf32>,
    %c172_275 = arith.constant 172 : index
    %c0_276 = arith.constant 0 : index
    %181 = vector.load %arg14[%c172_275, %c0_276] : memref<256x32xf32, #tpu.memory_space<vmem>>, vector<4x32xf32>
    %c24_277 = arith.constant 24 : index
    %c0_278 = arith.constant 0 : index
    %182 = vector.load %arg16[%c24_277, %c0_278] : memref<36x32xf32, #tpu.memory_space<vmem>>, vector<4x32xf32>
    tpu.vector_store %arg16[%c24_277, %c0_278], %181 {strides = array<i32>} : memref<36x32xf32, #tpu.memory_space<vmem>>, vector<4x32xf32>,
    %c180_279 = arith.constant 180 : index
    %c0_280 = arith.constant 0 : index
    %183 = vector.load %arg14[%c180_279, %c0_280] : memref<256x32xf32, #tpu.memory_space<vmem>>, vector<4x32xf32>
    %c28_281 = arith.constant 28 : index
    %c0_282 = arith.constant 0 : index
    %184 = vector.load %arg16[%c28_281, %c0_282] : memref<36x32xf32, #tpu.memory_space<vmem>>, vector<4x32xf32>
    tpu.vector_store %arg16[%c28_281, %c0_282], %183 {strides = array<i32>} : memref<36x32xf32, #tpu.memory_space<vmem>>, vector<4x32xf32>,
    %c188 = arith.constant 188 : index
    %c0_283 = arith.constant 0 : index
    %185 = vector.load %arg14[%c188, %c0_283] : memref<256x32xf32, #tpu.memory_space<vmem>>, vector<4x32xf32>
    %c32_284 = arith.constant 32 : index
    %c0_285 = arith.constant 0 : index
    %186 = vector.load %arg16[%c32_284, %c0_285] : memref<36x32xf32, #tpu.memory_space<vmem>>, vector<4x32xf32>
    tpu.vector_store %arg16[%c32_284, %c0_285], %185 {strides = array<i32>} : memref<36x32xf32, #tpu.memory_space<vmem>>, vector<4x32xf32>,
    %c0_286 = arith.constant 0 : index
    %c0_287 = arith.constant 0 : index
    %187 = vector.load %arg16[%c0_286, %c0_287] : memref<36x32xf32, #tpu.memory_space<vmem>>, vector<36x32xf32>
    %c7 = arith.constant 7 : index
    %c0_288 = arith.constant 0 : index
    %c0_289 = arith.constant 0 : index
    %188 = vector.load %arg3[%c7, %c0_288, %c0_289] : memref<16x32x64xf32, #tpu.memory_space<vmem>>, vector<1x32x64xf32>
    %189 = vector.shape_cast %188 : vector<1x32x64xf32> to vector<32x64xf32>
    %cst_290 = arith.constant dense<0.000000e+00> : vector<36x64xf32>
    %190 = tpu.matmul %187, %189, %cst_290 {dimension_numbers = #tpu.dot_dimension_numbers<[1], [0], [0], [1], [0, 0, 1, 1], [], []>} : vector<36x32xf32>, vector<32x64xf32>, vector<36x64xf32> -> vector<36x64xf32>
    %191 = arith.addf %168, %190 : vector<36x64xf32>
    %c64_291 = arith.constant 64 : index
    %c0_292 = arith.constant 0 : index
    %192 = vector.load %arg14[%c64_291, %c0_292] : memref<256x32xf32, #tpu.memory_space<vmem>>, vector<4x32xf32>
    %c0_293 = arith.constant 0 : index
    %c0_294 = arith.constant 0 : index
    %193 = vector.load %arg16[%c0_293, %c0_294] : memref<36x32xf32, #tpu.memory_space<vmem>>, vector<4x32xf32>
    tpu.vector_store %arg16[%c0_293, %c0_294], %192 {strides = array<i32>} : memref<36x32xf32, #tpu.memory_space<vmem>>, vector<4x32xf32>,
    %c72_295 = arith.constant 72 : index
    %c0_296 = arith.constant 0 : index
    %194 = vector.load %arg14[%c72_295, %c0_296] : memref<256x32xf32, #tpu.memory_space<vmem>>, vector<4x32xf32>
    %c4_297 = arith.constant 4 : index
    %c0_298 = arith.constant 0 : index
    %195 = vector.load %arg16[%c4_297, %c0_298] : memref<36x32xf32, #tpu.memory_space<vmem>>, vector<4x32xf32>
    tpu.vector_store %arg16[%c4_297, %c0_298], %194 {strides = array<i32>} : memref<36x32xf32, #tpu.memory_space<vmem>>, vector<4x32xf32>,
    %c80_299 = arith.constant 80 : index
    %c0_300 = arith.constant 0 : index
    %196 = vector.load %arg14[%c80_299, %c0_300] : memref<256x32xf32, #tpu.memory_space<vmem>>, vector<4x32xf32>
    %c8_301 = arith.constant 8 : index
    %c0_302 = arith.constant 0 : index
    %197 = vector.load %arg16[%c8_301, %c0_302] : memref<36x32xf32, #tpu.memory_space<vmem>>, vector<4x32xf32>
    tpu.vector_store %arg16[%c8_301, %c0_302], %196 {strides = array<i32>} : memref<36x32xf32, #tpu.memory_space<vmem>>, vector<4x32xf32>,
    %c128_303 = arith.constant 128 : index
    %c0_304 = arith.constant 0 : index
    %198 = vector.load %arg14[%c128_303, %c0_304] : memref<256x32xf32, #tpu.memory_space<vmem>>, vector<4x32xf32>
    %c12_305 = arith.constant 12 : index
    %c0_306 = arith.constant 0 : index
    %199 = vector.load %arg16[%c12_305, %c0_306] : memref<36x32xf32, #tpu.memory_space<vmem>>, vector<4x32xf32>
    tpu.vector_store %arg16[%c12_305, %c0_306], %198 {strides = array<i32>} : memref<36x32xf32, #tpu.memory_space<vmem>>, vector<4x32xf32>,
    %c136_307 = arith.constant 136 : index
    %c0_308 = arith.constant 0 : index
    %200 = vector.load %arg14[%c136_307, %c0_308] : memref<256x32xf32, #tpu.memory_space<vmem>>, vector<4x32xf32>
    %c16_309 = arith.constant 16 : index
    %c0_310 = arith.constant 0 : index
    %201 = vector.load %arg16[%c16_309, %c0_310] : memref<36x32xf32, #tpu.memory_space<vmem>>, vector<4x32xf32>
    tpu.vector_store %arg16[%c16_309, %c0_310], %200 {strides = array<i32>} : memref<36x32xf32, #tpu.memory_space<vmem>>, vector<4x32xf32>,
    %c144_311 = arith.constant 144 : index
    %c0_312 = arith.constant 0 : index
    %202 = vector.load %arg14[%c144_311, %c0_312] : memref<256x32xf32, #tpu.memory_space<vmem>>, vector<4x32xf32>
    %c20_313 = arith.constant 20 : index
    %c0_314 = arith.constant 0 : index
    %203 = vector.load %arg16[%c20_313, %c0_314] : memref<36x32xf32, #tpu.memory_space<vmem>>, vector<4x32xf32>
    tpu.vector_store %arg16[%c20_313, %c0_314], %202 {strides = array<i32>} : memref<36x32xf32, #tpu.memory_space<vmem>>, vector<4x32xf32>,
    %c192 = arith.constant 192 : index
    %c0_315 = arith.constant 0 : index
    %204 = vector.load %arg14[%c192, %c0_315] : memref<256x32xf32, #tpu.memory_space<vmem>>, vector<4x32xf32>
    %c24_316 = arith.constant 24 : index
    %c0_317 = arith.constant 0 : index
    %205 = vector.load %arg16[%c24_316, %c0_317] : memref<36x32xf32, #tpu.memory_space<vmem>>, vector<4x32xf32>
    tpu.vector_store %arg16[%c24_316, %c0_317], %204 {strides = array<i32>} : memref<36x32xf32, #tpu.memory_space<vmem>>, vector<4x32xf32>,
    %c200 = arith.constant 200 : index
    %c0_318 = arith.constant 0 : index
    %206 = vector.load %arg14[%c200, %c0_318] : memref<256x32xf32, #tpu.memory_space<vmem>>, vector<4x32xf32>
    %c28_319 = arith.constant 28 : index
    %c0_320 = arith.constant 0 : index
    %207 = vector.load %arg16[%c28_319, %c0_320] : memref<36x32xf32, #tpu.memory_space<vmem>>, vector<4x32xf32>
    tpu.vector_store %arg16[%c28_319, %c0_320], %206 {strides = array<i32>} : memref<36x32xf32, #tpu.memory_space<vmem>>, vector<4x32xf32>,
    %c208 = arith.constant 208 : index
    %c0_321 = arith.constant 0 : index
    %208 = vector.load %arg14[%c208, %c0_321] : memref<256x32xf32, #tpu.memory_space<vmem>>, vector<4x32xf32>
    %c32_322 = arith.constant 32 : index
    %c0_323 = arith.constant 0 : index
    %209 = vector.load %arg16[%c32_322, %c0_323] : memref<36x32xf32, #tpu.memory_space<vmem>>, vector<4x32xf32>
    tpu.vector_store %arg16[%c32_322, %c0_323], %208 {strides = array<i32>} : memref<36x32xf32, #tpu.memory_space<vmem>>, vector<4x32xf32>,
    %c0_324 = arith.constant 0 : index
    %c0_325 = arith.constant 0 : index
    %210 = vector.load %arg16[%c0_324, %c0_325] : memref<36x32xf32, #tpu.memory_space<vmem>>, vector<36x32xf32>
    %c8_326 = arith.constant 8 : index
    %c0_327 = arith.constant 0 : index
    %c0_328 = arith.constant 0 : index
    %211 = vector.load %arg3[%c8_326, %c0_327, %c0_328] : memref<16x32x64xf32, #tpu.memory_space<vmem>>, vector<1x32x64xf32>
    %212 = vector.shape_cast %211 : vector<1x32x64xf32> to vector<32x64xf32>
    %cst_329 = arith.constant dense<0.000000e+00> : vector<36x64xf32>
    %213 = tpu.matmul %210, %212, %cst_329 {dimension_numbers = #tpu.dot_dimension_numbers<[1], [0], [0], [1], [0, 0, 1, 1], [], []>} : vector<36x32xf32>, vector<32x64xf32>, vector<36x64xf32> -> vector<36x64xf32>
    %214 = arith.addf %191, %213 : vector<36x64xf32>
    %c68_330 = arith.constant 68 : index
    %c0_331 = arith.constant 0 : index
    %215 = vector.load %arg14[%c68_330, %c0_331] : memref<256x32xf32, #tpu.memory_space<vmem>>, vector<4x32xf32>
    %c0_332 = arith.constant 0 : index
    %c0_333 = arith.constant 0 : index
    %216 = vector.load %arg16[%c0_332, %c0_333] : memref<36x32xf32, #tpu.memory_space<vmem>>, vector<4x32xf32>
    tpu.vector_store %arg16[%c0_332, %c0_333], %215 {strides = array<i32>} : memref<36x32xf32, #tpu.memory_space<vmem>>, vector<4x32xf32>,
    %c76_334 = arith.constant 76 : index
    %c0_335 = arith.constant 0 : index
    %217 = vector.load %arg14[%c76_334, %c0_335] : memref<256x32xf32, #tpu.memory_space<vmem>>, vector<4x32xf32>
    %c4_336 = arith.constant 4 : index
    %c0_337 = arith.constant 0 : index
    %218 = vector.load %arg16[%c4_336, %c0_337] : memref<36x32xf32, #tpu.memory_space<vmem>>, vector<4x32xf32>
    tpu.vector_store %arg16[%c4_336, %c0_337], %217 {strides = array<i32>} : memref<36x32xf32, #tpu.memory_space<vmem>>, vector<4x32xf32>,
    %c84_338 = arith.constant 84 : index
    %c0_339 = arith.constant 0 : index
    %219 = vector.load %arg14[%c84_338, %c0_339] : memref<256x32xf32, #tpu.memory_space<vmem>>, vector<4x32xf32>
    %c8_340 = arith.constant 8 : index
    %c0_341 = arith.constant 0 : index
    %220 = vector.load %arg16[%c8_340, %c0_341] : memref<36x32xf32, #tpu.memory_space<vmem>>, vector<4x32xf32>
    tpu.vector_store %arg16[%c8_340, %c0_341], %219 {strides = array<i32>} : memref<36x32xf32, #tpu.memory_space<vmem>>, vector<4x32xf32>,
    %c132_342 = arith.constant 132 : index
    %c0_343 = arith.constant 0 : index
    %221 = vector.load %arg14[%c132_342, %c0_343] : memref<256x32xf32, #tpu.memory_space<vmem>>, vector<4x32xf32>
    %c12_344 = arith.constant 12 : index
    %c0_345 = arith.constant 0 : index
    %222 = vector.load %arg16[%c12_344, %c0_345] : memref<36x32xf32, #tpu.memory_space<vmem>>, vector<4x32xf32>
    tpu.vector_store %arg16[%c12_344, %c0_345], %221 {strides = array<i32>} : memref<36x32xf32, #tpu.memory_space<vmem>>, vector<4x32xf32>,
    %c140_346 = arith.constant 140 : index
    %c0_347 = arith.constant 0 : index
    %223 = vector.load %arg14[%c140_346, %c0_347] : memref<256x32xf32, #tpu.memory_space<vmem>>, vector<4x32xf32>
    %c16_348 = arith.constant 16 : index
    %c0_349 = arith.constant 0 : index
    %224 = vector.load %arg16[%c16_348, %c0_349] : memref<36x32xf32, #tpu.memory_space<vmem>>, vector<4x32xf32>
    tpu.vector_store %arg16[%c16_348, %c0_349], %223 {strides = array<i32>} : memref<36x32xf32, #tpu.memory_space<vmem>>, vector<4x32xf32>,
    %c148_350 = arith.constant 148 : index
    %c0_351 = arith.constant 0 : index
    %225 = vector.load %arg14[%c148_350, %c0_351] : memref<256x32xf32, #tpu.memory_space<vmem>>, vector<4x32xf32>
    %c20_352 = arith.constant 20 : index
    %c0_353 = arith.constant 0 : index
    %226 = vector.load %arg16[%c20_352, %c0_353] : memref<36x32xf32, #tpu.memory_space<vmem>>, vector<4x32xf32>
    tpu.vector_store %arg16[%c20_352, %c0_353], %225 {strides = array<i32>} : memref<36x32xf32, #tpu.memory_space<vmem>>, vector<4x32xf32>,
    %c196 = arith.constant 196 : index
    %c0_354 = arith.constant 0 : index
    %227 = vector.load %arg14[%c196, %c0_354] : memref<256x32xf32, #tpu.memory_space<vmem>>, vector<4x32xf32>
    %c24_355 = arith.constant 24 : index
    %c0_356 = arith.constant 0 : index
    %228 = vector.load %arg16[%c24_355, %c0_356] : memref<36x32xf32, #tpu.memory_space<vmem>>, vector<4x32xf32>
    tpu.vector_store %arg16[%c24_355, %c0_356], %227 {strides = array<i32>} : memref<36x32xf32, #tpu.memory_space<vmem>>, vector<4x32xf32>,
    %c204 = arith.constant 204 : index
    %c0_357 = arith.constant 0 : index
    %229 = vector.load %arg14[%c204, %c0_357] : memref<256x32xf32, #tpu.memory_space<vmem>>, vector<4x32xf32>
    %c28_358 = arith.constant 28 : index
    %c0_359 = arith.constant 0 : index
    %230 = vector.load %arg16[%c28_358, %c0_359] : memref<36x32xf32, #tpu.memory_space<vmem>>, vector<4x32xf32>
    tpu.vector_store %arg16[%c28_358, %c0_359], %229 {strides = array<i32>} : memref<36x32xf32, #tpu.memory_space<vmem>>, vector<4x32xf32>,
    %c212 = arith.constant 212 : index
    %c0_360 = arith.constant 0 : index
    %231 = vector.load %arg14[%c212, %c0_360] : memref<256x32xf32, #tpu.memory_space<vmem>>, vector<4x32xf32>
    %c32_361 = arith.constant 32 : index
    %c0_362 = arith.constant 0 : index
    %232 = vector.load %arg16[%c32_361, %c0_362] : memref<36x32xf32, #tpu.memory_space<vmem>>, vector<4x32xf32>
    tpu.vector_store %arg16[%c32_361, %c0_362], %231 {strides = array<i32>} : memref<36x32xf32, #tpu.memory_space<vmem>>, vector<4x32xf32>,
    %c0_363 = arith.constant 0 : index
    %c0_364 = arith.constant 0 : index
    %233 = vector.load %arg16[%c0_363, %c0_364] : memref<36x32xf32, #tpu.memory_space<vmem>>, vector<36x32xf32>
    %c9 = arith.constant 9 : index
    %c0_365 = arith.constant 0 : index
    %c0_366 = arith.constant 0 : index
    %234 = vector.load %arg3[%c9, %c0_365, %c0_366] : memref<16x32x64xf32, #tpu.memory_space<vmem>>, vector<1x32x64xf32>
    %235 = vector.shape_cast %234 : vector<1x32x64xf32> to vector<32x64xf32>
    %cst_367 = arith.constant dense<0.000000e+00> : vector<36x64xf32>
    %236 = tpu.matmul %233, %235, %cst_367 {dimension_numbers = #tpu.dot_dimension_numbers<[1], [0], [0], [1], [0, 0, 1, 1], [], []>} : vector<36x32xf32>, vector<32x64xf32>, vector<36x64xf32> -> vector<36x64xf32>
    %237 = arith.addf %214, %236 : vector<36x64xf32>
    %c72_368 = arith.constant 72 : index
    %c0_369 = arith.constant 0 : index
    %238 = vector.load %arg14[%c72_368, %c0_369] : memref<256x32xf32, #tpu.memory_space<vmem>>, vector<4x32xf32>
    %c0_370 = arith.constant 0 : index
    %c0_371 = arith.constant 0 : index
    %239 = vector.load %arg16[%c0_370, %c0_371] : memref<36x32xf32, #tpu.memory_space<vmem>>, vector<4x32xf32>
    tpu.vector_store %arg16[%c0_370, %c0_371], %238 {strides = array<i32>} : memref<36x32xf32, #tpu.memory_space<vmem>>, vector<4x32xf32>,
    %c80_372 = arith.constant 80 : index
    %c0_373 = arith.constant 0 : index
    %240 = vector.load %arg14[%c80_372, %c0_373] : memref<256x32xf32, #tpu.memory_space<vmem>>, vector<4x32xf32>
    %c4_374 = arith.constant 4 : index
    %c0_375 = arith.constant 0 : index
    %241 = vector.load %arg16[%c4_374, %c0_375] : memref<36x32xf32, #tpu.memory_space<vmem>>, vector<4x32xf32>
    tpu.vector_store %arg16[%c4_374, %c0_375], %240 {strides = array<i32>} : memref<36x32xf32, #tpu.memory_space<vmem>>, vector<4x32xf32>,
    %c88_376 = arith.constant 88 : index
    %c0_377 = arith.constant 0 : index
    %242 = vector.load %arg14[%c88_376, %c0_377] : memref<256x32xf32, #tpu.memory_space<vmem>>, vector<4x32xf32>
    %c8_378 = arith.constant 8 : index
    %c0_379 = arith.constant 0 : index
    %243 = vector.load %arg16[%c8_378, %c0_379] : memref<36x32xf32, #tpu.memory_space<vmem>>, vector<4x32xf32>
    tpu.vector_store %arg16[%c8_378, %c0_379], %242 {strides = array<i32>} : memref<36x32xf32, #tpu.memory_space<vmem>>, vector<4x32xf32>,
    %c136_380 = arith.constant 136 : index
    %c0_381 = arith.constant 0 : index
    %244 = vector.load %arg14[%c136_380, %c0_381] : memref<256x32xf32, #tpu.memory_space<vmem>>, vector<4x32xf32>
    %c12_382 = arith.constant 12 : index
    %c0_383 = arith.constant 0 : index
    %245 = vector.load %arg16[%c12_382, %c0_383] : memref<36x32xf32, #tpu.memory_space<vmem>>, vector<4x32xf32>
    tpu.vector_store %arg16[%c12_382, %c0_383], %244 {strides = array<i32>} : memref<36x32xf32, #tpu.memory_space<vmem>>, vector<4x32xf32>,
    %c144_384 = arith.constant 144 : index
    %c0_385 = arith.constant 0 : index
    %246 = vector.load %arg14[%c144_384, %c0_385] : memref<256x32xf32, #tpu.memory_space<vmem>>, vector<4x32xf32>
    %c16_386 = arith.constant 16 : index
    %c0_387 = arith.constant 0 : index
    %247 = vector.load %arg16[%c16_386, %c0_387] : memref<36x32xf32, #tpu.memory_space<vmem>>, vector<4x32xf32>
    tpu.vector_store %arg16[%c16_386, %c0_387], %246 {strides = array<i32>} : memref<36x32xf32, #tpu.memory_space<vmem>>, vector<4x32xf32>,
    %c152_388 = arith.constant 152 : index
    %c0_389 = arith.constant 0 : index
    %248 = vector.load %arg14[%c152_388, %c0_389] : memref<256x32xf32, #tpu.memory_space<vmem>>, vector<4x32xf32>
    %c20_390 = arith.constant 20 : index
    %c0_391 = arith.constant 0 : index
    %249 = vector.load %arg16[%c20_390, %c0_391] : memref<36x32xf32, #tpu.memory_space<vmem>>, vector<4x32xf32>
    tpu.vector_store %arg16[%c20_390, %c0_391], %248 {strides = array<i32>} : memref<36x32xf32, #tpu.memory_space<vmem>>, vector<4x32xf32>,
    %c200_392 = arith.constant 200 : index
    %c0_393 = arith.constant 0 : index
    %250 = vector.load %arg14[%c200_392, %c0_393] : memref<256x32xf32, #tpu.memory_space<vmem>>, vector<4x32xf32>
    %c24_394 = arith.constant 24 : index
    %c0_395 = arith.constant 0 : index
    %251 = vector.load %arg16[%c24_394, %c0_395] : memref<36x32xf32, #tpu.memory_space<vmem>>, vector<4x32xf32>
    tpu.vector_store %arg16[%c24_394, %c0_395], %250 {strides = array<i32>} : memref<36x32xf32, #tpu.memory_space<vmem>>, vector<4x32xf32>,
    %c208_396 = arith.constant 208 : index
    %c0_397 = arith.constant 0 : index
    %252 = vector.load %arg14[%c208_396, %c0_397] : memref<256x32xf32, #tpu.memory_space<vmem>>, vector<4x32xf32>
    %c28_398 = arith.constant 28 : index
    %c0_399 = arith.constant 0 : index
    %253 = vector.load %arg16[%c28_398, %c0_399] : memref<36x32xf32, #tpu.memory_space<vmem>>, vector<4x32xf32>
    tpu.vector_store %arg16[%c28_398, %c0_399], %252 {strides = array<i32>} : memref<36x32xf32, #tpu.memory_space<vmem>>, vector<4x32xf32>,
    %c216 = arith.constant 216 : index
    %c0_400 = arith.constant 0 : index
    %254 = vector.load %arg14[%c216, %c0_400] : memref<256x32xf32, #tpu.memory_space<vmem>>, vector<4x32xf32>
    %c32_401 = arith.constant 32 : index
    %c0_402 = arith.constant 0 : index
    %255 = vector.load %arg16[%c32_401, %c0_402] : memref<36x32xf32, #tpu.memory_space<vmem>>, vector<4x32xf32>
    tpu.vector_store %arg16[%c32_401, %c0_402], %254 {strides = array<i32>} : memref<36x32xf32, #tpu.memory_space<vmem>>, vector<4x32xf32>,
    %c0_403 = arith.constant 0 : index
    %c0_404 = arith.constant 0 : index
    %256 = vector.load %arg16[%c0_403, %c0_404] : memref<36x32xf32, #tpu.memory_space<vmem>>, vector<36x32xf32>
    %c10 = arith.constant 10 : index
    %c0_405 = arith.constant 0 : index
    %c0_406 = arith.constant 0 : index
    %257 = vector.load %arg3[%c10, %c0_405, %c0_406] : memref<16x32x64xf32, #tpu.memory_space<vmem>>, vector<1x32x64xf32>
    %258 = vector.shape_cast %257 : vector<1x32x64xf32> to vector<32x64xf32>
    %cst_407 = arith.constant dense<0.000000e+00> : vector<36x64xf32>
    %259 = tpu.matmul %256, %258, %cst_407 {dimension_numbers = #tpu.dot_dimension_numbers<[1], [0], [0], [1], [0, 0, 1, 1], [], []>} : vector<36x32xf32>, vector<32x64xf32>, vector<36x64xf32> -> vector<36x64xf32>
    %260 = arith.addf %237, %259 : vector<36x64xf32>
    %c76_408 = arith.constant 76 : index
    %c0_409 = arith.constant 0 : index
    %261 = vector.load %arg14[%c76_408, %c0_409] : memref<256x32xf32, #tpu.memory_space<vmem>>, vector<4x32xf32>
    %c0_410 = arith.constant 0 : index
    %c0_411 = arith.constant 0 : index
    %262 = vector.load %arg16[%c0_410, %c0_411] : memref<36x32xf32, #tpu.memory_space<vmem>>, vector<4x32xf32>
    tpu.vector_store %arg16[%c0_410, %c0_411], %261 {strides = array<i32>} : memref<36x32xf32, #tpu.memory_space<vmem>>, vector<4x32xf32>,
    %c84_412 = arith.constant 84 : index
    %c0_413 = arith.constant 0 : index
    %263 = vector.load %arg14[%c84_412, %c0_413] : memref<256x32xf32, #tpu.memory_space<vmem>>, vector<4x32xf32>
    %c4_414 = arith.constant 4 : index
    %c0_415 = arith.constant 0 : index
    %264 = vector.load %arg16[%c4_414, %c0_415] : memref<36x32xf32, #tpu.memory_space<vmem>>, vector<4x32xf32>
    tpu.vector_store %arg16[%c4_414, %c0_415], %263 {strides = array<i32>} : memref<36x32xf32, #tpu.memory_space<vmem>>, vector<4x32xf32>,
    %c92_416 = arith.constant 92 : index
    %c0_417 = arith.constant 0 : index
    %265 = vector.load %arg14[%c92_416, %c0_417] : memref<256x32xf32, #tpu.memory_space<vmem>>, vector<4x32xf32>
    %c8_418 = arith.constant 8 : index
    %c0_419 = arith.constant 0 : index
    %266 = vector.load %arg16[%c8_418, %c0_419] : memref<36x32xf32, #tpu.memory_space<vmem>>, vector<4x32xf32>
    tpu.vector_store %arg16[%c8_418, %c0_419], %265 {strides = array<i32>} : memref<36x32xf32, #tpu.memory_space<vmem>>, vector<4x32xf32>,
    %c140_420 = arith.constant 140 : index
    %c0_421 = arith.constant 0 : index
    %267 = vector.load %arg14[%c140_420, %c0_421] : memref<256x32xf32, #tpu.memory_space<vmem>>, vector<4x32xf32>
    %c12_422 = arith.constant 12 : index
    %c0_423 = arith.constant 0 : index
    %268 = vector.load %arg16[%c12_422, %c0_423] : memref<36x32xf32, #tpu.memory_space<vmem>>, vector<4x32xf32>
    tpu.vector_store %arg16[%c12_422, %c0_423], %267 {strides = array<i32>} : memref<36x32xf32, #tpu.memory_space<vmem>>, vector<4x32xf32>,
    %c148_424 = arith.constant 148 : index
    %c0_425 = arith.constant 0 : index
    %269 = vector.load %arg14[%c148_424, %c0_425] : memref<256x32xf32, #tpu.memory_space<vmem>>, vector<4x32xf32>
    %c16_426 = arith.constant 16 : index
    %c0_427 = arith.constant 0 : index
    %270 = vector.load %arg16[%c16_426, %c0_427] : memref<36x32xf32, #tpu.memory_space<vmem>>, vector<4x32xf32>
    tpu.vector_store %arg16[%c16_426, %c0_427], %269 {strides = array<i32>} : memref<36x32xf32, #tpu.memory_space<vmem>>, vector<4x32xf32>,
    %c156_428 = arith.constant 156 : index
    %c0_429 = arith.constant 0 : index
    %271 = vector.load %arg14[%c156_428, %c0_429] : memref<256x32xf32, #tpu.memory_space<vmem>>, vector<4x32xf32>
    %c20_430 = arith.constant 20 : index
    %c0_431 = arith.constant 0 : index
    %272 = vector.load %arg16[%c20_430, %c0_431] : memref<36x32xf32, #tpu.memory_space<vmem>>, vector<4x32xf32>
    tpu.vector_store %arg16[%c20_430, %c0_431], %271 {strides = array<i32>} : memref<36x32xf32, #tpu.memory_space<vmem>>, vector<4x32xf32>,
    %c204_432 = arith.constant 204 : index
    %c0_433 = arith.constant 0 : index
    %273 = vector.load %arg14[%c204_432, %c0_433] : memref<256x32xf32, #tpu.memory_space<vmem>>, vector<4x32xf32>
    %c24_434 = arith.constant 24 : index
    %c0_435 = arith.constant 0 : index
    %274 = vector.load %arg16[%c24_434, %c0_435] : memref<36x32xf32, #tpu.memory_space<vmem>>, vector<4x32xf32>
    tpu.vector_store %arg16[%c24_434, %c0_435], %273 {strides = array<i32>} : memref<36x32xf32, #tpu.memory_space<vmem>>, vector<4x32xf32>,
    %c212_436 = arith.constant 212 : index
    %c0_437 = arith.constant 0 : index
    %275 = vector.load %arg14[%c212_436, %c0_437] : memref<256x32xf32, #tpu.memory_space<vmem>>, vector<4x32xf32>
    %c28_438 = arith.constant 28 : index
    %c0_439 = arith.constant 0 : index
    %276 = vector.load %arg16[%c28_438, %c0_439] : memref<36x32xf32, #tpu.memory_space<vmem>>, vector<4x32xf32>
    tpu.vector_store %arg16[%c28_438, %c0_439], %275 {strides = array<i32>} : memref<36x32xf32, #tpu.memory_space<vmem>>, vector<4x32xf32>,
    %c220 = arith.constant 220 : index
    %c0_440 = arith.constant 0 : index
    %277 = vector.load %arg14[%c220, %c0_440] : memref<256x32xf32, #tpu.memory_space<vmem>>, vector<4x32xf32>
    %c32_441 = arith.constant 32 : index
    %c0_442 = arith.constant 0 : index
    %278 = vector.load %arg16[%c32_441, %c0_442] : memref<36x32xf32, #tpu.memory_space<vmem>>, vector<4x32xf32>
    tpu.vector_store %arg16[%c32_441, %c0_442], %277 {strides = array<i32>} : memref<36x32xf32, #tpu.memory_space<vmem>>, vector<4x32xf32>,
    %c0_443 = arith.constant 0 : index
    %c0_444 = arith.constant 0 : index
    %279 = vector.load %arg16[%c0_443, %c0_444] : memref<36x32xf32, #tpu.memory_space<vmem>>, vector<36x32xf32>
    %c11 = arith.constant 11 : index
    %c0_445 = arith.constant 0 : index
    %c0_446 = arith.constant 0 : index
    %280 = vector.load %arg3[%c11, %c0_445, %c0_446] : memref<16x32x64xf32, #tpu.memory_space<vmem>>, vector<1x32x64xf32>
    %281 = vector.shape_cast %280 : vector<1x32x64xf32> to vector<32x64xf32>
    %cst_447 = arith.constant dense<0.000000e+00> : vector<36x64xf32>
    %282 = tpu.matmul %279, %281, %cst_447 {dimension_numbers = #tpu.dot_dimension_numbers<[1], [0], [0], [1], [0, 0, 1, 1], [], []>} : vector<36x32xf32>, vector<32x64xf32>, vector<36x64xf32> -> vector<36x64xf32>
    %283 = arith.addf %260, %282 : vector<36x64xf32>
    %c96_448 = arith.constant 96 : index
    %c0_449 = arith.constant 0 : index
    %284 = vector.load %arg14[%c96_448, %c0_449] : memref<256x32xf32, #tpu.memory_space<vmem>>, vector<4x32xf32>
    %c0_450 = arith.constant 0 : index
    %c0_451 = arith.constant 0 : index
    %285 = vector.load %arg16[%c0_450, %c0_451] : memref<36x32xf32, #tpu.memory_space<vmem>>, vector<4x32xf32>
    tpu.vector_store %arg16[%c0_450, %c0_451], %284 {strides = array<i32>} : memref<36x32xf32, #tpu.memory_space<vmem>>, vector<4x32xf32>,
    %c104_452 = arith.constant 104 : index
    %c0_453 = arith.constant 0 : index
    %286 = vector.load %arg14[%c104_452, %c0_453] : memref<256x32xf32, #tpu.memory_space<vmem>>, vector<4x32xf32>
    %c4_454 = arith.constant 4 : index
    %c0_455 = arith.constant 0 : index
    %287 = vector.load %arg16[%c4_454, %c0_455] : memref<36x32xf32, #tpu.memory_space<vmem>>, vector<4x32xf32>
    tpu.vector_store %arg16[%c4_454, %c0_455], %286 {strides = array<i32>} : memref<36x32xf32, #tpu.memory_space<vmem>>, vector<4x32xf32>,
    %c112_456 = arith.constant 112 : index
    %c0_457 = arith.constant 0 : index
    %288 = vector.load %arg14[%c112_456, %c0_457] : memref<256x32xf32, #tpu.memory_space<vmem>>, vector<4x32xf32>
    %c8_458 = arith.constant 8 : index
    %c0_459 = arith.constant 0 : index
    %289 = vector.load %arg16[%c8_458, %c0_459] : memref<36x32xf32, #tpu.memory_space<vmem>>, vector<4x32xf32>
    tpu.vector_store %arg16[%c8_458, %c0_459], %288 {strides = array<i32>} : memref<36x32xf32, #tpu.memory_space<vmem>>, vector<4x32xf32>,
    %c160_460 = arith.constant 160 : index
    %c0_461 = arith.constant 0 : index
    %290 = vector.load %arg14[%c160_460, %c0_461] : memref<256x32xf32, #tpu.memory_space<vmem>>, vector<4x32xf32>
    %c12_462 = arith.constant 12 : index
    %c0_463 = arith.constant 0 : index
    %291 = vector.load %arg16[%c12_462, %c0_463] : memref<36x32xf32, #tpu.memory_space<vmem>>, vector<4x32xf32>
    tpu.vector_store %arg16[%c12_462, %c0_463], %290 {strides = array<i32>} : memref<36x32xf32, #tpu.memory_space<vmem>>, vector<4x32xf32>,
    %c168_464 = arith.constant 168 : index
    %c0_465 = arith.constant 0 : index
    %292 = vector.load %arg14[%c168_464, %c0_465] : memref<256x32xf32, #tpu.memory_space<vmem>>, vector<4x32xf32>
    %c16_466 = arith.constant 16 : index
    %c0_467 = arith.constant 0 : index
    %293 = vector.load %arg16[%c16_466, %c0_467] : memref<36x32xf32, #tpu.memory_space<vmem>>, vector<4x32xf32>
    tpu.vector_store %arg16[%c16_466, %c0_467], %292 {strides = array<i32>} : memref<36x32xf32, #tpu.memory_space<vmem>>, vector<4x32xf32>,
    %c176_468 = arith.constant 176 : index
    %c0_469 = arith.constant 0 : index
    %294 = vector.load %arg14[%c176_468, %c0_469] : memref<256x32xf32, #tpu.memory_space<vmem>>, vector<4x32xf32>
    %c20_470 = arith.constant 20 : index
    %c0_471 = arith.constant 0 : index
    %295 = vector.load %arg16[%c20_470, %c0_471] : memref<36x32xf32, #tpu.memory_space<vmem>>, vector<4x32xf32>
    tpu.vector_store %arg16[%c20_470, %c0_471], %294 {strides = array<i32>} : memref<36x32xf32, #tpu.memory_space<vmem>>, vector<4x32xf32>,
    %c224 = arith.constant 224 : index
    %c0_472 = arith.constant 0 : index
    %296 = vector.load %arg14[%c224, %c0_472] : memref<256x32xf32, #tpu.memory_space<vmem>>, vector<4x32xf32>
    %c24_473 = arith.constant 24 : index
    %c0_474 = arith.constant 0 : index
    %297 = vector.load %arg16[%c24_473, %c0_474] : memref<36x32xf32, #tpu.memory_space<vmem>>, vector<4x32xf32>
    tpu.vector_store %arg16[%c24_473, %c0_474], %296 {strides = array<i32>} : memref<36x32xf32, #tpu.memory_space<vmem>>, vector<4x32xf32>,
    %c232 = arith.constant 232 : index
    %c0_475 = arith.constant 0 : index
    %298 = vector.load %arg14[%c232, %c0_475] : memref<256x32xf32, #tpu.memory_space<vmem>>, vector<4x32xf32>
    %c28_476 = arith.constant 28 : index
    %c0_477 = arith.constant 0 : index
    %299 = vector.load %arg16[%c28_476, %c0_477] : memref<36x32xf32, #tpu.memory_space<vmem>>, vector<4x32xf32>
    tpu.vector_store %arg16[%c28_476, %c0_477], %298 {strides = array<i32>} : memref<36x32xf32, #tpu.memory_space<vmem>>, vector<4x32xf32>,
    %c240 = arith.constant 240 : index
    %c0_478 = arith.constant 0 : index
    %300 = vector.load %arg14[%c240, %c0_478] : memref<256x32xf32, #tpu.memory_space<vmem>>, vector<4x32xf32>
    %c32_479 = arith.constant 32 : index
    %c0_480 = arith.constant 0 : index
    %301 = vector.load %arg16[%c32_479, %c0_480] : memref<36x32xf32, #tpu.memory_space<vmem>>, vector<4x32xf32>
    tpu.vector_store %arg16[%c32_479, %c0_480], %300 {strides = array<i32>} : memref<36x32xf32, #tpu.memory_space<vmem>>, vector<4x32xf32>,
    %c0_481 = arith.constant 0 : index
    %c0_482 = arith.constant 0 : index
    %302 = vector.load %arg16[%c0_481, %c0_482] : memref<36x32xf32, #tpu.memory_space<vmem>>, vector<36x32xf32>
    %c12_483 = arith.constant 12 : index
    %c0_484 = arith.constant 0 : index
    %c0_485 = arith.constant 0 : index
    %303 = vector.load %arg3[%c12_483, %c0_484, %c0_485] : memref<16x32x64xf32, #tpu.memory_space<vmem>>, vector<1x32x64xf32>
    %304 = vector.shape_cast %303 : vector<1x32x64xf32> to vector<32x64xf32>
    %cst_486 = arith.constant dense<0.000000e+00> : vector<36x64xf32>
    %305 = tpu.matmul %302, %304, %cst_486 {dimension_numbers = #tpu.dot_dimension_numbers<[1], [0], [0], [1], [0, 0, 1, 1], [], []>} : vector<36x32xf32>, vector<32x64xf32>, vector<36x64xf32> -> vector<36x64xf32>
    %306 = arith.addf %283, %305 : vector<36x64xf32>
    %c100_487 = arith.constant 100 : index
    %c0_488 = arith.constant 0 : index
    %307 = vector.load %arg14[%c100_487, %c0_488] : memref<256x32xf32, #tpu.memory_space<vmem>>, vector<4x32xf32>
    %c0_489 = arith.constant 0 : index
    %c0_490 = arith.constant 0 : index
    %308 = vector.load %arg16[%c0_489, %c0_490] : memref<36x32xf32, #tpu.memory_space<vmem>>, vector<4x32xf32>
    tpu.vector_store %arg16[%c0_489, %c0_490], %307 {strides = array<i32>} : memref<36x32xf32, #tpu.memory_space<vmem>>, vector<4x32xf32>,
    %c108_491 = arith.constant 108 : index
    %c0_492 = arith.constant 0 : index
    %309 = vector.load %arg14[%c108_491, %c0_492] : memref<256x32xf32, #tpu.memory_space<vmem>>, vector<4x32xf32>
    %c4_493 = arith.constant 4 : index
    %c0_494 = arith.constant 0 : index
    %310 = vector.load %arg16[%c4_493, %c0_494] : memref<36x32xf32, #tpu.memory_space<vmem>>, vector<4x32xf32>
    tpu.vector_store %arg16[%c4_493, %c0_494], %309 {strides = array<i32>} : memref<36x32xf32, #tpu.memory_space<vmem>>, vector<4x32xf32>,
    %c116_495 = arith.constant 116 : index
    %c0_496 = arith.constant 0 : index
    %311 = vector.load %arg14[%c116_495, %c0_496] : memref<256x32xf32, #tpu.memory_space<vmem>>, vector<4x32xf32>
    %c8_497 = arith.constant 8 : index
    %c0_498 = arith.constant 0 : index
    %312 = vector.load %arg16[%c8_497, %c0_498] : memref<36x32xf32, #tpu.memory_space<vmem>>, vector<4x32xf32>
    tpu.vector_store %arg16[%c8_497, %c0_498], %311 {strides = array<i32>} : memref<36x32xf32, #tpu.memory_space<vmem>>, vector<4x32xf32>,
    %c164_499 = arith.constant 164 : index
    %c0_500 = arith.constant 0 : index
    %313 = vector.load %arg14[%c164_499, %c0_500] : memref<256x32xf32, #tpu.memory_space<vmem>>, vector<4x32xf32>
    %c12_501 = arith.constant 12 : index
    %c0_502 = arith.constant 0 : index
    %314 = vector.load %arg16[%c12_501, %c0_502] : memref<36x32xf32, #tpu.memory_space<vmem>>, vector<4x32xf32>
    tpu.vector_store %arg16[%c12_501, %c0_502], %313 {strides = array<i32>} : memref<36x32xf32, #tpu.memory_space<vmem>>, vector<4x32xf32>,
    %c172_503 = arith.constant 172 : index
    %c0_504 = arith.constant 0 : index
    %315 = vector.load %arg14[%c172_503, %c0_504] : memref<256x32xf32, #tpu.memory_space<vmem>>, vector<4x32xf32>
    %c16_505 = arith.constant 16 : index
    %c0_506 = arith.constant 0 : index
    %316 = vector.load %arg16[%c16_505, %c0_506] : memref<36x32xf32, #tpu.memory_space<vmem>>, vector<4x32xf32>
    tpu.vector_store %arg16[%c16_505, %c0_506], %315 {strides = array<i32>} : memref<36x32xf32, #tpu.memory_space<vmem>>, vector<4x32xf32>,
    %c180_507 = arith.constant 180 : index
    %c0_508 = arith.constant 0 : index
    %317 = vector.load %arg14[%c180_507, %c0_508] : memref<256x32xf32, #tpu.memory_space<vmem>>, vector<4x32xf32>
    %c20_509 = arith.constant 20 : index
    %c0_510 = arith.constant 0 : index
    %318 = vector.load %arg16[%c20_509, %c0_510] : memref<36x32xf32, #tpu.memory_space<vmem>>, vector<4x32xf32>
    tpu.vector_store %arg16[%c20_509, %c0_510], %317 {strides = array<i32>} : memref<36x32xf32, #tpu.memory_space<vmem>>, vector<4x32xf32>,
    %c228 = arith.constant 228 : index
    %c0_511 = arith.constant 0 : index
    %319 = vector.load %arg14[%c228, %c0_511] : memref<256x32xf32, #tpu.memory_space<vmem>>, vector<4x32xf32>
    %c24_512 = arith.constant 24 : index
    %c0_513 = arith.constant 0 : index
    %320 = vector.load %arg16[%c24_512, %c0_513] : memref<36x32xf32, #tpu.memory_space<vmem>>, vector<4x32xf32>
    tpu.vector_store %arg16[%c24_512, %c0_513], %319 {strides = array<i32>} : memref<36x32xf32, #tpu.memory_space<vmem>>, vector<4x32xf32>,
    %c236 = arith.constant 236 : index
    %c0_514 = arith.constant 0 : index
    %321 = vector.load %arg14[%c236, %c0_514] : memref<256x32xf32, #tpu.memory_space<vmem>>, vector<4x32xf32>
    %c28_515 = arith.constant 28 : index
    %c0_516 = arith.constant 0 : index
    %322 = vector.load %arg16[%c28_515, %c0_516] : memref<36x32xf32, #tpu.memory_space<vmem>>, vector<4x32xf32>
    tpu.vector_store %arg16[%c28_515, %c0_516], %321 {strides = array<i32>} : memref<36x32xf32, #tpu.memory_space<vmem>>, vector<4x32xf32>,
    %c244 = arith.constant 244 : index
    %c0_517 = arith.constant 0 : index
    %323 = vector.load %arg14[%c244, %c0_517] : memref<256x32xf32, #tpu.memory_space<vmem>>, vector<4x32xf32>
    %c32_518 = arith.constant 32 : index
    %c0_519 = arith.constant 0 : index
    %324 = vector.load %arg16[%c32_518, %c0_519] : memref<36x32xf32, #tpu.memory_space<vmem>>, vector<4x32xf32>
    tpu.vector_store %arg16[%c32_518, %c0_519], %323 {strides = array<i32>} : memref<36x32xf32, #tpu.memory_space<vmem>>, vector<4x32xf32>,
    %c0_520 = arith.constant 0 : index
    %c0_521 = arith.constant 0 : index
    %325 = vector.load %arg16[%c0_520, %c0_521] : memref<36x32xf32, #tpu.memory_space<vmem>>, vector<36x32xf32>
    %c13 = arith.constant 13 : index
    %c0_522 = arith.constant 0 : index
    %c0_523 = arith.constant 0 : index
    %326 = vector.load %arg3[%c13, %c0_522, %c0_523] : memref<16x32x64xf32, #tpu.memory_space<vmem>>, vector<1x32x64xf32>
    %327 = vector.shape_cast %326 : vector<1x32x64xf32> to vector<32x64xf32>
    %cst_524 = arith.constant dense<0.000000e+00> : vector<36x64xf32>
    %328 = tpu.matmul %325, %327, %cst_524 {dimension_numbers = #tpu.dot_dimension_numbers<[1], [0], [0], [1], [0, 0, 1, 1], [], []>} : vector<36x32xf32>, vector<32x64xf32>, vector<36x64xf32> -> vector<36x64xf32>
    %329 = arith.addf %306, %328 : vector<36x64xf32>
    %c104_525 = arith.constant 104 : index
    %c0_526 = arith.constant 0 : index
    %330 = vector.load %arg14[%c104_525, %c0_526] : memref<256x32xf32, #tpu.memory_space<vmem>>, vector<4x32xf32>
    %c0_527 = arith.constant 0 : index
    %c0_528 = arith.constant 0 : index
    %331 = vector.load %arg16[%c0_527, %c0_528] : memref<36x32xf32, #tpu.memory_space<vmem>>, vector<4x32xf32>
    tpu.vector_store %arg16[%c0_527, %c0_528], %330 {strides = array<i32>} : memref<36x32xf32, #tpu.memory_space<vmem>>, vector<4x32xf32>,
    %c112_529 = arith.constant 112 : index
    %c0_530 = arith.constant 0 : index
    %332 = vector.load %arg14[%c112_529, %c0_530] : memref<256x32xf32, #tpu.memory_space<vmem>>, vector<4x32xf32>
    %c4_531 = arith.constant 4 : index
    %c0_532 = arith.constant 0 : index
    %333 = vector.load %arg16[%c4_531, %c0_532] : memref<36x32xf32, #tpu.memory_space<vmem>>, vector<4x32xf32>
    tpu.vector_store %arg16[%c4_531, %c0_532], %332 {strides = array<i32>} : memref<36x32xf32, #tpu.memory_space<vmem>>, vector<4x32xf32>,
    %c120_533 = arith.constant 120 : index
    %c0_534 = arith.constant 0 : index
    %334 = vector.load %arg14[%c120_533, %c0_534] : memref<256x32xf32, #tpu.memory_space<vmem>>, vector<4x32xf32>
    %c8_535 = arith.constant 8 : index
    %c0_536 = arith.constant 0 : index
    %335 = vector.load %arg16[%c8_535, %c0_536] : memref<36x32xf32, #tpu.memory_space<vmem>>, vector<4x32xf32>
    tpu.vector_store %arg16[%c8_535, %c0_536], %334 {strides = array<i32>} : memref<36x32xf32, #tpu.memory_space<vmem>>, vector<4x32xf32>,
    %c168_537 = arith.constant 168 : index
    %c0_538 = arith.constant 0 : index
    %336 = vector.load %arg14[%c168_537, %c0_538] : memref<256x32xf32, #tpu.memory_space<vmem>>, vector<4x32xf32>
    %c12_539 = arith.constant 12 : index
    %c0_540 = arith.constant 0 : index
    %337 = vector.load %arg16[%c12_539, %c0_540] : memref<36x32xf32, #tpu.memory_space<vmem>>, vector<4x32xf32>
    tpu.vector_store %arg16[%c12_539, %c0_540], %336 {strides = array<i32>} : memref<36x32xf32, #tpu.memory_space<vmem>>, vector<4x32xf32>,
    %c176_541 = arith.constant 176 : index
    %c0_542 = arith.constant 0 : index
    %338 = vector.load %arg14[%c176_541, %c0_542] : memref<256x32xf32, #tpu.memory_space<vmem>>, vector<4x32xf32>
    %c16_543 = arith.constant 16 : index
    %c0_544 = arith.constant 0 : index
    %339 = vector.load %arg16[%c16_543, %c0_544] : memref<36x32xf32, #tpu.memory_space<vmem>>, vector<4x32xf32>
    tpu.vector_store %arg16[%c16_543, %c0_544], %338 {strides = array<i32>} : memref<36x32xf32, #tpu.memory_space<vmem>>, vector<4x32xf32>,
    %c184_545 = arith.constant 184 : index
    %c0_546 = arith.constant 0 : index
    %340 = vector.load %arg14[%c184_545, %c0_546] : memref<256x32xf32, #tpu.memory_space<vmem>>, vector<4x32xf32>
    %c20_547 = arith.constant 20 : index
    %c0_548 = arith.constant 0 : index
    %341 = vector.load %arg16[%c20_547, %c0_548] : memref<36x32xf32, #tpu.memory_space<vmem>>, vector<4x32xf32>
    tpu.vector_store %arg16[%c20_547, %c0_548], %340 {strides = array<i32>} : memref<36x32xf32, #tpu.memory_space<vmem>>, vector<4x32xf32>,
    %c232_549 = arith.constant 232 : index
    %c0_550 = arith.constant 0 : index
    %342 = vector.load %arg14[%c232_549, %c0_550] : memref<256x32xf32, #tpu.memory_space<vmem>>, vector<4x32xf32>
    %c24_551 = arith.constant 24 : index
    %c0_552 = arith.constant 0 : index
    %343 = vector.load %arg16[%c24_551, %c0_552] : memref<36x32xf32, #tpu.memory_space<vmem>>, vector<4x32xf32>
    tpu.vector_store %arg16[%c24_551, %c0_552], %342 {strides = array<i32>} : memref<36x32xf32, #tpu.memory_space<vmem>>, vector<4x32xf32>,
    %c240_553 = arith.constant 240 : index
    %c0_554 = arith.constant 0 : index
    %344 = vector.load %arg14[%c240_553, %c0_554] : memref<256x32xf32, #tpu.memory_space<vmem>>, vector<4x32xf32>
    %c28_555 = arith.constant 28 : index
    %c0_556 = arith.constant 0 : index
    %345 = vector.load %arg16[%c28_555, %c0_556] : memref<36x32xf32, #tpu.memory_space<vmem>>, vector<4x32xf32>
    tpu.vector_store %arg16[%c28_555, %c0_556], %344 {strides = array<i32>} : memref<36x32xf32, #tpu.memory_space<vmem>>, vector<4x32xf32>,
    %c248 = arith.constant 248 : index
    %c0_557 = arith.constant 0 : index
    %346 = vector.load %arg14[%c248, %c0_557] : memref<256x32xf32, #tpu.memory_space<vmem>>, vector<4x32xf32>
    %c32_558 = arith.constant 32 : index
    %c0_559 = arith.constant 0 : index
    %347 = vector.load %arg16[%c32_558, %c0_559] : memref<36x32xf32, #tpu.memory_space<vmem>>, vector<4x32xf32>
    tpu.vector_store %arg16[%c32_558, %c0_559], %346 {strides = array<i32>} : memref<36x32xf32, #tpu.memory_space<vmem>>, vector<4x32xf32>,
    %c0_560 = arith.constant 0 : index
    %c0_561 = arith.constant 0 : index
    %348 = vector.load %arg16[%c0_560, %c0_561] : memref<36x32xf32, #tpu.memory_space<vmem>>, vector<36x32xf32>
    %c14 = arith.constant 14 : index
    %c0_562 = arith.constant 0 : index
    %c0_563 = arith.constant 0 : index
    %349 = vector.load %arg3[%c14, %c0_562, %c0_563] : memref<16x32x64xf32, #tpu.memory_space<vmem>>, vector<1x32x64xf32>
    %350 = vector.shape_cast %349 : vector<1x32x64xf32> to vector<32x64xf32>
    %cst_564 = arith.constant dense<0.000000e+00> : vector<36x64xf32>
    %351 = tpu.matmul %348, %350, %cst_564 {dimension_numbers = #tpu.dot_dimension_numbers<[1], [0], [0], [1], [0, 0, 1, 1], [], []>} : vector<36x32xf32>, vector<32x64xf32>, vector<36x64xf32> -> vector<36x64xf32>
    %352 = arith.addf %329, %351 : vector<36x64xf32>
    %c108_565 = arith.constant 108 : index
    %c0_566 = arith.constant 0 : index
    %353 = vector.load %arg14[%c108_565, %c0_566] : memref<256x32xf32, #tpu.memory_space<vmem>>, vector<4x32xf32>
    %c0_567 = arith.constant 0 : index
    %c0_568 = arith.constant 0 : index
    %354 = vector.load %arg16[%c0_567, %c0_568] : memref<36x32xf32, #tpu.memory_space<vmem>>, vector<4x32xf32>
    tpu.vector_store %arg16[%c0_567, %c0_568], %353 {strides = array<i32>} : memref<36x32xf32, #tpu.memory_space<vmem>>, vector<4x32xf32>,
    %c116_569 = arith.constant 116 : index
    %c0_570 = arith.constant 0 : index
    %355 = vector.load %arg14[%c116_569, %c0_570] : memref<256x32xf32, #tpu.memory_space<vmem>>, vector<4x32xf32>
    %c4_571 = arith.constant 4 : index
    %c0_572 = arith.constant 0 : index
    %356 = vector.load %arg16[%c4_571, %c0_572] : memref<36x32xf32, #tpu.memory_space<vmem>>, vector<4x32xf32>
    tpu.vector_store %arg16[%c4_571, %c0_572], %355 {strides = array<i32>} : memref<36x32xf32, #tpu.memory_space<vmem>>, vector<4x32xf32>,
    %c124_573 = arith.constant 124 : index
    %c0_574 = arith.constant 0 : index
    %357 = vector.load %arg14[%c124_573, %c0_574] : memref<256x32xf32, #tpu.memory_space<vmem>>, vector<4x32xf32>
    %c8_575 = arith.constant 8 : index
    %c0_576 = arith.constant 0 : index
    %358 = vector.load %arg16[%c8_575, %c0_576] : memref<36x32xf32, #tpu.memory_space<vmem>>, vector<4x32xf32>
    tpu.vector_store %arg16[%c8_575, %c0_576], %357 {strides = array<i32>} : memref<36x32xf32, #tpu.memory_space<vmem>>, vector<4x32xf32>,
    %c172_577 = arith.constant 172 : index
    %c0_578 = arith.constant 0 : index
    %359 = vector.load %arg14[%c172_577, %c0_578] : memref<256x32xf32, #tpu.memory_space<vmem>>, vector<4x32xf32>
    %c12_579 = arith.constant 12 : index
    %c0_580 = arith.constant 0 : index
    %360 = vector.load %arg16[%c12_579, %c0_580] : memref<36x32xf32, #tpu.memory_space<vmem>>, vector<4x32xf32>
    tpu.vector_store %arg16[%c12_579, %c0_580], %359 {strides = array<i32>} : memref<36x32xf32, #tpu.memory_space<vmem>>, vector<4x32xf32>,
    %c180_581 = arith.constant 180 : index
    %c0_582 = arith.constant 0 : index
    %361 = vector.load %arg14[%c180_581, %c0_582] : memref<256x32xf32, #tpu.memory_space<vmem>>, vector<4x32xf32>
    %c16_583 = arith.constant 16 : index
    %c0_584 = arith.constant 0 : index
    %362 = vector.load %arg16[%c16_583, %c0_584] : memref<36x32xf32, #tpu.memory_space<vmem>>, vector<4x32xf32>
    tpu.vector_store %arg16[%c16_583, %c0_584], %361 {strides = array<i32>} : memref<36x32xf32, #tpu.memory_space<vmem>>, vector<4x32xf32>,
    %c188_585 = arith.constant 188 : index
    %c0_586 = arith.constant 0 : index
    %363 = vector.load %arg14[%c188_585, %c0_586] : memref<256x32xf32, #tpu.memory_space<vmem>>, vector<4x32xf32>
    %c20_587 = arith.constant 20 : index
    %c0_588 = arith.constant 0 : index
    %364 = vector.load %arg16[%c20_587, %c0_588] : memref<36x32xf32, #tpu.memory_space<vmem>>, vector<4x32xf32>
    tpu.vector_store %arg16[%c20_587, %c0_588], %363 {strides = array<i32>} : memref<36x32xf32, #tpu.memory_space<vmem>>, vector<4x32xf32>,
    %c236_589 = arith.constant 236 : index
    %c0_590 = arith.constant 0 : index
    %365 = vector.load %arg14[%c236_589, %c0_590] : memref<256x32xf32, #tpu.memory_space<vmem>>, vector<4x32xf32>
    %c24_591 = arith.constant 24 : index
    %c0_592 = arith.constant 0 : index
    %366 = vector.load %arg16[%c24_591, %c0_592] : memref<36x32xf32, #tpu.memory_space<vmem>>, vector<4x32xf32>
    tpu.vector_store %arg16[%c24_591, %c0_592], %365 {strides = array<i32>} : memref<36x32xf32, #tpu.memory_space<vmem>>, vector<4x32xf32>,
    %c244_593 = arith.constant 244 : index
    %c0_594 = arith.constant 0 : index
    %367 = vector.load %arg14[%c244_593, %c0_594] : memref<256x32xf32, #tpu.memory_space<vmem>>, vector<4x32xf32>
    %c28_595 = arith.constant 28 : index
    %c0_596 = arith.constant 0 : index
    %368 = vector.load %arg16[%c28_595, %c0_596] : memref<36x32xf32, #tpu.memory_space<vmem>>, vector<4x32xf32>
    tpu.vector_store %arg16[%c28_595, %c0_596], %367 {strides = array<i32>} : memref<36x32xf32, #tpu.memory_space<vmem>>, vector<4x32xf32>,
    %c252 = arith.constant 252 : index
    %c0_597 = arith.constant 0 : index
    %369 = vector.load %arg14[%c252, %c0_597] : memref<256x32xf32, #tpu.memory_space<vmem>>, vector<4x32xf32>
    %c32_598 = arith.constant 32 : index
    %c0_599 = arith.constant 0 : index
    %370 = vector.load %arg16[%c32_598, %c0_599] : memref<36x32xf32, #tpu.memory_space<vmem>>, vector<4x32xf32>
    tpu.vector_store %arg16[%c32_598, %c0_599], %369 {strides = array<i32>} : memref<36x32xf32, #tpu.memory_space<vmem>>, vector<4x32xf32>,
    %c0_600 = arith.constant 0 : index
    %c0_601 = arith.constant 0 : index
    %371 = vector.load %arg16[%c0_600, %c0_601] : memref<36x32xf32, #tpu.memory_space<vmem>>, vector<36x32xf32>
    %c15 = arith.constant 15 : index
    %c0_602 = arith.constant 0 : index
    %c0_603 = arith.constant 0 : index
    %372 = vector.load %arg3[%c15, %c0_602, %c0_603] : memref<16x32x64xf32, #tpu.memory_space<vmem>>, vector<1x32x64xf32>
    %373 = vector.shape_cast %372 : vector<1x32x64xf32> to vector<32x64xf32>
    %cst_604 = arith.constant dense<0.000000e+00> : vector<36x64xf32>
    %374 = tpu.matmul %371, %373, %cst_604 {dimension_numbers = #tpu.dot_dimension_numbers<[1], [0], [0], [1], [0, 0, 1, 1], [], []>} : vector<36x32xf32>, vector<32x64xf32>, vector<36x64xf32> -> vector<36x64xf32>
    %375 = arith.addf %352, %374 : vector<36x64xf32>
    %c0_605 = arith.constant 0 : index
    %c0_606 = arith.constant 0 : index
    %376 = vector.load %arg4[%c0_605, %c0_606] : memref<1x64xf32, #tpu.memory_space<vmem>>, vector<1x64xf32>
    %377 = vector.broadcast %376 : vector<1x64xf32> to vector<36x64xf32>
    %378 = arith.addf %375, %377 : vector<36x64xf32>
    %cst_607 = arith.constant 0.000000e+00 : f32
    %379 = vector.broadcast %cst_607 : f32 to vector<36x64xf32>
    %380 = arith.maximumf %378, %379 : vector<36x64xf32>
    %c0_608 = arith.constant 0 : index
    %c0_609 = arith.constant 0 : index
    %381 = vector.load %arg15[%c0_608, %c0_609] : memref<36x64xf32, #tpu.memory_space<vmem>>, vector<36x64xf32>
    tpu.vector_store %arg15[%c0_608, %c0_609], %380 {strides = array<i32>} : memref<36x64xf32, #tpu.memory_space<vmem>>, vector<36x64xf32>,
    %c0_610 = arith.constant 0 : index
    %c0_611 = arith.constant 0 : index
    %382 = vector.load %arg15[%c0_610, %c0_611] : memref<36x64xf32, #tpu.memory_space<vmem>>, vector<4x64xf32>
    %c0_612 = arith.constant 0 : index
    %c0_613 = arith.constant 0 : index
    %383 = vector.load %arg17[%c0_612, %c0_613] : memref<4x64xf32, #tpu.memory_space<vmem>>, vector<4x64xf32>
    tpu.vector_store %arg17[%c0_612, %c0_613], %382 {strides = array<i32>} : memref<4x64xf32, #tpu.memory_space<vmem>>, vector<4x64xf32>,
    %c0_614 = arith.constant 0 : index
    %c0_615 = arith.constant 0 : index
    %384 = vector.load %arg17[%c0_614, %c0_615] : memref<4x64xf32, #tpu.memory_space<vmem>>, vector<4x64xf32>
    %c0_616 = arith.constant 0 : index
    %c0_617 = arith.constant 0 : index
    %c0_618 = arith.constant 0 : index
    %385 = vector.load %arg5[%c0_616, %c0_617, %c0_618] : memref<9x64x64xf32, #tpu.memory_space<vmem>>, vector<1x64x64xf32>
    %386 = vector.shape_cast %385 : vector<1x64x64xf32> to vector<64x64xf32>
    %cst_619 = arith.constant dense<0.000000e+00> : vector<4x64xf32>
    %387 = tpu.matmul %384, %386, %cst_619 {dimension_numbers = #tpu.dot_dimension_numbers<[1], [0], [0], [1], [0, 0, 1, 1], [], []>} : vector<4x64xf32>, vector<64x64xf32>, vector<4x64xf32> -> vector<4x64xf32>
    %c4_620 = arith.constant 4 : index
    %c0_621 = arith.constant 0 : index
    %388 = vector.load %arg15[%c4_620, %c0_621] : memref<36x64xf32, #tpu.memory_space<vmem>>, vector<4x64xf32>
    %c0_622 = arith.constant 0 : index
    %c0_623 = arith.constant 0 : index
    %389 = vector.load %arg17[%c0_622, %c0_623] : memref<4x64xf32, #tpu.memory_space<vmem>>, vector<4x64xf32>
    tpu.vector_store %arg17[%c0_622, %c0_623], %388 {strides = array<i32>} : memref<4x64xf32, #tpu.memory_space<vmem>>, vector<4x64xf32>,
    %c0_624 = arith.constant 0 : index
    %c0_625 = arith.constant 0 : index
    %390 = vector.load %arg17[%c0_624, %c0_625] : memref<4x64xf32, #tpu.memory_space<vmem>>, vector<4x64xf32>
    %c1_626 = arith.constant 1 : index
    %c0_627 = arith.constant 0 : index
    %c0_628 = arith.constant 0 : index
    %391 = vector.load %arg5[%c1_626, %c0_627, %c0_628] : memref<9x64x64xf32, #tpu.memory_space<vmem>>, vector<1x64x64xf32>
    %392 = vector.shape_cast %391 : vector<1x64x64xf32> to vector<64x64xf32>
    %cst_629 = arith.constant dense<0.000000e+00> : vector<4x64xf32>
    %393 = tpu.matmul %390, %392, %cst_629 {dimension_numbers = #tpu.dot_dimension_numbers<[1], [0], [0], [1], [0, 0, 1, 1], [], []>} : vector<4x64xf32>, vector<64x64xf32>, vector<4x64xf32> -> vector<4x64xf32>
    %394 = arith.addf %387, %393 : vector<4x64xf32>
    %c8_630 = arith.constant 8 : index
    %c0_631 = arith.constant 0 : index
    %395 = vector.load %arg15[%c8_630, %c0_631] : memref<36x64xf32, #tpu.memory_space<vmem>>, vector<4x64xf32>
    %c0_632 = arith.constant 0 : index
    %c0_633 = arith.constant 0 : index
    %396 = vector.load %arg17[%c0_632, %c0_633] : memref<4x64xf32, #tpu.memory_space<vmem>>, vector<4x64xf32>
    tpu.vector_store %arg17[%c0_632, %c0_633], %395 {strides = array<i32>} : memref<4x64xf32, #tpu.memory_space<vmem>>, vector<4x64xf32>,
    %c0_634 = arith.constant 0 : index
    %c0_635 = arith.constant 0 : index
    %397 = vector.load %arg17[%c0_634, %c0_635] : memref<4x64xf32, #tpu.memory_space<vmem>>, vector<4x64xf32>
    %c2_636 = arith.constant 2 : index
    %c0_637 = arith.constant 0 : index
    %c0_638 = arith.constant 0 : index
    %398 = vector.load %arg5[%c2_636, %c0_637, %c0_638] : memref<9x64x64xf32, #tpu.memory_space<vmem>>, vector<1x64x64xf32>
    %399 = vector.shape_cast %398 : vector<1x64x64xf32> to vector<64x64xf32>
    %cst_639 = arith.constant dense<0.000000e+00> : vector<4x64xf32>
    %400 = tpu.matmul %397, %399, %cst_639 {dimension_numbers = #tpu.dot_dimension_numbers<[1], [0], [0], [1], [0, 0, 1, 1], [], []>} : vector<4x64xf32>, vector<64x64xf32>, vector<4x64xf32> -> vector<4x64xf32>
    %401 = arith.addf %394, %400 : vector<4x64xf32>
    %c12_640 = arith.constant 12 : index
    %c0_641 = arith.constant 0 : index
    %402 = vector.load %arg15[%c12_640, %c0_641] : memref<36x64xf32, #tpu.memory_space<vmem>>, vector<4x64xf32>
    %c0_642 = arith.constant 0 : index
    %c0_643 = arith.constant 0 : index
    %403 = vector.load %arg17[%c0_642, %c0_643] : memref<4x64xf32, #tpu.memory_space<vmem>>, vector<4x64xf32>
    tpu.vector_store %arg17[%c0_642, %c0_643], %402 {strides = array<i32>} : memref<4x64xf32, #tpu.memory_space<vmem>>, vector<4x64xf32>,
    %c0_644 = arith.constant 0 : index
    %c0_645 = arith.constant 0 : index
    %404 = vector.load %arg17[%c0_644, %c0_645] : memref<4x64xf32, #tpu.memory_space<vmem>>, vector<4x64xf32>
    %c3_646 = arith.constant 3 : index
    %c0_647 = arith.constant 0 : index
    %c0_648 = arith.constant 0 : index
    %405 = vector.load %arg5[%c3_646, %c0_647, %c0_648] : memref<9x64x64xf32, #tpu.memory_space<vmem>>, vector<1x64x64xf32>
    %406 = vector.shape_cast %405 : vector<1x64x64xf32> to vector<64x64xf32>
    %cst_649 = arith.constant dense<0.000000e+00> : vector<4x64xf32>
    %407 = tpu.matmul %404, %406, %cst_649 {dimension_numbers = #tpu.dot_dimension_numbers<[1], [0], [0], [1], [0, 0, 1, 1], [], []>} : vector<4x64xf32>, vector<64x64xf32>, vector<4x64xf32> -> vector<4x64xf32>
    %408 = arith.addf %401, %407 : vector<4x64xf32>
    %c16_650 = arith.constant 16 : index
    %c0_651 = arith.constant 0 : index
    %409 = vector.load %arg15[%c16_650, %c0_651] : memref<36x64xf32, #tpu.memory_space<vmem>>, vector<4x64xf32>
    %c0_652 = arith.constant 0 : index
    %c0_653 = arith.constant 0 : index
    %410 = vector.load %arg17[%c0_652, %c0_653] : memref<4x64xf32, #tpu.memory_space<vmem>>, vector<4x64xf32>
    tpu.vector_store %arg17[%c0_652, %c0_653], %409 {strides = array<i32>} : memref<4x64xf32, #tpu.memory_space<vmem>>, vector<4x64xf32>,
    %c0_654 = arith.constant 0 : index
    %c0_655 = arith.constant 0 : index
    %411 = vector.load %arg17[%c0_654, %c0_655] : memref<4x64xf32, #tpu.memory_space<vmem>>, vector<4x64xf32>
    %c4_656 = arith.constant 4 : index
    %c0_657 = arith.constant 0 : index
    %c0_658 = arith.constant 0 : index
    %412 = vector.load %arg5[%c4_656, %c0_657, %c0_658] : memref<9x64x64xf32, #tpu.memory_space<vmem>>, vector<1x64x64xf32>
    %413 = vector.shape_cast %412 : vector<1x64x64xf32> to vector<64x64xf32>
    %cst_659 = arith.constant dense<0.000000e+00> : vector<4x64xf32>
    %414 = tpu.matmul %411, %413, %cst_659 {dimension_numbers = #tpu.dot_dimension_numbers<[1], [0], [0], [1], [0, 0, 1, 1], [], []>} : vector<4x64xf32>, vector<64x64xf32>, vector<4x64xf32> -> vector<4x64xf32>
    %415 = arith.addf %408, %414 : vector<4x64xf32>
    %c20_660 = arith.constant 20 : index
    %c0_661 = arith.constant 0 : index
    %416 = vector.load %arg15[%c20_660, %c0_661] : memref<36x64xf32, #tpu.memory_space<vmem>>, vector<4x64xf32>
    %c0_662 = arith.constant 0 : index
    %c0_663 = arith.constant 0 : index
    %417 = vector.load %arg17[%c0_662, %c0_663] : memref<4x64xf32, #tpu.memory_space<vmem>>, vector<4x64xf32>
    tpu.vector_store %arg17[%c0_662, %c0_663], %416 {strides = array<i32>} : memref<4x64xf32, #tpu.memory_space<vmem>>, vector<4x64xf32>,
    %c0_664 = arith.constant 0 : index
    %c0_665 = arith.constant 0 : index
    %418 = vector.load %arg17[%c0_664, %c0_665] : memref<4x64xf32, #tpu.memory_space<vmem>>, vector<4x64xf32>
    %c5_666 = arith.constant 5 : index
    %c0_667 = arith.constant 0 : index
    %c0_668 = arith.constant 0 : index
    %419 = vector.load %arg5[%c5_666, %c0_667, %c0_668] : memref<9x64x64xf32, #tpu.memory_space<vmem>>, vector<1x64x64xf32>
    %420 = vector.shape_cast %419 : vector<1x64x64xf32> to vector<64x64xf32>
    %cst_669 = arith.constant dense<0.000000e+00> : vector<4x64xf32>
    %421 = tpu.matmul %418, %420, %cst_669 {dimension_numbers = #tpu.dot_dimension_numbers<[1], [0], [0], [1], [0, 0, 1, 1], [], []>} : vector<4x64xf32>, vector<64x64xf32>, vector<4x64xf32> -> vector<4x64xf32>
    %422 = arith.addf %415, %421 : vector<4x64xf32>
    %c24_670 = arith.constant 24 : index
    %c0_671 = arith.constant 0 : index
    %423 = vector.load %arg15[%c24_670, %c0_671] : memref<36x64xf32, #tpu.memory_space<vmem>>, vector<4x64xf32>
    %c0_672 = arith.constant 0 : index
    %c0_673 = arith.constant 0 : index
    %424 = vector.load %arg17[%c0_672, %c0_673] : memref<4x64xf32, #tpu.memory_space<vmem>>, vector<4x64xf32>
    tpu.vector_store %arg17[%c0_672, %c0_673], %423 {strides = array<i32>} : memref<4x64xf32, #tpu.memory_space<vmem>>, vector<4x64xf32>,
    %c0_674 = arith.constant 0 : index
    %c0_675 = arith.constant 0 : index
    %425 = vector.load %arg17[%c0_674, %c0_675] : memref<4x64xf32, #tpu.memory_space<vmem>>, vector<4x64xf32>
    %c6_676 = arith.constant 6 : index
    %c0_677 = arith.constant 0 : index
    %c0_678 = arith.constant 0 : index
    %426 = vector.load %arg5[%c6_676, %c0_677, %c0_678] : memref<9x64x64xf32, #tpu.memory_space<vmem>>, vector<1x64x64xf32>
    %427 = vector.shape_cast %426 : vector<1x64x64xf32> to vector<64x64xf32>
    %cst_679 = arith.constant dense<0.000000e+00> : vector<4x64xf32>
    %428 = tpu.matmul %425, %427, %cst_679 {dimension_numbers = #tpu.dot_dimension_numbers<[1], [0], [0], [1], [0, 0, 1, 1], [], []>} : vector<4x64xf32>, vector<64x64xf32>, vector<4x64xf32> -> vector<4x64xf32>
    %429 = arith.addf %422, %428 : vector<4x64xf32>
    %c28_680 = arith.constant 28 : index
    %c0_681 = arith.constant 0 : index
    %430 = vector.load %arg15[%c28_680, %c0_681] : memref<36x64xf32, #tpu.memory_space<vmem>>, vector<4x64xf32>
    %c0_682 = arith.constant 0 : index
    %c0_683 = arith.constant 0 : index
    %431 = vector.load %arg17[%c0_682, %c0_683] : memref<4x64xf32, #tpu.memory_space<vmem>>, vector<4x64xf32>
    tpu.vector_store %arg17[%c0_682, %c0_683], %430 {strides = array<i32>} : memref<4x64xf32, #tpu.memory_space<vmem>>, vector<4x64xf32>,
    %c0_684 = arith.constant 0 : index
    %c0_685 = arith.constant 0 : index
    %432 = vector.load %arg17[%c0_684, %c0_685] : memref<4x64xf32, #tpu.memory_space<vmem>>, vector<4x64xf32>
    %c7_686 = arith.constant 7 : index
    %c0_687 = arith.constant 0 : index
    %c0_688 = arith.constant 0 : index
    %433 = vector.load %arg5[%c7_686, %c0_687, %c0_688] : memref<9x64x64xf32, #tpu.memory_space<vmem>>, vector<1x64x64xf32>
    %434 = vector.shape_cast %433 : vector<1x64x64xf32> to vector<64x64xf32>
    %cst_689 = arith.constant dense<0.000000e+00> : vector<4x64xf32>
    %435 = tpu.matmul %432, %434, %cst_689 {dimension_numbers = #tpu.dot_dimension_numbers<[1], [0], [0], [1], [0, 0, 1, 1], [], []>} : vector<4x64xf32>, vector<64x64xf32>, vector<4x64xf32> -> vector<4x64xf32>
    %436 = arith.addf %429, %435 : vector<4x64xf32>
    %c32_690 = arith.constant 32 : index
    %c0_691 = arith.constant 0 : index
    %437 = vector.load %arg15[%c32_690, %c0_691] : memref<36x64xf32, #tpu.memory_space<vmem>>, vector<4x64xf32>
    %c0_692 = arith.constant 0 : index
    %c0_693 = arith.constant 0 : index
    %438 = vector.load %arg17[%c0_692, %c0_693] : memref<4x64xf32, #tpu.memory_space<vmem>>, vector<4x64xf32>
    tpu.vector_store %arg17[%c0_692, %c0_693], %437 {strides = array<i32>} : memref<4x64xf32, #tpu.memory_space<vmem>>, vector<4x64xf32>,
    %c0_694 = arith.constant 0 : index
    %c0_695 = arith.constant 0 : index
    %439 = vector.load %arg17[%c0_694, %c0_695] : memref<4x64xf32, #tpu.memory_space<vmem>>, vector<4x64xf32>
    %c8_696 = arith.constant 8 : index
    %c0_697 = arith.constant 0 : index
    %c0_698 = arith.constant 0 : index
    %440 = vector.load %arg5[%c8_696, %c0_697, %c0_698] : memref<9x64x64xf32, #tpu.memory_space<vmem>>, vector<1x64x64xf32>
    %441 = vector.shape_cast %440 : vector<1x64x64xf32> to vector<64x64xf32>
    %cst_699 = arith.constant dense<0.000000e+00> : vector<4x64xf32>
    %442 = tpu.matmul %439, %441, %cst_699 {dimension_numbers = #tpu.dot_dimension_numbers<[1], [0], [0], [1], [0, 0, 1, 1], [], []>} : vector<4x64xf32>, vector<64x64xf32>, vector<4x64xf32> -> vector<4x64xf32>
    %443 = arith.addf %436, %442 : vector<4x64xf32>
    %c0_700 = arith.constant 0 : index
    %c0_701 = arith.constant 0 : index
    %444 = vector.load %arg6[%c0_700, %c0_701] : memref<1x64xf32, #tpu.memory_space<vmem>>, vector<1x64xf32>
    %445 = vector.broadcast %444 : vector<1x64xf32> to vector<4x64xf32>
    %446 = arith.addf %443, %445 : vector<4x64xf32>
    %cst_702 = arith.constant 0.000000e+00 : f32
    %447 = vector.broadcast %cst_702 : f32 to vector<4x64xf32>
    %448 = arith.maximumf %446, %447 : vector<4x64xf32>
    %449 = vector.extract_strided_slice %448 {offsets = [0, 0], sizes = [2, 64], strides = [1, 1]} : vector<4x64xf32> to vector<2x64xf32>
    %450 = vector.extract_strided_slice %448 {offsets = [2, 0], sizes = [2, 64], strides = [1, 1]} : vector<4x64xf32> to vector<2x64xf32>
    %451 = arith.addf %449, %450 : vector<2x64xf32>
    %cst_703 = arith.constant 5.000000e-01 : f32
    %452 = vector.broadcast %cst_703 : f32 to vector<2x64xf32>
    %453 = arith.mulf %452, %451 : vector<2x64xf32>
    %c0_704 = arith.constant 0 : index
    %c0_705 = arith.constant 0 : index
    %454 = vector.load %arg7[%c0_704, %c0_705] : memref<64x512xf32, #tpu.memory_space<vmem>>, vector<64x512xf32>
    %cst_706 = arith.constant dense<0.000000e+00> : vector<2x512xf32>
    %455 = tpu.matmul %453, %454, %cst_706 {dimension_numbers = #tpu.dot_dimension_numbers<[1], [0], [0], [1], [0, 0, 1, 1], [], []>} : vector<2x64xf32>, vector<64x512xf32>, vector<2x512xf32> -> vector<2x512xf32>
    %c0_707 = arith.constant 0 : index
    %c0_708 = arith.constant 0 : index
    %456 = vector.load %arg8[%c0_707, %c0_708] : memref<1x512xf32, #tpu.memory_space<vmem>>, vector<1x512xf32>
    %457 = vector.broadcast %456 : vector<1x512xf32> to vector<2x512xf32>
    %458 = arith.addf %455, %457 : vector<2x512xf32>
    %c0_709 = arith.constant 0 : index
    %c0_710 = arith.constant 0 : index
    %459 = vector.load %arg9[%c0_709, %c0_710] : memref<512x128xf32, #tpu.memory_space<vmem>>, vector<512x128xf32>
    %cst_711 = arith.constant dense<0.000000e+00> : vector<2x128xf32>
    %460 = tpu.matmul %458, %459, %cst_711 {dimension_numbers = #tpu.dot_dimension_numbers<[1], [0], [0], [1], [0, 0, 1, 1], [], []>} : vector<2x512xf32>, vector<512x128xf32>, vector<2x128xf32> -> vector<2x128xf32>
    %c0_712 = arith.constant 0 : index
    %c0_713 = arith.constant 0 : index
    %461 = vector.load %arg10[%c0_712, %c0_713] : memref<1x128xf32, #tpu.memory_space<vmem>>, vector<1x128xf32>
    %462 = vector.broadcast %461 : vector<1x128xf32> to vector<2x128xf32>
    %463 = arith.addf %460, %462 : vector<2x128xf32>
    %c0_714 = arith.constant 0 : index
    %c0_715 = arith.constant 0 : index
    %464 = vector.load %arg11[%c0_714, %c0_715] : memref<128x18xf32, #tpu.memory_space<vmem>>, vector<128x18xf32>
    %cst_716 = arith.constant dense<0.000000e+00> : vector<2x18xf32>
    %465 = tpu.matmul %463, %464, %cst_716 {dimension_numbers = #tpu.dot_dimension_numbers<[1], [0], [0], [1], [0, 0, 1, 1], [], []>} : vector<2x128xf32>, vector<128x18xf32>, vector<2x18xf32> -> vector<2x18xf32>
    %c0_717 = arith.constant 0 : index
    %c0_718 = arith.constant 0 : index
    %466 = vector.load %arg12[%c0_717, %c0_718] : memref<1x18xf32, #tpu.memory_space<vmem>>, vector<1x18xf32>
    %467 = vector.broadcast %466 : vector<1x18xf32> to vector<2x18xf32>
    %468 = arith.addf %465, %467 : vector<2x18xf32>
    %c0_719 = arith.constant 0 : index
    %c0_720 = arith.constant 0 : index
    %469 = vector.load %arg13[%c0_719, %c0_720] : memref<2x18xf32, #tpu.memory_space<vmem>>, vector<2x18xf32>
    tpu.vector_store %arg13[%c0_719, %c0_720], %468 {strides = array<i32>} : memref<2x18xf32, #tpu.memory_space<vmem>>, vector<2x18xf32>,
    return
  }
}

</mosaic_0001>

<bundles_post_ra>
// kernel: forward.1
= control target key start
LH: loop header
LB: loop body
LE: loop exit
PB: predicated region body
PF: predicated region fallthrough
CT: control target
= control target key end

     0   :  { %v5471_v3 = vmov 0.0|0.0   ;;  %s7429_s0 = inlined_call_operand.vmem [shape: f32[256,256], index: 0, kind: input, shape index: {}]   ;;  %s7430_s1 = inlined_call_operand.vmem [shape: f32[256,32], index: 1, kind: input, shape index: {}]   ;;  %s7431_s2 = inlined_call_operand.vmem [shape: f32[1,32], index: 2, kind: input, shape index: {}]   ;;  %s7432_s3 = inlined_call_operand.vmem [shape: f32[16,32,64], index: 3, kind: input, shape index: {}]   ;;  %s7433_s4 = inlined_call_operand.vmem [shape: f32[1,64], index: 4, kind: input, shape index: {}]   ;;  %s7434_s5 = inlined_call_operand.vmem [shape: f32[9,64,64], index: 5, kind: input, shape index: {}]   ;;  %s7435_s6 = inlined_call_operand.vmem [shape: f32[1,64], index: 6, kind: input, shape index: {}]   ;;  %s7436_s7 = inlined_call_operand.vmem [shape: f32[64,512], index: 7, kind: input, shape index: {}]   ;;  %s7437_s8 = inlined_call_operand.vmem [shape: f32[1,512], index: 8, kind: input, shape index: {}]   ;;  %s7438_s9 = inlined_call_operand.vmem [shape: f32[512,128], index: 9, kind: input, shape index: {}]   ;;  %s7439_s10 = inlined_call_operand.vmem [shape: f32[1,128], index: 10, kind: input, shape index: {}]   ;;  %s7440_s11 = inlined_call_operand.vmem [shape: f32[128,18], index: 11, kind: input, shape index: {}]   ;;  %s7441_s12 = inlined_call_operand.vmem [shape: f32[1,18], index: 12, kind: input, shape index: {}]   ;;  %s7442_s13 = inlined_call_operand.hbm [shape: f32[2,18], index: 13, kind: output, shape index: {}]  }
   0x1   :  { %v109_v0 = vld [vmem:[%s7430_s1] sm:$0xff]  ;;  %v110_v1 = vld [vmem:[%s7430_s1 + $0x8] sm:$0xff]  ;;  %v111_v2 = vld [vmem:[%s7430_s1 + $0x10] sm:$0xff]  ;;  %5070 = vmatprep.subr.bf16.mxu0 %v5471_v3  ;;  %5118 = vmatprep.subr.bf16.mxu1 %v5471_v3 }
   0x2   :  { %v5071_v4 = vpack.c.bf16 %v110_v1, %v109_v0  ;;  %v112_v5 = vld [vmem:[%s7430_s1 + $0x18] sm:$0xff]  ;;  %v113_v7 = vld [vmem:[%s7430_s1 + $0x20] sm:$0xff]  ;;  %v114_v8 = vld [vmem:[%s7430_s1 + $0x28] sm:$0xff] }
   0x3   :  { %v5074_v6 = vpack.c.bf16 %v112_v5, %v111_v2  ;;  %v5077_v9 = vpack.c.bf16 %v114_v8, %v113_v7  ;;  %v115_v10 = vld [vmem:[%s7430_s1 + $0x30] sm:$0xff]  ;;  %v116_v11 = vld [vmem:[%s7430_s1 + $0x38] sm:$0xff]  ;;  %v46_v12 = vld [vmem:[%s7429_s0 + $0x8] sm:$0xff] }
   0x4   :  { %5072 = vmatpush1.bf16.msra.mxu0 %v5071_v4  ;;  %v5080_v13 = vpack.c.bf16 %v116_v11, %v115_v10  ;;  %212 = vmatprep.mubr.f32.mxu0 %v46_v12  ;;  %v117_v14 = vld [vmem:[%s7430_s1 + $0x40] sm:$0xff]  ;;  %v118_v15 = vld [vmem:[%s7430_s1 + $0x48] sm:$0xff]  ;;  %v119_v17 = vld [vmem:[%s7430_s1 + $0x50] sm:$0xff] }
   0x5   :  { %5073 = vmatprep.subr.bf16.mxu0 %v5471_v3  ;;  %v5083_v16 = vpack.c.bf16 %v118_v15, %v117_v14  ;;  %v120_v18 = vld [vmem:[%s7430_s1 + $0x58] sm:$0xff]  ;;  %v121_v20 = vld [vmem:[%s7430_s1 + $0x60] sm:$0xff]  ;;  %v122_v21 = vld [vmem:[%s7430_s1 + $0x68] sm:$0xff] }
   0x6   :  { %v5086_v19 = vpack.c.bf16 %v120_v18, %v119_v17  ;;  %v5089_v22 = vpack.c.bf16 %v122_v21, %v121_v20  ;;  %v123_v23 = vld [vmem:[%s7430_s1 + $0x70] sm:$0xff]  ;;  %v124_v24 = vld [vmem:[%s7430_s1 + $0x78] sm:$0xff] }
   0x8   :  { %5075 = vmatpush1.bf16.msra.mxu0 %v5074_v6 }
   0x9   :  { %5076 = vmatprep.subr.bf16.mxu0 %v5471_v3 }
   0xc   :  { %5078 = vmatpush1.bf16.msra.mxu0 %v5077_v9 }
   0xd   :  { %5079 = vmatprep.subr.bf16.mxu0 %v5471_v3 }
  0x10   :  { %5081 = vmatpush1.bf16.msra.mxu0 %v5080_v13 }
  0x11   :  { %5082 = vmatprep.subr.bf16.mxu0 %v5471_v3 }
  0x14   :  { %5084 = vmatpush1.bf16.msra.mxu0 %v5083_v16 }
  0x15   :  { %5085 = vmatprep.subr.bf16.mxu0 %v5471_v3 }
  0x18   :  { %5087 = vmatpush1.bf16.msra.mxu0 %v5086_v19 }
  0x19   :  { %5088 = vmatprep.subr.bf16.mxu0 %v5471_v3 }
  0x1a   :  { %18 = vsyncpa [#allocation7], 0  ;;  %v5092_v25 = vpack.c.bf16 %v124_v24, %v123_v23  ;;  %v125_v26 = vld [vmem:[%s7430_s1 + $0x80] sm:$0xff]  ;;  %v126_v27 = vld [vmem:[%s7430_s1 + $0x88] sm:$0xff]  ;;  %vm5472_vm0 = vmmov 0   ;;  %vm405_vm1 = vcmask 261120  }
  0x1b   :  { %v5095_v28 = vpack.c.bf16 %v126_v27, %v125_v26  ;;  %v127_v29 = vld [vmem:[%s7430_s1 + $0x90] sm:$0xff]  ;;  %v128_v30 = vld [vmem:[%s7430_s1 + $0x98] sm:$0xff]  ;;  %v129_v32 = vld [vmem:[%s7430_s1 + $0xa0] sm:$0xff]  ;;  %vm439_vm2 = vcmask 257024   ;;  %vm2653_vm3 = vcmask 523264   ;;  %vm2658_vm4 = vcmask 519168  }
  0x1c   :  { %5090 = vmatpush1.bf16.msra.mxu0 %v5089_v22  ;;  %v5098_v31 = vpack.c.bf16 %v128_v30, %v127_v29  ;;  %v130_v33 = vld [vmem:[%s7430_s1 + $0xa8] sm:$0xff]  ;;  %v131_v35 = vld [vmem:[%s7430_s1 + $0xb0] sm:$0xff]  ;;  %v132_v36 = vld [vmem:[%s7430_s1 + $0xb8] sm:$0xff]  ;;  %vm3948_vm5 = vcmask 140288  }
  0x1d   :  { %5091 = vmatprep.subr.bf16.mxu0 %v5471_v3  ;;  %v5101_v34 = vpack.c.bf16 %v130_v33, %v129_v32  ;;  %v5104_v37 = vpack.c.bf16 %v132_v36, %v131_v35  ;;  %v133_v38 = vld [vmem:[%s7430_s1 + $0xc0] sm:$0xff]  ;;  %v134_v39 = vld [vmem:[%s7430_s1 + $0xc8] sm:$0xff]  ;;  %v135_v41 = vld [vmem:[%s7430_s1 + $0xd0] sm:$0xff] }
  0x1e   :  { %v5107_v40 = vpack.c.bf16 %v134_v39, %v133_v38  ;;  %v136_v42 = vld [vmem:[%s7430_s1 + $0xd8] sm:$0xff]  ;;  %v137_v44 = vld [vmem:[%s7430_s1 + $0xe0] sm:$0xff]  ;;  %v138_v45 = vld [vmem:[%s7430_s1 + $0xe8] sm:$0xff] }
  0x1f   :  { %v5110_v43 = vpack.c.bf16 %v136_v42, %v135_v41  ;;  %v5113_v46 = vpack.c.bf16 %v138_v45, %v137_v44  ;;  %v139_v47 = vld [vmem:[%s7430_s1 + $0xf0] sm:$0xff]  ;;  %v140_v48 = vld [vmem:[%s7430_s1 + $0xf8] sm:$0xff]  ;;  %v45_v50 = vld [vmem:[%s7429_s0] sm:$0xff] }
  0x20   :  { %5093 = vmatpush1.bf16.msra.mxu0 %v5092_v25  ;;  %v5116_v49 = vpack.c.bf16 %v140_v48, %v139_v47  ;;  %v48_v51 = vld [vmem:[%s7429_s0 + $0x18] sm:$0xff]  ;;  %v47_v52 = vld [vmem:[%s7429_s0 + $0x10] sm:$0xff]  ;;  %v50_v53 = vld [vmem:[%s7429_s0 + $0x28] sm:$0xff] }
  0x21   :  { %5094 = vmatprep.subr.bf16.mxu0 %v5471_v3  ;;  %v49_v54 = vld [vmem:[%s7429_s0 + $0x20] sm:$0xff]  ;;  %v52_v55 = vld [vmem:[%s7429_s0 + $0x38] sm:$0xff]  ;;  %v51_v56 = vld [vmem:[%s7429_s0 + $0x30] sm:$0xff] }
  0x22   :  { %v54_v57 = vld [vmem:[%s7429_s0 + $0x48] sm:$0xff]  ;;  %v53_v58 = vld [vmem:[%s7429_s0 + $0x40] sm:$0xff]  ;;  %v56_v59 = vld [vmem:[%s7429_s0 + $0x58] sm:$0xff] }
  0x23   :  { %v55_v60 = vld [vmem:[%s7429_s0 + $0x50] sm:$0xff]  ;;  %v58_v61 = vld [vmem:[%s7429_s0 + $0x68] sm:$0xff]  ;;  %v57_v62 = vld [vmem:[%s7429_s0 + $0x60] sm:$0xff] }
  0x24   :  { %5096 = vmatpush1.bf16.msra.mxu0 %v5095_v28  ;;  %v60_v63 = vld [vmem:[%s7429_s0 + $0x78] sm:$0xff]  ;;  %v59_v0 = vld [vmem:[%s7429_s0 + $0x70] sm:$0xff]  ;;  %v62_v1 = vld [vmem:[%s7429_s0 + $0x88] sm:$0xff] }
  0x25   :  { %5097 = vmatprep.subr.bf16.mxu0 %v5471_v3  ;;  %v61_v2 = vld [vmem:[%s7429_s0 + $0x80] sm:$0xff]  ;;  %v64_v4 = vld [vmem:[%s7429_s0 + $0x98] sm:$0xff]  ;;  %v63_v5 = vld [vmem:[%s7429_s0 + $0x90] sm:$0xff] }
  0x26   :  { %v66_v6 = vld [vmem:[%s7429_s0 + $0xa8] sm:$0xff]  ;;  %v65_v7 = vld [vmem:[%s7429_s0 + $0xa0] sm:$0xff]  ;;  %v68_v8 = vld [vmem:[%s7429_s0 + $0xb8] sm:$0xff] }
  0x27   :  { %v67_v9 = vld [vmem:[%s7429_s0 + $0xb0] sm:$0xff]  ;;  %v70_v10 = vld [vmem:[%s7429_s0 + $0xc8] sm:$0xff]  ;;  %v69_v11 = vld [vmem:[%s7429_s0 + $0xc0] sm:$0xff] }
  0x28   :  { %5099 = vmatpush1.bf16.msra.mxu0 %v5098_v31  ;;  %v72_v12 = vld [vmem:[%s7429_s0 + $0xd8] sm:$0xff]  ;;  %v71_v13 = vld [vmem:[%s7429_s0 + $0xd0] sm:$0xff]  ;;  %v74_v14 = vld [vmem:[%s7429_s0 + $0xe8] sm:$0xff] }
  0x29   :  { %5100 = vmatprep.subr.bf16.mxu0 %v5471_v3  ;;  %v73_v15 = vld [vmem:[%s7429_s0 + $0xe0] sm:$0xff]  ;;  %v76_v16 = vld [vmem:[%s7429_s0 + $0xf8] sm:$0xff]  ;;  %v75_v17 = vld [vmem:[%s7429_s0 + $0xf0] sm:$0xff] }
  0x2a   :  { %v78_v18 = vld [vmem:[%s7429_s0 + $0x108] sm:$0xff]  ;;  %v77_v19 = vld [vmem:[%s7429_s0 + $0x100] sm:$0xff]  ;;  %v80_v20 = vld [vmem:[%s7429_s0 + $0x118] sm:$0xff] }
  0x2b   :  { %v79_v21 = vld [vmem:[%s7429_s0 + $0x110] sm:$0xff]  ;;  %v82_v22 = vld [vmem:[%s7429_s0 + $0x128] sm:$0xff]  ;;  %v81_v23 = vld [vmem:[%s7429_s0 + $0x120] sm:$0xff] }
  0x2c   :  { %5102 = vmatpush1.bf16.msra.mxu0 %v5101_v34  ;;  %v84_v24 = vld [vmem:[%s7429_s0 + $0x138] sm:$0xff]  ;;  %v83_v25 = vld [vmem:[%s7429_s0 + $0x130] sm:$0xff]  ;;  %v86_v26 = vld [vmem:[%s7429_s0 + $0x148] sm:$0xff] }
  0x2d   :  { %5103 = vmatprep.subr.bf16.mxu0 %v5471_v3  ;;  %v85_v27 = vld [vmem:[%s7429_s0 + $0x140] sm:$0xff]  ;;  %v88_v28 = vld [vmem:[%s7429_s0 + $0x158] sm:$0xff]  ;;  %v87_v29 = vld [vmem:[%s7429_s0 + $0x150] sm:$0xff] }
  0x2e   :  { %v90_v30 = vld [vmem:[%s7429_s0 + $0x168] sm:$0xff]  ;;  %v89_v31 = vld [vmem:[%s7429_s0 + $0x160] sm:$0xff]  ;;  %v92_v32 = vld [vmem:[%s7429_s0 + $0x178] sm:$0xff] }
  0x2f   :  { %v91_v33 = vld [vmem:[%s7429_s0 + $0x170] sm:$0xff]  ;;  %v94_v34 = vld [vmem:[%s7429_s0 + $0x188] sm:$0xff]  ;;  %v93_v35 = vld [vmem:[%s7429_s0 + $0x180] sm:$0xff] }
  0x30   :  { %5105 = vmatpush1.bf16.msra.mxu0 %v5104_v37  ;;  %v96_v36 = vld [vmem:[%s7429_s0 + $0x198] sm:$0xff]  ;;  %v95_v37 = vld [vmem:[%s7429_s0 + $0x190] sm:$0xff]  ;;  %v98_v38 = vld [vmem:[%s7429_s0 + $0x1a8] sm:$0xff] }
  0x31   :  { %5106 = vmatprep.subr.bf16.mxu0 %v5471_v3  ;;  %v97_v39 = vld [vmem:[%s7429_s0 + $0x1a0] sm:$0xff]  ;;  %v99_v41 = vld [vmem:[%s7429_s0 + $0x1b0] sm:$0xff]  ;;  %v102_v42 = vld [vmem:[%s7429_s0 + $0x1c8] sm:$0xff] }
  0x32   :  { %v3966_v44 = vld [vmem:[%s7432_s3 + $0x28] sm:$0xff]  ;;  %v101_v45 = vld [vmem:[%s7429_s0 + $0x1c0] sm:$0xff]  ;;  %v104_v47 = vld [vmem:[%s7429_s0 + $0x1d8] sm:$0xff] }
  0x33   :  { %v3967_v48 = vld [vmem:[%s7432_s3 + $0x30] sm:$0xff] }
  0x34   :  { %5108 = vmatpush1.bf16.msra.mxu0 %v5107_v40  ;;  %v100_v40 = vld [vmem:[%s7429_s0 + $0x1b8] sm:$0xff] }
  0x35   :  { %5109 = vmatprep.subr.bf16.mxu0 %v5471_v3 }
  0x38   :  { %5111 = vmatpush1.bf16.msra.mxu0 %v5110_v43  ;;  %v3965_v43 = vld [vmem:[%s7432_s3 + $0x20] sm:$0xff] }
  0x39   :  { %5112 = vmatprep.subr.bf16.mxu0 %v5471_v3 }
  0x3c   :  { %5114 = vmatpush1.bf16.msra.mxu0 %v5113_v46  ;;  %v5119_v46 = vpack.c.bf16 %v3966_v44, %v3965_v43  ;;  %v465_v43 = vld [vmem:[%s7432_s3 + $0x18] sm:$0xff] }
  0x3d   :  { %5115 = vmatprep.subr.bf16.mxu0 %v5471_v3 }
  0x3e   :  { %5120 = vmatpush3.bf16.msra.mxu1 %v5119_v46 }
  0x3f   :  { %5121 = vmatprep.subr.bf16.mxu1 %v5471_v3 }
  0x40   :  { %5117 = vmatpush1.bf16.msra.mxu0 %v5116_v49  ;;  %v3968_v49 = vld [vmem:[%s7432_s3 + $0x38] sm:$0xff] }
  0x41   :  { %5178 = vmatprep.subr.bf16.mxu0 %v5471_v3 }
  0x43   :  { %213 = vmatmul.mubr.f32.vlgmr.msra.gmra.mrb[0].mxu0 %v45_v50  ;;  %v103_v50 = vld [vmem:[%s7429_s0 + $0x1d0] sm:$0xff] }
  0x44   :  { %217 = vmatprep.mubr.f32.mxu0 %v48_v51  ;;  %v5122_v51 = vpack.c.bf16 %v3968_v49, %v3967_v48 }
  0x46   :  { %5123 = vmatpush3.bf16.msra.mxu1 %v5122_v51 }
  0x47   :  { %218 = vmatmul.mubr.f32.gmra.mrb[2].mxu0 %v47_v52  ;;  %v106_v52 = vld [vmem:[%s7429_s0 + $0x1e8] sm:$0xff]  ;;  %5124 = vmatprep.subr.bf16.mxu1 %v5471_v3 }
  0x48   :  { %222 = vmatprep.mubr.f32.mxu0 %v50_v53  ;;  %v105_v53 = vld [vmem:[%s7429_s0 + $0x1e0] sm:$0xff] }
  0x4b   :  { %223 = vmatmul.mubr.f32.gmra.mrb[4].mxu0 %v49_v54  ;;  %v5473_v54 = vmov 0.0  }
  0x4c   :  { %227 = vmatprep.mubr.f32.mxu0 %v52_v55  ;;  %4504 = vmatprep.mubr.msk.f32.mxu1 %vm5472_vm0, %v5473_v54  ;;  %v108_v55 = vld [vmem:[%s7429_s0 + $0x1f8] sm:$0xff] }
  0x4f   :  { %228 = vmatmul.mubr.f32.gmra.mrb[6].mxu0 %v51_v56  ;;  %v107_v56 = vld [vmem:[%s7429_s0 + $0x1f0] sm:$0xff] }
  0x50   :  { %232 = vmatprep.mubr.f32.mxu0 %v54_v57  ;;  %v4051_v57 = vld [vmem:[%s7432_s3 + $0x140] sm:$0xff] }
  0x53   :  { %233 = vmatmul.mubr.f32.gmra.mrb[8].mxu0 %v53_v58  ;;  %v4052_v58 = vld [vmem:[%s7432_s3 + $0x148] sm:$0xff] }
  0x54   :  { %237 = vmatprep.mubr.f32.mxu0 %v56_v59  ;;  %v5179_v59 = vpack.c.bf16 %v4052_v58, %v4051_v57 }
  0x56   :  { %5180 = vmatpush3.bf16.msra.mxu0 %v5179_v59 }
  0x57   :  { %238 = vmatmul.mubr.f32.gmra.mrb[10].mxu0 %v55_v60  ;;  %v4053_v60 = vld [vmem:[%s7432_s3 + $0x150] sm:$0xff]  ;;  %5181 = vmatprep.subr.bf16.mxu0 %v5471_v3 }
  0x58   :  { %242 = vmatprep.mubr.f32.mxu0 %v58_v61  ;;  %v4054_v61 = vld [vmem:[%s7432_s3 + $0x158] sm:$0xff] }
  0x5b   :  { %243 = vmatmul.mubr.f32.gmra.mrb[12].mxu0 %v57_v62  ;;  %v5182_v62 = vpack.c.bf16 %v4054_v61, %v4053_v60 }
  0x5c   :  { %247 = vmatprep.mubr.f32.mxu0 %v60_v63  ;;  %v5886_v63 = vld [vmem:[%s7431_s2] ss:$0 sm:$0xff] }
  0x5d   :  { %5183 = vmatpush3.bf16.msra.mxu0 %v5182_v62 }
  0x5e   :  { %5190 = vmatprep.subr.bf16.mxu0 %v5471_v3 }
  0x5f   :  { %248 = vmatmul.mubr.f32.gmra.mrb[14].mxu0 %v59_v0 }
  0x60   :  { %252 = vmatprep.mubr.f32.mxu0 %v62_v1 }
  0x63   :  { %253 = vmatmul.mubr.f32.gmra.mrb[16].mxu0 %v61_v2 }
  0x64   :  { %257 = vmatprep.mubr.f32.mxu0 %v64_v4 }
  0x67   :  { %258 = vmatmul.mubr.f32.gmra.mrb[18].mxu0 %v63_v5 }
  0x68   :  { %262 = vmatprep.mubr.f32.mxu0 %v66_v6 }
  0x6b   :  { %263 = vmatmul.mubr.f32.gmra.mrb[20].mxu0 %v65_v7 }
  0x6c   :  { %267 = vmatprep.mubr.f32.mxu0 %v68_v8 }
  0x6f   :  { %268 = vmatmul.mubr.f32.gmra.mrb[22].mxu0 %v67_v9 }
  0x70   :  { %272 = vmatprep.mubr.f32.mxu0 %v70_v10 }
  0x73   :  { %273 = vmatmul.mubr.f32.gmra.mrb[24].mxu0 %v69_v11 }
  0x74   :  { %277 = vmatprep.mubr.f32.mxu0 %v72_v12 }
  0x77   :  { %278 = vmatmul.mubr.f32.gmra.mrb[26].mxu0 %v71_v13 }
  0x78   :  { %282 = vmatprep.mubr.f32.mxu0 %v74_v14 }
  0x7b   :  { %283 = vmatmul.mubr.f32.gmra.mrb[28].mxu0 %v73_v15 }
  0x7c   :  { %287 = vmatprep.mubr.f32.mxu0 %v76_v16 }
  0x7f   :  { %288 = vmatmul.mubr.f32.gmra.mrb[30].mxu0 %v75_v17 }
  0x80   :  { %292 = vmatprep.mubr.f32.mxu0 %v78_v18 }
  0x83   :  { %293 = vmatmul.mubr.f32.gmra.mrb[32].mxu0 %v77_v19 }
  0x84   :  { %297 = vmatprep.mubr.f32.mxu0 %v80_v20 }
  0x87   :  { %298 = vmatmul.mubr.f32.gmra.mrb[34].mxu0 %v79_v21 }
  0x88   :  { %302 = vmatprep.mubr.f32.mxu0 %v82_v22 }
  0x8b   :  { %303 = vmatmul.mubr.f32.gmra.mrb[36].mxu0 %v81_v23 }
  0x8c   :  { %307 = vmatprep.mubr.f32.mxu0 %v84_v24 }
  0x8f   :  { %308 = vmatmul.mubr.f32.gmra.mrb[38].mxu0 %v83_v25 }
  0x90   :  { %312 = vmatprep.mubr.f32.mxu0 %v86_v26 }
  0x93   :  { %313 = vmatmul.mubr.f32.gmra.mrb[40].mxu0 %v85_v27 }
  0x94   :  { %317 = vmatprep.mubr.f32.mxu0 %v88_v28 }
  0x97   :  { %318 = vmatmul.mubr.f32.gmra.mrb[42].mxu0 %v87_v29 }
  0x98   :  { %322 = vmatprep.mubr.f32.mxu0 %v90_v30 }
  0x9b   :  { %323 = vmatmul.mubr.f32.gmra.mrb[44].mxu0 %v89_v31 }
  0x9c   :  { %327 = vmatprep.mubr.f32.mxu0 %v92_v32 }
  0x9f   :  { %328 = vmatmul.mubr.f32.gmra.mrb[46].mxu0 %v91_v33 }
  0xa0   :  { %332 = vmatprep.mubr.f32.mxu0 %v94_v34  ;;  %v462_v34 = vld [vmem:[%s7432_s3] sm:$0xff] }
  0xa3   :  { %333 = vmatmul.mubr.f32.gmra.mrb[48].mxu0 %v93_v35  ;;  %v463_v35 = vld [vmem:[%s7432_s3 + $0x8] sm:$0xff] }
  0xa4   :  { %337 = vmatprep.mubr.f32.mxu0 %v96_v36 }
  0xa7   :  { %338 = vmatmul.mubr.f32.gmra.mrb[50].mxu0 %v95_v37 }
  0xa8   :  { %342 = vmatprep.mubr.f32.mxu0 %v98_v38 }
  0xab   :  { %343 = vmatmul.mubr.f32.gmra.mrb[52].mxu0 %v97_v39 }
  0xac   :  { %347 = vmatprep.mubr.f32.mxu0 %v100_v40  ;;  %v5125_v40 = vpack.c.bf16 %v463_v35, %v462_v34 }
  0xaf   :  { %348 = vmatmul.mubr.f32.gmra.mrb[54].mxu0 %v99_v41 }
  0xb0   :  { %352 = vmatprep.mubr.f32.mxu0 %v102_v42  ;;  %v464_v42 = vld [vmem:[%s7432_s3 + $0x10] sm:$0xff] }
  0xb3   :  { %353 = vmatmul.mubr.f32.gmra.mrb[56].mxu0 %v101_v45 }
  0xb4   :  { %357 = vmatprep.mubr.f32.mxu0 %v104_v47 }
  0xb7   :  { %358 = vmatmul.mubr.f32.gmra.mrb[58].mxu0 %v103_v50  ;;  %v5128_v50 = vpack.c.bf16 %v465_v43, %v464_v42 }
  0xb8   :  { %362 = vmatprep.mubr.f32.mxu0 %v106_v52 }
  0xbb   :  { %363 = vmatmul.mubr.f32.gmra.mrb[60].mxu0 %v105_v53 }
  0xbc   :  { %367 = vmatprep.mubr.f32.mxu0 %v108_v55 }
  0xbf   :  { %368 = vmatmul.mubr.f32.gmra.mrb[62].mxu0 %v107_v56 }
  0xc0   :  { %4734 = vmatprep.mubr.msk.f32.mxu0 %vm5472_vm0, %v5473_v54 }
 0x116   :  { %v214_v0 = vpop.f32.mrb[0].mxu0 }
 0x117   :  { %v215_v1 = vadd.f32 %v5886_v63, %v214_v0  ;;  %v216_v2 = vpop.f32.mrb[1].mxu0 }
 0x119   :  { %v373_v4 = vmax.f32 %v215_v1, 0.0 }
 0x11a   :  { %v219_v5 = vpop.f32.mrb[2].mxu0 }
 0x11b   :  { %406 = vst.msk [vmem:[#allocation2] sm:$0xff] %vm405_vm1, %v373_v4  ;;  %v220_v6 = vadd.f32 %v5886_v63, %v219_v5  ;;  %v221_v7 = vpop.f32.mrb[3].mxu0 }
 0x11d   :  { %v374_v8 = vmax.f32 %v220_v6, 0.0 }
 0x11e   :  { %v224_v9 = vpop.f32.mrb[4].mxu0 }
 0x11f   :  { %407 = vst.msk [vmem:[#allocation2 + $0x8] sm:$0xff] %vm405_vm1, %v374_v8  ;;  %v225_v10 = vadd.f32 %v5886_v63, %v224_v9  ;;  %v226_v11 = vpop.f32.mrb[5].mxu0 }
 0x121   :  { %v375_v12 = vmax.f32 %v225_v10, 0.0 }
 0x122   :  { %v438_v13 = vld [vmem:[#allocation2] sm:$0xf]  ;;  %v229_v14 = vpop.f32.mrb[6].mxu0  ;;  %v466_v27 = vld [vmem:[#allocation2 + $0x4] sm:$0xf] }
 0x123   :  { %440 = vst.msk [vmem:[#allocation4] sm:$0xf] %vm439_vm2, %v438_v13  ;;  %v230_v15 = vadd.f32 %v5886_v63, %v229_v14  ;;  %v231_v16 = vpop.f32.mrb[7].mxu0 }
 0x124   :  { %408 = vst.msk [vmem:[#allocation2 + $0x10] sm:$0xff] %vm405_vm1, %v375_v12 }
 0x125   :  { %v376_v17 = vmax.f32 %v230_v15, 0.0 }
 0x126   :  { %v441_v18 = vld [vmem:[#allocation2 + $0x8] sm:$0xf]  ;;  %v234_v19 = vpop.f32.mrb[8].mxu0  ;;  %v468_v29 = vld [vmem:[#allocation2 + $0xc] sm:$0xf] }
 0x127   :  { %442 = vst.msk [vmem:[#allocation4 + $0x4] sm:$0xf] %vm439_vm2, %v441_v18  ;;  %v235_v20 = vadd.f32 %v5886_v63, %v234_v19  ;;  %v236_v21 = vpop.f32.mrb[9].mxu0  ;;  %v704_v45 = vld [vmem:[#allocation2 + $0x8] sm:$0xf] }
 0x128   :  { %409 = vst.msk [vmem:[#allocation2 + $0x18] sm:$0xff] %vm405_vm1, %v376_v17  ;;  %v842_v57 = vld [vmem:[#allocation2 + $0xc] sm:$0xf] }
 0x129   :  { %v377_v23 = vmax.f32 %v235_v20, 0.0 }
 0x12a   :  { %v239_v24 = vpop.f32.mrb[10].mxu0 }
 0x12b   :  { %v443_v22 = vld [vmem:[#allocation2 + $0x10] sm:$0xf]  ;;  %v240_v25 = vadd.f32 %v5886_v63, %v239_v24  ;;  %v241_v26 = vpop.f32.mrb[11].mxu0  ;;  %410 = vst.msk [vmem:[#allocation2 + $0x20] sm:$0xff] %vm405_vm1, %v377_v23  ;;  %v844_v59 = vld [vmem:[#allocation2 + $0x14] sm:$0xf] }
 0x12c   :  { %444 = vst.msk [vmem:[#allocation4 + $0x8] sm:$0xf] %vm439_vm2, %v443_v22  ;;  %v706_v46 = vld [vmem:[#allocation2 + $0x10] sm:$0xf]  ;;  %v470_v11 = vld [vmem:[#allocation2 + $0x14] sm:$0xf] }
 0x12d   :  { %v378_v30 = vmax.f32 %v240_v25, 0.0 }
 0x12e   :  { %v5902_v28 = vld [vmem:[#allocation4] sm:$0xff]  ;;  %v244_v31 = vpop.f32.mrb[12].mxu0 }
 0x12f   :  { %467 = vst.msk [vmem:[#allocation4] sm:$0xf] %vm439_vm2, %v466_v27  ;;  %469 = vst.msk [vmem:[#allocation4 + $0x4] sm:$0xf] %vm439_vm2, %v468_v29  ;;  %v245_v32 = vadd.f32 %v5886_v63, %v244_v31  ;;  %v246_v33 = vpop.f32.mrb[13].mxu0 }
 0x130   :  { %411 = vst.msk [vmem:[#allocation2 + $0x28] sm:$0xff] %vm405_vm1, %v378_v30  ;;  %v708_v25 = vld [vmem:[#allocation2 + $0x18] sm:$0xf] }
 0x131   :  { %v379_v36 = vmax.f32 %v245_v32, 0.0 }
 0x132   :  { %v249_v37 = vpop.f32.mrb[14].mxu0  ;;  %v980_v6 = vld [vmem:[#allocation2 + $0x20] sm:$0xf]  ;;  %v1118_v20 = vld [vmem:[#allocation2 + $0x24] sm:$0xf] }
 0x133   :  { %v250_v38 = vadd.f32 %v5886_v63, %v249_v37  ;;  %v251_v39 = vpop.f32.mrb[15].mxu0  ;;  %412 = vst.msk [vmem:[#allocation2 + $0x30] sm:$0xff] %vm405_vm1, %v379_v36 }
 0x135   :  { %v380_v41 = vmax.f32 %v250_v38, 0.0 }
 0x136   :  { %v484_v44 = vld [vmem:[#allocation4] sm:$0xff]  ;;  %v254_v47 = vpop.f32.mrb[16].mxu0 }
 0x137   :  { %705 = vst.msk [vmem:[#allocation4] sm:$0xf] %vm439_vm2, %v704_v45  ;;  %707 = vst.msk [vmem:[#allocation4 + $0x4] sm:$0xf] %vm439_vm2, %v706_v46  ;;  %v255_v48 = vadd.f32 %v5886_v63, %v254_v47  ;;  %4505 = vmatmul.mubr.msk.f32.vlgmr.msra.gmra.mrb[0].mxu1 %vm405_vm1, %v484_v44  ;;  %v256_v49 = vpop.f32.mrb[17].mxu0 }
 0x138   :  { %413 = vst.msk [vmem:[#allocation2 + $0x38] sm:$0xff] %vm405_vm1, %v380_v41  ;;  %4507 = vmatprep.mubr.msk.f32.mxu1 %vm5472_vm0, %v5473_v54  ;;  %5126 = vmatpush3.bf16.msra.mxu1 %v5125_v40  ;;  %v982_v8 = vld [vmem:[#allocation2 + $0x28] sm:$0xf]  ;;  %v1120_v22 = vld [vmem:[#allocation2 + $0x2c] sm:$0xf] }
 0x139   :  { %v381_v51 = vmax.f32 %v255_v48, 0.0  ;;  %5127 = vmatprep.subr.bf16.mxu1 %v5471_v3  ;;  %v1256_v42 = vld [vmem:[#allocation2 + $0x28] sm:$0xf]  ;;  %v846_v47 = vld [vmem:[#allocation2 + $0x1c] sm:$0xf] }
 0x13a   :  { %v259_v52 = vpop.f32.mrb[18].mxu0  ;;  %v1258_v43 = vld [vmem:[#allocation2 + $0x30] sm:$0xf] }
 0x13b   :  { %414 = vst.msk [vmem:[#allocation2 + $0x40] sm:$0xff] %vm405_vm1, %v381_v51  ;;  %v260_v53 = vadd.f32 %v5886_v63, %v259_v52  ;;  %v261_v55 = vpop.f32.mrb[19].mxu0 }
 0x13c   :  { %5129 = vmatpush3.bf16.msra.mxu1 %v5128_v50 }
 0x13d   :  { %v382_v56 = vmax.f32 %v260_v53, 0.0  ;;  %5130 = vmatprep.subr.bf16.mxu1 %v5471_v3 }
 0x13e   :  { %v5933_v58 = vld [vmem:[#allocation4] sm:$0xff]  ;;  %v264_v60 = vpop.f32.mrb[20].mxu0 }
 0x13f   :  { %845 = vst.msk [vmem:[#allocation4 + $0x4] sm:$0xf] %vm439_vm2, %v844_v59  ;;  %843 = vst.msk [vmem:[#allocation4] sm:$0xf] %vm439_vm2, %v842_v57  ;;  %v265_v61 = vadd.f32 %v5886_v63, %v264_v60  ;;  %v266_v62 = vpop.f32.mrb[21].mxu0 }
 0x140   :  { %415 = vst.msk [vmem:[#allocation2 + $0x48] sm:$0xff] %vm405_vm1, %v382_v56  ;;  %v1394_v57 = vld [vmem:[#allocation2 + $0x2c] sm:$0xf]  ;;  %v1396_v60 = vld [vmem:[#allocation2 + $0x34] sm:$0xf] }
 0x141   :  { %v383_v0 = vmax.f32 %v265_v61, 0.0  ;;  %v984_v62 = vld [vmem:[#allocation2 + $0x30] sm:$0xf] }
 0x142   :  { %v445_v1 = vld [vmem:[#allocation2 + $0x40] sm:$0xf]  ;;  %v269_v2 = vpop.f32.mrb[22].mxu0  ;;  %v472_v14 = vld [vmem:[#allocation2 + $0x44] sm:$0xf] }
 0x143   :  { %446 = vst.msk [vmem:[#allocation4 + $0xc] sm:$0xf] %vm439_vm2, %v445_v1  ;;  %v270_v4 = vadd.f32 %v5886_v63, %v269_v2  ;;  %v271_v5 = vpop.f32.mrb[23].mxu0 }
 0x144   :  { %416 = vst.msk [vmem:[#allocation2 + $0x50] sm:$0xff] %vm405_vm1, %v383_v0 }
 0x145   :  { %v384_v10 = vmax.f32 %v270_v4, 0.0 }
 0x146   :  { %v5942_v7 = vld [vmem:[#allocation4] sm:$0xff]  ;;  %v274_v12 = vpop.f32.mrb[24].mxu0 }
 0x147   :  { %v447_v9 = vld [vmem:[#allocation2 + $0x48] sm:$0xf]  ;;  %981 = vst.msk [vmem:[#allocation4] sm:$0xf] %vm439_vm2, %v980_v6  ;;  %983 = vst.msk [vmem:[#allocation4 + $0x4] sm:$0xf] %vm439_vm2, %v982_v8  ;;  %v275_v16 = vadd.f32 %v5886_v63, %v274_v12 }
 0x148   :  { %448 = vst.msk [vmem:[#allocation4 + $0x10] sm:$0xf] %vm439_vm2, %v447_v9  ;;  %v276_v17 = vpop.f32.mrb[25].mxu0  ;;  %v474_v29 = vld [vmem:[#allocation2 + $0x4c] sm:$0xf] }
 0x149   :  { %417 = vst.msk [vmem:[#allocation2 + $0x58] sm:$0xff] %vm405_vm1, %v384_v10  ;;  %v385_v18 = vmax.f32 %v275_v16, 0.0  ;;  %v710_v30 = vld [vmem:[#allocation2 + $0x48] sm:$0xf]  ;;  %v848_v48 = vld [vmem:[#allocation2 + $0x4c] sm:$0xf] }
 0x14a   :  { %v5948_v13 = vld [vmem:[#allocation4 + $0x8] sm:$0xff]  ;;  %v279_v19 = vpop.f32.mrb[26].mxu0 }
 0x14b   :  { %v449_v15 = vld [vmem:[#allocation2 + $0x50] sm:$0xf]  ;;  %471 = vst.msk [vmem:[#allocation4 + $0x8] sm:$0xf] %vm439_vm2, %v470_v11  ;;  %473 = vst.msk [vmem:[#allocation4 + $0xc] sm:$0xf] %vm439_vm2, %v472_v14  ;;  %v280_v23 = vadd.f32 %v5886_v63, %v279_v19 }
 0x14c   :  { %450 = vst.msk [vmem:[#allocation4 + $0x14] sm:$0xf] %vm439_vm2, %v449_v15  ;;  %v281_v24 = vpop.f32.mrb[27].mxu0  ;;  %v476_v35 = vld [vmem:[#allocation2 + $0x54] sm:$0xf] }
 0x14d   :  { %418 = vst.msk [vmem:[#allocation2 + $0x60] sm:$0xff] %vm405_vm1, %v385_v18  ;;  %v386_v26 = vmax.f32 %v280_v23, 0.0  ;;  %v712_v49 = vld [vmem:[#allocation2 + $0x50] sm:$0xf]  ;;  %v850_v1 = vld [vmem:[#allocation2 + $0x54] sm:$0xf] }
 0x14e   :  { %v5954_v21 = vld [vmem:[#allocation4] sm:$0xff]  ;;  %v284_v27 = vpop.f32.mrb[28].mxu0  ;;  %v1532_v18 = vld [vmem:[#allocation2 + $0x40] sm:$0xf]  ;;  %v1122_v24 = vld [vmem:[#allocation2 + $0x34] sm:$0xf] }
 0x14f   :  { %1119 = vst.msk [vmem:[#allocation4] sm:$0xf] %vm439_vm2, %v1118_v20  ;;  %1121 = vst.msk [vmem:[#allocation4 + $0x4] sm:$0xf] %vm439_vm2, %v1120_v22  ;;  %v285_v31 = vadd.f32 %v5886_v63, %v284_v27  ;;  %v286_v32 = vpop.f32.mrb[29].mxu0 }
 0x150   :  { %419 = vst.msk [vmem:[#allocation2 + $0x68] sm:$0xff] %vm405_vm1, %v386_v26  ;;  %v714_v52 = vld [vmem:[#allocation2 + $0x58] sm:$0xf]  ;;  %v852_v2 = vld [vmem:[#allocation2 + $0x5c] sm:$0xf] }
 0x151   :  { %v387_v37 = vmax.f32 %v285_v31, 0.0  ;;  %v1534_v19 = vld [vmem:[#allocation2 + $0x48] sm:$0xf] }
 0x152   :  { %v485_v33 = vld [vmem:[#allocation4 + $0x8] sm:$0xff]  ;;  %v289_v36 = vpop.f32.mrb[30].mxu0 }
 0x153   :  { %v5961_v34 = vld [vmem:[#allocation4 + $0x10] sm:$0xff]  ;;  %709 = vst.msk [vmem:[#allocation4 + $0x8] sm:$0xf] %vm439_vm2, %v708_v25  ;;  %711 = vst.msk [vmem:[#allocation4 + $0xc] sm:$0xf] %vm439_vm2, %v710_v30  ;;  %v290_v38 = vadd.f32 %v5886_v63, %v289_v36  ;;  %v291_v39 = vpop.f32.mrb[31].mxu0  ;;  %4508 = vmatmul.mubr.msk.f32.gmra.mrb[2].mxu1 %vm405_vm1, %v485_v33 }
 0x154   :  { %475 = vst.msk [vmem:[#allocation4 + $0x10] sm:$0xf] %vm439_vm2, %v474_v29  ;;  %477 = vst.msk [vmem:[#allocation4 + $0x14] sm:$0xf] %vm439_vm2, %v476_v35  ;;  %4510 = vmatprep.mubr.msk.f32.mxu1 %vm5472_vm0, %v5473_v54  ;;  %v986_v8 = vld [vmem:[#allocation2 + $0x60] sm:$0xf] }
 0x155   :  { %420 = vst.msk [vmem:[#allocation2 + $0x70] sm:$0xff] %vm405_vm1, %v387_v37  ;;  %v388_v40 = vmax.f32 %v290_v38, 0.0  ;;  %v1124_v25 = vld [vmem:[#allocation2 + $0x64] sm:$0xf] }
 0x156   :  { %v5973_v41 = vld [vmem:[#allocation4] sm:$0xff]  ;;  %v294_v44 = vpop.f32.mrb[32].mxu0  ;;  %v1670_v39 = vld [vmem:[#allocation2 + $0x44] sm:$0xf] }
 0x157   :  { %1257 = vst.msk [vmem:[#allocation4] sm:$0xf] %vm439_vm2, %v1256_v42  ;;  %1259 = vst.msk [vmem:[#allocation4 + $0x4] sm:$0xf] %vm439_vm2, %v1258_v43  ;;  %v295_v45 = vadd.f32 %v5886_v63, %v294_v44  ;;  %v296_v46 = vpop.f32.mrb[33].mxu0 }
 0x158   :  { %421 = vst.msk [vmem:[#allocation2 + $0x78] sm:$0xff] %vm405_vm1, %v388_v40  ;;  %v988_v26 = vld [vmem:[#allocation2 + $0x68] sm:$0xf]  ;;  %v1672_v42 = vld [vmem:[#allocation2 + $0x4c] sm:$0xf] }
 0x159   :  { %v389_v53 = vmax.f32 %v295_v45, 0.0 }
 0x15a   :  { %v5979_v50 = vld [vmem:[#allocation4 + $0x8] sm:$0xff]  ;;  %v299_v55 = vpop.f32.mrb[34].mxu0 }
 0x15b   :  { %v486_v51 = vld [vmem:[#allocation4 + $0x10] sm:$0xff]  ;;  %847 = vst.msk [vmem:[#allocation4 + $0x8] sm:$0xf] %vm439_vm2, %v846_v47  ;;  %849 = vst.msk [vmem:[#allocation4 + $0xc] sm:$0xf] %vm439_vm2, %v848_v48  ;;  %v300_v56 = vadd.f32 %v5886_v63, %v299_v55  ;;  %v301_v0 = vpop.f32.mrb[35].mxu0 }
 0x15c   :  { %713 = vst.msk [vmem:[#allocation4 + $0x10] sm:$0xf] %vm439_vm2, %v712_v49  ;;  %715 = vst.msk [vmem:[#allocation4 + $0x14] sm:$0xf] %vm439_vm2, %v714_v52  ;;  %4511 = vmatmul.mubr.msk.f32.gmra.mrb[4].mxu1 %vm405_vm1, %v486_v51  ;;  %v990_v32 = vld [vmem:[#allocation2 + $0x70] sm:$0xf] }
 0x15d   :  { %422 = vst.msk [vmem:[#allocation2 + $0x80] sm:$0xff] %vm405_vm1, %v389_v53  ;;  %4513 = vmatprep.mubr.msk.f32.mxu1 %vm5472_vm0, %v5473_v54  ;;  %v390_v61 = vmax.f32 %v300_v56, 0.0  ;;  %v1260_v51 = vld [vmem:[#allocation2 + $0x38] sm:$0xf]  ;;  %v1126_v52 = vld [vmem:[#allocation2 + $0x6c] sm:$0xf] }
 0x15e   :  { %v5990_v59 = vld [vmem:[#allocation4] sm:$0xff]  ;;  %v304_v4 = vpop.f32.mrb[36].mxu0 }
 0x15f   :  { %1395 = vst.msk [vmem:[#allocation4] sm:$0xf] %vm439_vm2, %v1394_v57  ;;  %1397 = vst.msk [vmem:[#allocation4 + $0x4] sm:$0xf] %vm439_vm2, %v1396_v60  ;;  %v305_v9 = vadd.f32 %v5886_v63, %v304_v4  ;;  %v306_v10 = vpop.f32.mrb[37].mxu0 }
 0x160   :  { %423 = vst.msk [vmem:[#allocation2 + $0x88] sm:$0xff] %vm405_vm1, %v390_v61  ;;  %v1262_v53 = vld [vmem:[#allocation2 + $0x68] sm:$0xf]  ;;  %v1128_v57 = vld [vmem:[#allocation2 + $0x74] sm:$0xf] }
 0x161   :  { %v391_v12 = vmax.f32 %v305_v9, 0.0  ;;  %v1808_v9 = vld [vmem:[#allocation2 + $0x48] sm:$0xf]  ;;  %v1810_v10 = vld [vmem:[#allocation2 + $0x50] sm:$0xf] }
 0x162   :  { %v5995_v5 = vld [vmem:[#allocation4 + $0x8] sm:$0xff]  ;;  %v309_v14 = vpop.f32.mrb[38].mxu0 }
 0x163   :  { %v5997_v6 = vld [vmem:[#allocation4 + $0x10] sm:$0xff]  ;;  %985 = vst.msk [vmem:[#allocation4 + $0x8] sm:$0xf] %vm439_vm2, %v984_v62  ;;  %987 = vst.msk [vmem:[#allocation4 + $0xc] sm:$0xf] %vm439_vm2, %v986_v8  ;;  %v310_v15 = vadd.f32 %v5886_v63, %v309_v14  ;;  %v311_v16 = vpop.f32.mrb[39].mxu0 }
 0x164   :  { %853 = vst.msk [vmem:[#allocation4 + $0x14] sm:$0xf] %vm439_vm2, %v852_v2  ;;  %851 = vst.msk [vmem:[#allocation4 + $0x10] sm:$0xf] %vm439_vm2, %v850_v1  ;;  %v451_v11 = vld [vmem:[#allocation2 + $0x80] sm:$0xf] }
 0x165   :  { %452 = vst.msk [vmem:[#allocation4 + $0x18] sm:$0xf] %vm439_vm2, %v451_v11  ;;  %v392_v27 = vmax.f32 %v310_v15, 0.0  ;;  %v478_v44 = vld [vmem:[#allocation2 + $0x84] sm:$0xf] }
 0x166   :  { %v6006_v17 = vld [vmem:[#allocation4] sm:$0xff]  ;;  %424 = vst.msk [vmem:[#allocation2 + $0x90] sm:$0xff] %vm405_vm1, %v391_v12  ;;  %v314_v20 = vpop.f32.mrb[40].mxu0 }
 0x167   :  { %1533 = vst.msk [vmem:[#allocation4] sm:$0xf] %vm439_vm2, %v1532_v18  ;;  %1535 = vst.msk [vmem:[#allocation4 + $0x4] sm:$0xf] %vm439_vm2, %v1534_v19  ;;  %v453_v22 = vld [vmem:[#allocation2 + $0x88] sm:$0xf]  ;;  %v315_v23 = vadd.f32 %v5886_v63, %v314_v20 }
 0x168   :  { %454 = vst.msk [vmem:[#allocation4 + $0x1c] sm:$0xf] %vm439_vm2, %v453_v22  ;;  %v316_v33 = vpop.f32.mrb[41].mxu0  ;;  %v480_v46 = vld [vmem:[#allocation2 + $0x8c] sm:$0xf]  ;;  %v4069_v20 = vld [vmem:[%s7432_s3 + $0x180] sm:$0xff] }
 0x169   :  { %v393_v29 = vmax.f32 %v315_v23, 0.0  ;;  %425 = vst.msk [vmem:[#allocation2 + $0x98] sm:$0xff] %vm405_vm1, %v392_v27  ;;  %v716_v14 = vld [vmem:[#allocation2 + $0x88] sm:$0xf]  ;;  %v1398_v19 = vld [vmem:[#allocation2 + $0x3c] sm:$0xf] }
 0x16a   :  { %v6013_v30 = vld [vmem:[#allocation4 + $0x8] sm:$0xff]  ;;  %v319_v35 = vpop.f32.mrb[42].mxu0  ;;  %v1400_v22 = vld [vmem:[#allocation2 + $0x6c] sm:$0xf]  ;;  %v1266_v27 = vld [vmem:[#allocation2 + $0x78] sm:$0xf] }
 0x16b   :  { %v6015_v31 = vld [vmem:[#allocation4 + $0x10] sm:$0xff]  ;;  %1123 = vst.msk [vmem:[#allocation4 + $0x8] sm:$0xf] %vm439_vm2, %v1122_v24  ;;  %1125 = vst.msk [vmem:[#allocation4 + $0xc] sm:$0xf] %vm439_vm2, %v1124_v25  ;;  %v320_v36 = vadd.f32 %v5886_v63, %v319_v35  ;;  %v321_v37 = vpop.f32.mrb[43].mxu0 }
 0x16c   :  { %989 = vst.msk [vmem:[#allocation4 + $0x10] sm:$0xf] %vm439_vm2, %v988_v26  ;;  %991 = vst.msk [vmem:[#allocation4 + $0x14] sm:$0xf] %vm439_vm2, %v990_v32  ;;  %v1264_v23 = vld [vmem:[#allocation2 + $0x70] sm:$0xf] }
 0x16d   :  { %426 = vst.msk [vmem:[#allocation2 + $0xa0] sm:$0xff] %vm405_vm1, %v393_v29  ;;  %v455_v38 = vld [vmem:[#allocation2 + $0x90] sm:$0xf]  ;;  %v394_v43 = vmax.f32 %v320_v36, 0.0  ;;  %v482_v1 = vld [vmem:[#allocation2 + $0x94] sm:$0xf] }
 0x16e   :  { %v6024_v40 = vld [vmem:[#allocation4] sm:$0xff]  ;;  %456 = vst.msk [vmem:[#allocation4 + $0x20] sm:$0xf] %vm439_vm2, %v455_v38  ;;  %v324_v47 = vpop.f32.mrb[44].mxu0  ;;  %v718_v15 = vld [vmem:[#allocation2 + $0x90] sm:$0xf] }
 0x16f   :  { %1671 = vst.msk [vmem:[#allocation4] sm:$0xf] %vm439_vm2, %v1670_v39  ;;  %1673 = vst.msk [vmem:[#allocation4 + $0x4] sm:$0xf] %vm439_vm2, %v1672_v42  ;;  %v6029_v45 = vld [vmem:[#allocation4 + $0x18] sm:$0xff]  ;;  %v325_v48 = vadd.f32 %v5886_v63, %v324_v47  ;;  %v326_v49 = vpop.f32.mrb[45].mxu0 }
 0x170   :  { %479 = vst.msk [vmem:[#allocation4 + $0x18] sm:$0xf] %vm439_vm2, %v478_v44  ;;  %481 = vst.msk [vmem:[#allocation4 + $0x1c] sm:$0xf] %vm439_vm2, %v480_v46  ;;  %v4070_v24 = vld [vmem:[%s7432_s3 + $0x188] sm:$0xff]  ;;  %v3979_v36 = vld [vmem:[%s7432_s3 + $0x40] sm:$0xff] }
 0x171   :  { %427 = vst.msk [vmem:[#allocation2 + $0xa8] sm:$0xff] %vm405_vm1, %v394_v43  ;;  %v395_v60 = vmax.f32 %v325_v48, 0.0  ;;  %v720_v33 = vld [vmem:[#allocation2 + $0x98] sm:$0xf]  ;;  %v3980_v37 = vld [vmem:[%s7432_s3 + $0x48] sm:$0xff]  ;;  %v5191_v38 = vpack.c.bf16 %v4070_v24, %v4069_v20  ;;  %v4071_v42 = vld [vmem:[%s7432_s3 + $0x190] sm:$0xff] }
 0x172   :  { %v6035_v55 = vld [vmem:[#allocation4 + $0x8] sm:$0xff]  ;;  %v329_v61 = vpop.f32.mrb[46].mxu0  ;;  %v4072_v43 = vld [vmem:[%s7432_s3 + $0x198] sm:$0xff]  ;;  %v1946_v44 = vld [vmem:[#allocation2 + $0x4c] sm:$0xf] }
 0x173   :  { %v6037_v56 = vld [vmem:[#allocation4 + $0x10] sm:$0xff]  ;;  %1261 = vst.msk [vmem:[#allocation4 + $0x8] sm:$0xf] %vm439_vm2, %v1260_v51  ;;  %1263 = vst.msk [vmem:[#allocation4 + $0xc] sm:$0xf] %vm439_vm2, %v1262_v53  ;;  %v330_v62 = vadd.f32 %v5886_v63, %v329_v61  ;;  %v331_v4 = vpop.f32.mrb[47].mxu0  ;;  %v5131_v53 = vpack.c.bf16 %v3980_v37, %v3979_v36 }
 0x174   :  { %1127 = vst.msk [vmem:[#allocation4 + $0x10] sm:$0xf] %vm439_vm2, %v1126_v52  ;;  %1129 = vst.msk [vmem:[#allocation4 + $0x14] sm:$0xf] %vm439_vm2, %v1128_v57  ;;  %v1948_v46 = vld [vmem:[#allocation2 + $0x54] sm:$0xf] }
 0x175   :  { %428 = vst.msk [vmem:[#allocation2 + $0xb0] sm:$0xff] %vm405_vm1, %v395_v60  ;;  %v6045_v0 = vld [vmem:[#allocation4 + $0x20] sm:$0xf]  ;;  %v396_v2 = vmax.f32 %v330_v62, 0.0  ;;  %v854_v49 = vld [vmem:[#allocation2 + $0x8c] sm:$0xf] }
 0x176   :  { %v6047_v8 = vld [vmem:[#allocation4] sm:$0xff]  ;;  %483 = vst.msk [vmem:[#allocation4 + $0x20] sm:$0xf] %vm439_vm2, %v482_v1  ;;  %v334_v11 = vpop.f32.mrb[48].mxu0  ;;  %v856_v52 = vld [vmem:[#allocation2 + $0x94] sm:$0xf] }
 0x177   :  { %1809 = vst.msk [vmem:[#allocation4] sm:$0xf] %vm439_vm2, %v1808_v9  ;;  %1811 = vst.msk [vmem:[#allocation4 + $0x4] sm:$0xf] %vm439_vm2, %v1810_v10  ;;  %v487_v12 = vld [vmem:[#allocation4 + $0x18] sm:$0xff]  ;;  %v335_v16 = vadd.f32 %v5886_v63, %v334_v11  ;;  %v336_v18 = vpop.f32.mrb[49].mxu0 }
 0x178   :  { %429 = vst.msk [vmem:[#allocation2 + $0xb8] sm:$0xff] %vm405_vm1, %v396_v2  ;;  %4514 = vmatmul.mubr.msk.f32.gmra.mrb[6].mxu1 %vm405_vm1, %v487_v12  ;;  %v1536_v60 = vld [vmem:[#allocation2 + $0x50] sm:$0xf]  ;;  %v3982_v62 = vld [vmem:[%s7432_s3 + $0x58] sm:$0xff]  ;;  %v5194_v2 = vpack.c.bf16 %v4072_v43, %v4071_v42  ;;  %v1402_v4 = vld [vmem:[#allocation2 + $0x74] sm:$0xf] }
 0x179   :  { %717 = vst.msk [vmem:[#allocation4 + $0x18] sm:$0xf] %vm439_vm2, %v716_v14  ;;  %719 = vst.msk [vmem:[#allocation4 + $0x1c] sm:$0xf] %vm439_vm2, %v718_v15  ;;  %4516 = vmatprep.mubr.msk.f32.mxu1 %vm5472_vm0, %v5473_v54  ;;  %v397_v29 = vmax.f32 %v335_v16, 0.0  ;;  %v3981_v61 = vld [vmem:[%s7432_s3 + $0x50] sm:$0xff] }
 0x17a   :  { %v6065_v25 = vld [vmem:[#allocation4 + $0x8] sm:$0xff]  ;;  %v339_v32 = vpop.f32.mrb[50].mxu0  ;;  %v1404_v9 = vld [vmem:[#allocation2 + $0x7c] sm:$0xf]  ;;  %v1538_v15 = vld [vmem:[#allocation2 + $0x80] sm:$0xf] }
 0x17b   :  { %v6067_v26 = vld [vmem:[#allocation4 + $0x10] sm:$0xff]  ;;  %1399 = vst.msk [vmem:[#allocation4 + $0x8] sm:$0xf] %vm439_vm2, %v1398_v19  ;;  %1401 = vst.msk [vmem:[#allocation4 + $0xc] sm:$0xf] %vm439_vm2, %v1400_v22  ;;  %v340_v35 = vadd.f32 %v5886_v63, %v339_v32  ;;  %v341_v57 = vpop.f32.mrb[51].mxu0  ;;  %v5134_v19 = vpack.c.bf16 %v3982_v62, %v3981_v61 }
 0x17c   :  { %1265 = vst.msk [vmem:[#allocation4 + $0x10] sm:$0xf] %vm439_vm2, %v1264_v23  ;;  %1267 = vst.msk [vmem:[#allocation4 + $0x14] sm:$0xf] %vm439_vm2, %v1266_v27  ;;  %v858_v18 = vld [vmem:[#allocation2 + $0x9c] sm:$0xf] }
 0x17d   :  { %430 = vst.msk [vmem:[#allocation2 + $0xc0] sm:$0xff] %vm405_vm1, %v397_v29  ;;  %v488_v39 = vld [vmem:[#allocation4 + $0x20] sm:$0xf]  ;;  %v398_v48 = vmax.f32 %v340_v35, 0.0  ;;  %v2084_v32 = vld [vmem:[#allocation2 + $0x60] sm:$0xf] }
 0x17e   :  { %721 = vst.msk [vmem:[#allocation4 + $0x20] sm:$0xf] %vm439_vm2, %v720_v33  ;;  %4517 = vmatmul.mubr.msk.f32.gmra.mrb[8].mxu1 %vm405_vm1, %v488_v39  ;;  %v1826_v47 = vld [vmem:[#allocation4] sm:$0xff]  ;;  %v344_v1 = vpop.f32.mrb[52].mxu0  ;;  %v1674_v42 = vld [vmem:[#allocation2 + $0x54] sm:$0xf] }
 0x17f   :  { %4527 = vmatprep.mubr.msk.f32.mxu1 %vm5472_vm0, %v5473_v54  ;;  %4735 = vmatmul.mubr.msk.f32.vlgmr.msra.gmra.mrb[64].mxu0 %vm405_vm1, %v1826_v47  ;;  %1947 = vst.msk [vmem:[#allocation4] sm:$0xf] %vm439_vm2, %v1946_v44  ;;  %1949 = vst.msk [vmem:[#allocation4 + $0x4] sm:$0xf] %vm439_vm2, %v1948_v46  ;;  %v345_v10 = vadd.f32 %v5886_v63, %v344_v1  ;;  %v346_v11 = vpop.f32.mrb[53].mxu0 }
 0x180   :  { %v6089_v51 = vld [vmem:[#allocation4 + $0x18] sm:$0xff]  ;;  %431 = vst.msk [vmem:[#allocation2 + $0xc8] sm:$0xff] %vm405_vm1, %v398_v48  ;;  %4737 = vmatprep.mubr.msk.f32.mxu0 %vm5472_vm0, %v5473_v54  ;;  %5192 = vmatpush3.bf16.msra.mxu0 %v5191_v38  ;;  %v994_v27 = vld [vmem:[#allocation2 + $0xa8] sm:$0xf]  ;;  %v1542_v48 = vld [vmem:[#allocation2 + $0x90] sm:$0xf] }
 0x181   :  { %857 = vst.msk [vmem:[#allocation4 + $0x1c] sm:$0xf] %vm439_vm2, %v856_v52  ;;  %855 = vst.msk [vmem:[#allocation4 + $0x18] sm:$0xf] %vm439_vm2, %v854_v49  ;;  %5193 = vmatprep.subr.bf16.mxu0 %v5471_v3  ;;  %v399_v20 = vmax.f32 %v345_v10, 0.0 }
 0x182   :  { %v6109_v12 = vld [vmem:[#allocation4 + $0x8] sm:$0xff]  ;;  %4528 = vmatmul.mubr.msk.f32.vlgmr.msra.gmra.mrb[10].mxu1 %vm405_vm1, %v5902_v28  ;;  %v349_v16 = vpop.f32.mrb[54].mxu0  ;;  %v992_v28 = vld [vmem:[#allocation2 + $0xa0] sm:$0xf]  ;;  %v2086_v33 = vld [vmem:[#allocation2 + $0x68] sm:$0xf] }
 0x183   :  { %v6111_v14 = vld [vmem:[#allocation4 + $0x10] sm:$0xff]  ;;  %1537 = vst.msk [vmem:[#allocation4 + $0x8] sm:$0xf] %vm439_vm2, %v1536_v60  ;;  %1539 = vst.msk [vmem:[#allocation4 + $0xc] sm:$0xf] %vm439_vm2, %v1538_v15  ;;  %5132 = vmatpush3.bf16.msra.mxu1 %v5131_v53  ;;  %4530 = vmatprep.mubr.msk.f32.mxu1 %vm5472_vm0, %v5473_v54  ;;  %v350_v22 = vadd.f32 %v5886_v63, %v349_v16  ;;  %v351_v23 = vpop.f32.mrb[55].mxu0 }
 0x184   :  { %1403 = vst.msk [vmem:[#allocation4 + $0x10] sm:$0xf] %vm439_vm2, %v1402_v4  ;;  %1405 = vst.msk [vmem:[#allocation4 + $0x14] sm:$0xf] %vm439_vm2, %v1404_v9  ;;  %5133 = vmatprep.subr.bf16.mxu1 %v5471_v3  ;;  %5195 = vmatpush3.bf16.msra.mxu0 %v5194_v2  ;;  %v1540_v43 = vld [vmem:[#allocation2 + $0x88] sm:$0xf] }
 0x185   :  { %v6123_v24 = vld [vmem:[#allocation4 + $0x20] sm:$0xf]  ;;  %432 = vst.msk [vmem:[#allocation2 + $0xd0] sm:$0xff] %vm405_vm1, %v399_v20  ;;  %v400_v29 = vmax.f32 %v350_v22, 0.0  ;;  %5202 = vmatprep.subr.bf16.mxu0 %v5471_v3  ;;  %v996_v52 = vld [vmem:[#allocation2 + $0xb0] sm:$0xf] }
 0x186   :  { %859 = vst.msk [vmem:[#allocation4 + $0x20] sm:$0xf] %vm439_vm2, %v858_v18  ;;  %4531 = vmatmul.mubr.msk.f32.gmra.mrb[12].mxu1 %vm405_vm1, %v5948_v13  ;;  %v354_v35 = vpop.f32.mrb[56].mxu0  ;;  %v6130_v36 = vld [vmem:[#allocation4] sm:$0xff]  ;;  %v1676_v13 = vld [vmem:[#allocation2 + $0x84] sm:$0xf] }
 0x187   :  { %4533 = vmatprep.mubr.msk.f32.mxu1 %vm5472_vm0, %v5473_v54  ;;  %5135 = vmatpush3.bf16.msra.mxu1 %v5134_v19  ;;  %433 = vst.msk [vmem:[#allocation2 + $0xd8] sm:$0xff] %vm405_vm1, %v400_v29  ;;  %v355_v38 = vadd.f32 %v5886_v63, %v354_v35  ;;  %v356_v39 = vpop.f32.mrb[57].mxu0  ;;  %v1130_v60 = vld [vmem:[#allocation2 + $0xa4] sm:$0xf]  ;;  %v2224_v2 = vld [vmem:[#allocation2 + $0x6c] sm:$0xf] }
 0x188   :  { %v6132_v37 = vld [vmem:[#allocation4 + $0x18] sm:$0xff]  ;;  %2085 = vst.msk [vmem:[#allocation4] sm:$0xf] %vm439_vm2, %v2084_v32  ;;  %2087 = vst.msk [vmem:[#allocation4 + $0x4] sm:$0xf] %vm439_vm2, %v2086_v33  ;;  %5136 = vmatprep.subr.bf16.mxu1 %v5471_v3  ;;  %v3989_v18 = vld [vmem:[%s7432_s3 + $0x68] sm:$0xff] }
 0x189   :  { %993 = vst.msk [vmem:[#allocation4 + $0x18] sm:$0xf] %vm439_vm2, %v992_v28  ;;  %995 = vst.msk [vmem:[#allocation4 + $0x1c] sm:$0xf] %vm439_vm2, %v994_v27  ;;  %v401_v44 = vmax.f32 %v355_v38, 0.0  ;;  %v3988_v16 = vld [vmem:[%s7432_s3 + $0x60] sm:$0xff] }
 0x18a   :  { %v6145_v47 = vld [vmem:[#allocation4 + $0x8] sm:$0xff]  ;;  %4534 = vmatmul.mubr.msk.f32.gmra.mrb[14].mxu1 %vm405_vm1, %v5961_v34  ;;  %v359_v49 = vpop.f32.mrb[58].mxu0  ;;  %v1132_v34 = vld [vmem:[#allocation2 + $0xac] sm:$0xf]  ;;  %v2222_v1 = vld [vmem:[#allocation2 + $0x64] sm:$0xf]  ;;  %v5137_v29 = vpack.c.bf16 %v3989_v18, %v3988_v16 }
 0x18b   :  { %v6143_v46 = vld [vmem:[#allocation4 + $0x10] sm:$0xff]  ;;  %1675 = vst.msk [vmem:[#allocation4 + $0x8] sm:$0xf] %vm439_vm2, %v1674_v42  ;;  %1677 = vst.msk [vmem:[#allocation4 + $0xc] sm:$0xf] %vm439_vm2, %v1676_v13  ;;  %4536 = vmatprep.mubr.msk.f32.mxu1 %vm5472_vm0, %v5473_v54  ;;  %v360_v53 = vadd.f32 %v5886_v63, %v359_v49  ;;  %v361_v57 = vpop.f32.mrb[59].mxu0 }
 0x18c   :  { %1541 = vst.msk [vmem:[#allocation4 + $0x10] sm:$0xf] %vm439_vm2, %v1540_v43  ;;  %1543 = vst.msk [vmem:[#allocation4 + $0x14] sm:$0xf] %vm439_vm2, %v1542_v48  ;;  %v1678_v19 = vld [vmem:[#allocation2 + $0x8c] sm:$0xf] }
 0x18d   :  { %434 = vst.msk [vmem:[#allocation2 + $0xe0] sm:$0xff] %vm405_vm1, %v401_v44  ;;  %v6157_v61 = vld [vmem:[#allocation4 + $0x20] sm:$0xf]  ;;  %v402_v62 = vmax.f32 %v360_v53, 0.0  ;;  %v1680_v28 = vld [vmem:[#allocation2 + $0x94] sm:$0xf] }
 0x18e   :  { %4537 = vmatmul.mubr.msk.f32.gmra.mrb[16].mxu1 %vm405_vm1, %v6029_v45  ;;  %997 = vst.msk [vmem:[#allocation4 + $0x20] sm:$0xf] %vm439_vm2, %v996_v52  ;;  %v364_v4 = vpop.f32.mrb[60].mxu0  ;;  %v1812_v45 = vld [vmem:[#allocation2 + $0x58] sm:$0xf]  ;;  %v3990_v32 = vld [vmem:[%s7432_s3 + $0x70] sm:$0xff] }
 0x18f   :  { %v6162_v9 = vld [vmem:[#allocation4] sm:$0xff]  ;;  %4539 = vmatprep.mubr.msk.f32.mxu1 %vm5472_vm0, %v5473_v54  ;;  %435 = vst.msk [vmem:[#allocation2 + $0xe8] sm:$0xff] %vm405_vm1, %v402_v62  ;;  %v365_v11 = vadd.f32 %v5886_v63, %v364_v4  ;;  %v366_v15 = vpop.f32.mrb[61].mxu0  ;;  %v1134_v27 = vld [vmem:[#allocation2 + $0xb4] sm:$0xf] }
 0x190   :  { %v6164_v10 = vld [vmem:[#allocation4 + $0x18] sm:$0xff]  ;;  %2223 = vst.msk [vmem:[#allocation4] sm:$0xf] %vm439_vm2, %v2222_v1  ;;  %2225 = vst.msk [vmem:[#allocation4 + $0x4] sm:$0xf] %vm439_vm2, %v2224_v2 }
 0x191   :  { %1131 = vst.msk [vmem:[#allocation4 + $0x18] sm:$0xf] %vm439_vm2, %v1130_v60  ;;  %1133 = vst.msk [vmem:[#allocation4 + $0x1c] sm:$0xf] %vm439_vm2, %v1132_v34  ;;  %v1814_v63 = vld [vmem:[#allocation2 + $0x88] sm:$0xf] }
 0x192   :  { %v403_v20 = vmax.f32 %v365_v11, 0.0  ;;  %v6180_v22 = vld [vmem:[#allocation4 + $0x8] sm:$0xff]  ;;  %4540 = vmatmul.mubr.msk.f32.gmra.mrb[18].mxu1 %vm405_vm1, %v6045_v0  ;;  %v3991_v0 = vld [vmem:[%s7432_s3 + $0x78] sm:$0xff]  ;;  %v1268_v33 = vld [vmem:[#allocation2 + $0xa8] sm:$0xf] }
 0x193   :  { %v6182_v23 = vld [vmem:[#allocation4 + $0x10] sm:$0xff]  ;;  %1813 = vst.msk [vmem:[#allocation4 + $0x8] sm:$0xf] %vm439_vm2, %v1812_v45  ;;  %1815 = vst.msk [vmem:[#allocation4 + $0xc] sm:$0xf] %vm439_vm2, %v1814_v63  ;;  %4550 = vmatprep.mubr.msk.f32.mxu1 %vm5472_vm0, %v5473_v54  ;;  %v5140_v48 = vpack.c.bf16 %v3991_v0, %v3990_v32 }
 0x194   :  { %1679 = vst.msk [vmem:[#allocation4 + $0x10] sm:$0xf] %vm439_vm2, %v1678_v19  ;;  %1681 = vst.msk [vmem:[#allocation4 + $0x14] sm:$0xf] %vm439_vm2, %v1680_v28  ;;  %v1270_v35 = vld [vmem:[#allocation2 + $0xb0] sm:$0xf] }
 0x195   :  { %436 = vst.msk [vmem:[#allocation2 + $0xf0] sm:$0xff] %vm405_vm1, %v403_v20  ;;  %v6199_v38 = vld [vmem:[#allocation4 + $0x20] sm:$0xf]  ;;  %v2362_v42 = vld [vmem:[#allocation2 + $0x70] sm:$0xf] }
 0x196   :  { %v2360_v39 = vld [vmem:[#allocation2 + $0x68] sm:$0xf]  ;;  %4551 = vmatmul.mubr.msk.f32.vlgmr.msra.gmra.mrb[20].mxu1 %vm405_vm1, %v5933_v58  ;;  %1135 = vst.msk [vmem:[#allocation4 + $0x20] sm:$0xf] %vm439_vm2, %v1134_v27  ;;  %v1818_v44 = vld [vmem:[#allocation2 + $0x98] sm:$0xf] }
 0x197   :  { %5138 = vmatpush3.bf16.msra.mxu1 %v5137_v29  ;;  %4553 = vmatprep.mubr.msk.f32.mxu1 %vm5472_vm0, %v5473_v54  ;;  %v6208_v43 = vld [vmem:[#allocation4] sm:$0xff]  ;;  %v1950_v58 = vld [vmem:[#allocation2 + $0x5c] sm:$0xf]  ;;  %v1816_v53 = vld [vmem:[#allocation2 + $0x90] sm:$0xf] }
 0x198   :  { %v6204_v13 = vld [vmem:[#allocation4 + $0x18] sm:$0xff]  ;;  %5139 = vmatprep.subr.bf16.mxu1 %v5471_v3  ;;  %2361 = vst.msk [vmem:[#allocation4] sm:$0xf] %vm439_vm2, %v2360_v39  ;;  %2363 = vst.msk [vmem:[#allocation4 + $0x4] sm:$0xf] %vm439_vm2, %v2362_v42  ;;  %v3998_v20 = vld [vmem:[%s7432_s3 + $0x88] sm:$0xff] }
 0x199   :  { %1269 = vst.msk [vmem:[#allocation4 + $0x18] sm:$0xf] %vm439_vm2, %v1268_v33  ;;  %1271 = vst.msk [vmem:[#allocation4 + $0x1c] sm:$0xf] %vm439_vm2, %v1270_v35  ;;  %v1952_v49 = vld [vmem:[#allocation2 + $0x8c] sm:$0xf] }
 0x19a   :  { %4554 = vmatmul.mubr.msk.f32.gmra.mrb[22].mxu1 %vm405_vm1, %v5979_v50  ;;  %v1827_v57 = vld [vmem:[#allocation4 + $0x8] sm:$0xff]  ;;  %v1272_v60 = vld [vmem:[#allocation2 + $0xb8] sm:$0xf]  ;;  %v1406_v50 = vld [vmem:[#allocation2 + $0xac] sm:$0xf] }
 0x19b   :  { %v6215_v52 = vld [vmem:[#allocation4 + $0x10] sm:$0xff]  ;;  %4556 = vmatprep.mubr.msk.f32.mxu1 %vm5472_vm0, %v5473_v54  ;;  %4738 = vmatmul.mubr.msk.f32.gmra.mrb[66].mxu0 %vm405_vm1, %v1827_v57  ;;  %1951 = vst.msk [vmem:[#allocation4 + $0x8] sm:$0xf] %vm439_vm2, %v1950_v58  ;;  %1953 = vst.msk [vmem:[#allocation4 + $0xc] sm:$0xf] %vm439_vm2, %v1952_v49  ;;  %v3999_v33 = vld [vmem:[%s7432_s3 + $0x90] sm:$0xff] }
 0x19c   :  { %1817 = vst.msk [vmem:[#allocation4 + $0x10] sm:$0xf] %vm439_vm2, %v1816_v53  ;;  %1819 = vst.msk [vmem:[#allocation4 + $0x14] sm:$0xf] %vm439_vm2, %v1818_v44  ;;  %5141 = vmatpush3.bf16.msra.mxu1 %v5140_v48  ;;  %4740 = vmatprep.mubr.msk.f32.mxu0 %vm5472_vm0, %v5473_v54  ;;  %v1408_v34 = vld [vmem:[#allocation2 + $0xb4] sm:$0xf] }
 0x19d   :  { %5142 = vmatprep.subr.bf16.mxu1 %v5471_v3  ;;  %v6229_v62 = vld [vmem:[#allocation4 + $0x20] sm:$0xf]  ;;  %v2498_v1 = vld [vmem:[#allocation2 + $0x6c] sm:$0xf]  ;;  %v2500_v2 = vld [vmem:[#allocation2 + $0x74] sm:$0xf] }
 0x19e   :  { %4557 = vmatmul.mubr.msk.f32.gmra.mrb[24].mxu1 %vm405_vm1, %v5997_v6  ;;  %1273 = vst.msk [vmem:[#allocation4 + $0x20] sm:$0xf] %vm439_vm2, %v1272_v60  ;;  %v2090_v15 = vld [vmem:[#allocation2 + $0xa0] sm:$0xf]  ;;  %v2088_v6 = vld [vmem:[#allocation2 + $0x70] sm:$0xf] }
 0x19f   :  { %4559 = vmatprep.mubr.msk.f32.mxu1 %vm5472_vm0, %v5473_v54  ;;  %v6238_v11 = vld [vmem:[#allocation4] sm:$0xff]  ;;  %v1954_v45 = vld [vmem:[#allocation2 + $0x94] sm:$0xf]  ;;  %v1956_v16 = vld [vmem:[#allocation2 + $0x9c] sm:$0xf] }
 0x1a0   :  { %v6234_v4 = vld [vmem:[#allocation4 + $0x18] sm:$0xff]  ;;  %2499 = vst.msk [vmem:[#allocation4] sm:$0xf] %vm439_vm2, %v2498_v1  ;;  %2501 = vst.msk [vmem:[#allocation4 + $0x4] sm:$0xf] %vm439_vm2, %v2500_v2  ;;  %v4000_v35 = vld [vmem:[%s7432_s3 + $0x98] sm:$0xff] }
 0x1a1   :  { %1407 = vst.msk [vmem:[#allocation4 + $0x18] sm:$0xf] %vm439_vm2, %v1406_v50  ;;  %1409 = vst.msk [vmem:[#allocation4 + $0x1c] sm:$0xf] %vm439_vm2, %v1408_v34  ;;  %v1410_v63 = vld [vmem:[#allocation2 + $0xbc] sm:$0xf]  ;;  %v5146_v53 = vpack.c.bf16 %v4000_v35, %v3999_v33 }
 0x1a2   :  { %4560 = vmatmul.mubr.msk.f32.gmra.mrb[26].mxu1 %vm405_vm1, %v6089_v51  ;;  %v6246_v19 = vld [vmem:[#allocation4 + $0x8] sm:$0xff]  ;;  %v3997_v51 = vld [vmem:[%s7432_s3 + $0x80] sm:$0xff]  ;;  %v1546_v27 = vld [vmem:[#allocation2 + $0xc8] sm:$0xf] }
 0x1a3   :  { %v1828_v18 = vld [vmem:[#allocation4 + $0x10] sm:$0xff]  ;;  %4562 = vmatprep.mubr.msk.f32.mxu1 %vm5472_vm0, %v5473_v54  ;;  %2089 = vst.msk [vmem:[#allocation4 + $0x8] sm:$0xf] %vm439_vm2, %v2088_v6  ;;  %2091 = vst.msk [vmem:[#allocation4 + $0xc] sm:$0xf] %vm439_vm2, %v2090_v15  ;;  %v5143_v0 = vpack.c.bf16 %v3998_v20, %v3997_v51  ;;  %v4006_v51 = vld [vmem:[%s7432_s3 + $0xa0] sm:$0xff] }
 0x1a4   :  { %4741 = vmatmul.mubr.msk.f32.gmra.mrb[68].mxu0 %vm405_vm1, %v1828_v18  ;;  %1955 = vst.msk [vmem:[#allocation4 + $0x10] sm:$0xf] %vm439_vm2, %v1954_v45  ;;  %1957 = vst.msk [vmem:[#allocation4 + $0x14] sm:$0xf] %vm439_vm2, %v1956_v16  ;;  %v1544_v28 = vld [vmem:[#allocation2 + $0xc0] sm:$0xf] }
 0x1a5   :  { %4743 = vmatprep.mubr.msk.f32.mxu0 %vm5472_vm0, %v5473_v54  ;;  %v6263_v29 = vld [vmem:[#allocation4 + $0x20] sm:$0xf]  ;;  %v2228_v39 = vld [vmem:[#allocation2 + $0xa4] sm:$0xf]  ;;  %v2094_v44 = vld [vmem:[#allocation2 + $0xb0] sm:$0xf] }
 0x1a6   :  { %4563 = vmatmul.mubr.msk.f32.gmra.mrb[28].mxu1 %vm405_vm1, %v6123_v24  ;;  %1411 = vst.msk [vmem:[#allocation4 + $0x20] sm:$0xf] %vm439_vm2, %v1410_v63  ;;  %v2092_v42 = vld [vmem:[#allocation2 + $0xa8] sm:$0xf]  ;;  %v2226_v24 = vld [vmem:[#allocation2 + $0x74] sm:$0xf] }
 0x1a7   :  { %4573 = vmatprep.mubr.msk.f32.mxu1 %vm5472_vm0, %v5473_v54  ;;  %v1548_v49 = vld [vmem:[#allocation2 + $0xd0] sm:$0xf]  ;;  %v1684_v57 = vld [vmem:[#allocation2 + $0xcc] sm:$0xf]  ;;  %v2366_v1 = vld [vmem:[#allocation2 + $0xa8] sm:$0xf] }
 0x1a8   :  { %v6268_v32 = vld [vmem:[#allocation4 + $0x18] sm:$0xff]  ;;  %v2230_v34 = vld [vmem:[#allocation2 + $0xac] sm:$0xf]  ;;  %v2232_v2 = vld [vmem:[#allocation2 + $0xb4] sm:$0xf] }
 0x1a9   :  { %1545 = vst.msk [vmem:[#allocation4 + $0x18] sm:$0xf] %vm439_vm2, %v1544_v28  ;;  %1547 = vst.msk [vmem:[#allocation4 + $0x1c] sm:$0xf] %vm439_vm2, %v1546_v27  ;;  %v2364_v15 = vld [vmem:[#allocation2 + $0x78] sm:$0xf] }
 0x1aa   :  { %4574 = vmatmul.mubr.msk.f32.vlgmr.msra.gmra.mrb[30].mxu1 %vm405_vm1, %v5942_v7  ;;  %v6282_v48 = vld [vmem:[#allocation4 + $0x8] sm:$0xff]  ;;  %v1682_v7 = vld [vmem:[#allocation2 + $0xc4] sm:$0xf]  ;;  %v1820_v16 = vld [vmem:[#allocation2 + $0xc8] sm:$0xf] }
 0x1ab   :  { %v6284_v58 = vld [vmem:[#allocation4 + $0x10] sm:$0xff]  ;;  %5144 = vmatpush3.bf16.msra.mxu1 %v5143_v0  ;;  %4576 = vmatprep.mubr.msk.f32.mxu1 %vm5472_vm0, %v5473_v54  ;;  %2227 = vst.msk [vmem:[#allocation4 + $0x8] sm:$0xf] %vm439_vm2, %v2226_v24  ;;  %2229 = vst.msk [vmem:[#allocation4 + $0xc] sm:$0xf] %vm439_vm2, %v2228_v39  ;;  %v4007_v20 = vld [vmem:[%s7432_s3 + $0xa8] sm:$0xff] }
 0x1ac   :  { %2093 = vst.msk [vmem:[#allocation4 + $0x10] sm:$0xf] %vm439_vm2, %v2092_v42  ;;  %2095 = vst.msk [vmem:[#allocation4 + $0x14] sm:$0xf] %vm439_vm2, %v2094_v44  ;;  %5145 = vmatprep.subr.bf16.mxu1 %v5471_v3  ;;  %v1686_v45 = vld [vmem:[#allocation2 + $0xd4] sm:$0xf]  ;;  %v5149_v42 = vpack.c.bf16 %v4007_v20, %v4006_v51 }
 0x1ad   :  { %v6293_v60 = vld [vmem:[#allocation4 + $0x20] sm:$0xf]  ;;  %v1822_v18 = vld [vmem:[#allocation2 + $0xd0] sm:$0xf]  ;;  %v2504_v28 = vld [vmem:[#allocation2 + $0xac] sm:$0xf] }
 0x1ae   :  { %4577 = vmatmul.mubr.msk.f32.gmra.mrb[32].mxu1 %vm405_vm1, %v5995_v5  ;;  %1549 = vst.msk [vmem:[#allocation4 + $0x20] sm:$0xf] %vm439_vm2, %v1548_v49  ;;  %v2368_v27 = vld [vmem:[#allocation2 + $0xb0] sm:$0xf]  ;;  %v2370_v0 = vld [vmem:[#allocation2 + $0xb8] sm:$0xf] }
 0x1af   :  { %4579 = vmatprep.mubr.msk.f32.mxu1 %vm5472_vm0, %v5473_v54  ;;  %5147 = vmatpush3.bf16.msra.mxu1 %v5146_v53  ;;  %v1824_v39 = vld [vmem:[#allocation2 + $0xd8] sm:$0xf]  ;;  %v1958_v24 = vld [vmem:[#allocation2 + $0xcc] sm:$0xf]  ;;  %v1960_v49 = vld [vmem:[#allocation2 + $0xd4] sm:$0xf] }
 0x1b0   :  { %v6298_v50 = vld [vmem:[#allocation4 + $0x18] sm:$0xff]  ;;  %5148 = vmatprep.subr.bf16.mxu1 %v5471_v3  ;;  %v4009_v44 = vld [vmem:[%s7432_s3 + $0xb8] sm:$0xff] }
 0x1b1   :  { %1683 = vst.msk [vmem:[#allocation4 + $0x18] sm:$0xf] %vm439_vm2, %v1682_v7  ;;  %1685 = vst.msk [vmem:[#allocation4 + $0x1c] sm:$0xf] %vm439_vm2, %v1684_v57 }
 0x1b2   :  { %4580 = vmatmul.mubr.msk.f32.gmra.mrb[34].mxu1 %vm405_vm1, %v6015_v31  ;;  %v6309_v6 = vld [vmem:[#allocation4 + $0x8] sm:$0xff] }
 0x1b3   :  { %v6307_v5 = vld [vmem:[#allocation4 + $0x10] sm:$0xff]  ;;  %4582 = vmatprep.mubr.msk.f32.mxu1 %vm5472_vm0, %v5473_v54  ;;  %2365 = vst.msk [vmem:[#allocation4 + $0x8] sm:$0xf] %vm439_vm2, %v2364_v15  ;;  %2367 = vst.msk [vmem:[#allocation4 + $0xc] sm:$0xf] %vm439_vm2, %v2366_v1  ;;  %v4087_v15 = vld [vmem:[%s7432_s3 + $0x1c0] sm:$0xff] }
 0x1b4   :  { %2231 = vst.msk [vmem:[#allocation4 + $0x10] sm:$0xf] %vm439_vm2, %v2230_v34  ;;  %2233 = vst.msk [vmem:[#allocation4 + $0x14] sm:$0xf] %vm439_vm2, %v2232_v2  ;;  %v2506_v34 = vld [vmem:[#allocation2 + $0xb4] sm:$0xf] }
 0x1b5   :  { %v6317_v63 = vld [vmem:[#allocation4 + $0x20] sm:$0xf]  ;;  %v2508_v1 = vld [vmem:[#allocation2 + $0xbc] sm:$0xf] }
 0x1b6   :  { %4583 = vmatmul.mubr.msk.f32.gmra.mrb[36].mxu1 %vm405_vm1, %v6132_v37  ;;  %1687 = vst.msk [vmem:[#allocation4 + $0x20] sm:$0xf] %vm439_vm2, %v1686_v45  ;;  %v2502_v37 = vld [vmem:[#allocation2 + $0x7c] sm:$0xf]  ;;  %v2096_v45 = vld [vmem:[#allocation2 + $0xe0] sm:$0xf] }
 0x1b7   :  { %4585 = vmatprep.mubr.msk.f32.mxu1 %vm5472_vm0, %v5473_v54  ;;  %v1962_v2 = vld [vmem:[#allocation2 + $0xdc] sm:$0xf] }
 0x1b8   :  { %v6322_v31 = vld [vmem:[#allocation4 + $0x18] sm:$0xff] }
 0x1b9   :  { %1821 = vst.msk [vmem:[#allocation4 + $0x18] sm:$0xf] %vm439_vm2, %v1820_v16  ;;  %1823 = vst.msk [vmem:[#allocation4 + $0x1c] sm:$0xf] %vm439_vm2, %v1822_v18  ;;  %v2098_v16 = vld [vmem:[#allocation2 + $0xe8] sm:$0xf] }
 0x1ba   :  { %4586 = vmatmul.mubr.msk.f32.gmra.mrb[38].mxu1 %vm405_vm1, %v6157_v61  ;;  %v6336_v33 = vld [vmem:[#allocation4 + $0x8] sm:$0xff] }
 0x1bb   :  { %v6338_v35 = vld [vmem:[#allocation4 + $0x10] sm:$0xff]  ;;  %4596 = vmatprep.mubr.msk.f32.mxu1 %vm5472_vm0, %v5473_v54  ;;  %2503 = vst.msk [vmem:[#allocation4 + $0x8] sm:$0xf] %vm439_vm2, %v2502_v37  ;;  %2505 = vst.msk [vmem:[#allocation4 + $0xc] sm:$0xf] %vm439_vm2, %v2504_v28  ;;  %v4008_v61 = vld [vmem:[%s7432_s3 + $0xb0] sm:$0xff] }
 0x1bc   :  { %2369 = vst.msk [vmem:[#allocation4 + $0x10] sm:$0xf] %vm439_vm2, %v2368_v27  ;;  %2371 = vst.msk [vmem:[#allocation4 + $0x14] sm:$0xf] %vm439_vm2, %v2370_v0  ;;  %v5152_v57 = vpack.c.bf16 %v4009_v44, %v4008_v61  ;;  %v4090_v28 = vld [vmem:[%s7432_s3 + $0x1d8] sm:$0xff]  ;;  %v369_v27 = vpop.f32.mrb[62].mxu0 }
 0x1bd   :  { %v6352_v53 = vld [vmem:[#allocation4 + $0x20] sm:$0xf]  ;;  %v2100_v0 = vld [vmem:[#allocation2 + $0xf0] sm:$0xf]  ;;  %v5446_v37 = vld [vmem:[%s7431_s2] ss:$0 sm:$0xff] }
 0x1be   :  { %4597 = vmatmul.mubr.msk.f32.vlgmr.msra.gmra.mrb[40].mxu1 %vm405_vm1, %v5954_v21  ;;  %1825 = vst.msk [vmem:[#allocation4 + $0x20] sm:$0xf] %vm439_vm2, %v1824_v39  ;;  %v370_v39 = vadd.f32 %v5446_v37, %v369_v27  ;;  %v2234_v61 = vld [vmem:[#allocation2 + $0xe4] sm:$0xf]  ;;  %v4027_v27 = vld [vmem:[%s7432_s3 + $0xf8] sm:$0xff]  ;;  %v4044_v37 = vld [vmem:[%s7432_s3 + $0x130] sm:$0xff] }
 0x1bf   :  { %5150 = vmatpush3.bf16.msra.mxu1 %v5149_v42  ;;  %4599 = vmatprep.mubr.msk.f32.mxu1 %vm5472_vm0, %v5473_v54  ;;  %v371_v42 = vpop.f32.mrb[63].mxu0 }
 0x1c0   :  { %v1829_v7 = vld [vmem:[#allocation4 + $0x18] sm:$0xff]  ;;  %5151 = vmatprep.subr.bf16.mxu1 %v5471_v3  ;;  %v4063_v42 = vld [vmem:[%s7432_s3 + $0x178] sm:$0xff] }
 0x1c1   :  { %4744 = vmatmul.mubr.msk.f32.gmra.mrb[70].mxu0 %vm405_vm1, %v1829_v7  ;;  %1959 = vst.msk [vmem:[#allocation4 + $0x18] sm:$0xf] %vm439_vm2, %v1958_v24  ;;  %1961 = vst.msk [vmem:[#allocation4 + $0x1c] sm:$0xf] %vm439_vm2, %v1960_v49  ;;  %v2236_v24 = vld [vmem:[#allocation2 + $0xec] sm:$0xf] }
 0x1c2   :  { %4746 = vmatprep.mubr.msk.f32.mxu0 %vm5472_vm0, %v5473_v54  ;;  %4600 = vmatmul.mubr.msk.f32.gmra.mrb[42].mxu1 %vm405_vm1, %v6013_v30  ;;  %v4088_v30 = vld [vmem:[%s7432_s3 + $0x1c8] sm:$0xff]  ;;  %v404_v7 = vmax.f32 %v370_v39, 0.0  ;;  %v4045_v39 = vld [vmem:[%s7432_s3 + $0x138] sm:$0xff] }
 0x1c3   :  { %v6367_v21 = vld [vmem:[#allocation4 + $0x10] sm:$0xff]  ;;  %4602 = vmatprep.mubr.msk.f32.mxu1 %vm5472_vm0, %v5473_v54  ;;  %5153 = vmatpush3.bf16.msra.mxu1 %v5152_v57  ;;  %v5203_v20 = vpack.c.bf16 %v4088_v30, %v4087_v15  ;;  %v2372_v15 = vld [vmem:[#allocation2 + $0xe8] sm:$0xf]  ;;  %v2374_v30 = vld [vmem:[#allocation2 + $0xf0] sm:$0xf] }
 0x1c4   :  { %2507 = vst.msk [vmem:[#allocation4 + $0x10] sm:$0xf] %vm439_vm2, %v2506_v34  ;;  %2509 = vst.msk [vmem:[#allocation4 + $0x14] sm:$0xf] %vm439_vm2, %v2508_v1  ;;  %5154 = vmatprep.subr.bf16.mxu1 %v5471_v3  ;;  %v2238_v1 = vld [vmem:[#allocation2 + $0xf4] sm:$0xf] }
 0x1c5   :  { %v1830_v18 = vld [vmem:[#allocation4 + $0x20] sm:$0xf]  ;;  %437 = vst.msk [vmem:[#allocation2 + $0xf8] sm:$0xff] %vm405_vm1, %v404_v7  ;;  %v4099_v7 = vld [vmem:[%s7432_s3 + $0x1f8] sm:$0xff] }
 0x1c6   :  { %4603 = vmatmul.mubr.msk.f32.gmra.mrb[44].mxu1 %vm405_vm1, %v6037_v56  ;;  %4747 = vmatmul.mubr.msk.f32.gmra.mrb[72].mxu0 %vm405_vm1, %v1830_v18  ;;  %1963 = vst.msk [vmem:[#allocation4 + $0x20] sm:$0xf] %vm439_vm2, %v1962_v2  ;;  %v4089_v56 = vld [vmem:[%s7432_s3 + $0x1d0] sm:$0xff] }
 0x1c7   :  { %4605 = vmatprep.mubr.msk.f32.mxu1 %vm5472_vm0, %v5473_v54  ;;  %4780 = vmatprep.mubr.msk.f32.mxu0 %vm5472_vm0, %v5473_v54  ;;  %v5206_v44 = vpack.c.bf16 %v4090_v28, %v4089_v56  ;;  %v4026_v28 = vld [vmem:[%s7432_s3 + $0xf0] sm:$0xff] }
 0x1c8   :  { %v6388_v51 = vld [vmem:[#allocation4 + $0x18] sm:$0xff] }
 0x1c9   :  { %2097 = vst.msk [vmem:[#allocation4 + $0x18] sm:$0xf] %vm439_vm2, %v2096_v45  ;;  %2099 = vst.msk [vmem:[#allocation4 + $0x1c] sm:$0xf] %vm439_vm2, %v2098_v16  ;;  %v2512_v16 = vld [vmem:[#allocation2 + $0xf4] sm:$0xf] }
 0x1ca   :  { %4606 = vmatmul.mubr.msk.f32.gmra.mrb[46].mxu1 %vm405_vm1, %v6164_v10  ;;  %4781 = vmatmul.mubr.msk.f32.vlgmr.msra.gmra.mrb[74].mxu0 %vm405_vm1, %v6162_v9  ;;  %v4015_v10 = vld [vmem:[%s7432_s3 + $0xc0] sm:$0xff]  ;;  %v4016_v9 = vld [vmem:[%s7432_s3 + $0xc8] sm:$0xff] }
 0x1cb   :  { %4608 = vmatprep.mubr.msk.f32.mxu1 %vm5472_vm0, %v5473_v54  ;;  %4783 = vmatprep.mubr.msk.f32.mxu0 %vm5472_vm0, %v5473_v54  ;;  %v5155_v57 = vpack.c.bf16 %v4016_v9, %v4015_v10  ;;  %v4078_v9 = vld [vmem:[%s7432_s3 + $0x1a0] sm:$0xff] }
 0x1cc   :  { %5204 = vmatpush3.bf16.msra.mxu0 %v5203_v20  ;;  %v4024_v20 = vld [vmem:[%s7432_s3 + $0xe0] sm:$0xff]  ;;  %v2514_v56 = vld [vmem:[#allocation2 + $0xfc] sm:$0xf] }
 0x1cd   :  { %v6415_v49 = vld [vmem:[#allocation4 + $0x20] sm:$0xf]  ;;  %5205 = vmatprep.subr.bf16.mxu0 %v5471_v3 }
 0x1ce   :  { %2101 = vst.msk [vmem:[#allocation4 + $0x20] sm:$0xf] %vm439_vm2, %v2100_v0  ;;  %4609 = vmatmul.mubr.msk.f32.gmra.mrb[48].mxu1 %vm405_vm1, %v6199_v38  ;;  %4784 = vmatmul.mubr.msk.f32.gmra.mrb[76].mxu0 %vm405_vm1, %v6282_v48  ;;  %v4017_v38 = vld [vmem:[%s7432_s3 + $0xd0] sm:$0xff]  ;;  %v4018_v48 = vld [vmem:[%s7432_s3 + $0xd8] sm:$0xff] }
 0x1cf   :  { %4619 = vmatprep.mubr.msk.f32.mxu1 %vm5472_vm0, %v5473_v54  ;;  %4786 = vmatprep.mubr.msk.f32.mxu0 %vm5472_vm0, %v5473_v54  ;;  %v5158_v2 = vpack.c.bf16 %v4018_v48, %v4017_v38 }
 0x1d0   :  { %v2105_v34 = vld [vmem:[#allocation4 + $0x18] sm:$0xff]  ;;  %5207 = vmatpush3.bf16.msra.mxu0 %v5206_v44  ;;  %v4079_v44 = vld [vmem:[%s7432_s3 + $0x1a8] sm:$0xff] }
 0x1d1   :  { %2235 = vst.msk [vmem:[#allocation4 + $0x18] sm:$0xf] %vm439_vm2, %v2234_v61  ;;  %2237 = vst.msk [vmem:[#allocation4 + $0x1c] sm:$0xf] %vm439_vm2, %v2236_v24  ;;  %5226 = vmatprep.subr.bf16.mxu0 %v5471_v3  ;;  %v4081_v24 = vld [vmem:[%s7432_s3 + $0x1b8] sm:$0xff] }
 0x1d2   :  { %4620 = vmatmul.mubr.msk.f32.vlgmr.msra.gmra.mrb[50].mxu1 %vm405_vm1, %v5973_v41  ;;  %4787 = vmatmul.mubr.msk.f32.gmra.mrb[78].mxu0 %vm405_vm1, %v6307_v5  ;;  %v2510_v5 = vld [vmem:[#allocation2 + $0xec] sm:$0xf] }
 0x1d3   :  { %5156 = vmatpush3.bf16.msra.mxu1 %v5155_v57  ;;  %4622 = vmatprep.mubr.msk.f32.mxu1 %vm5472_vm0, %v5473_v54 }
 0x1d4   :  { %4789 = vmatprep.mubr.msk.f32.mxu0 %vm5472_vm0, %v5473_v54  ;;  %5157 = vmatprep.subr.bf16.mxu1 %v5471_v3 }
 0x1d5   :  { %v2106_v45 = vld [vmem:[#allocation4 + $0x20] sm:$0xf] }
 0x1d6   :  { %4623 = vmatmul.mubr.msk.f32.gmra.mrb[52].mxu1 %vm405_vm1, %v6035_v55  ;;  %4790 = vmatmul.mubr.msk.f32.gmra.mrb[80].mxu0 %vm405_vm1, %v2105_v34  ;;  %2239 = vst.msk [vmem:[#allocation4 + $0x20] sm:$0xf] %vm439_vm2, %v2238_v1  ;;  %v2376_v55 = vld [vmem:[#allocation2 + $0xf8] sm:$0xf] }
 0x1d7   :  { %4625 = vmatprep.mubr.msk.f32.mxu1 %vm5472_vm0, %v5473_v54  ;;  %4792 = vmatprep.mubr.msk.f32.mxu0 %vm5472_vm0, %v5473_v54 }
 0x1d8   :  { %v6454_v41 = vld [vmem:[#allocation4 + $0x18] sm:$0xff]  ;;  %5159 = vmatpush3.bf16.msra.mxu1 %v5158_v2 }
 0x1d9   :  { %2373 = vst.msk [vmem:[#allocation4 + $0x18] sm:$0xf] %vm439_vm2, %v2372_v15  ;;  %2375 = vst.msk [vmem:[#allocation4 + $0x1c] sm:$0xf] %vm439_vm2, %v2374_v30  ;;  %5160 = vmatprep.subr.bf16.mxu1 %v5471_v3 }
 0x1da   :  { %4626 = vmatmul.mubr.msk.f32.gmra.mrb[54].mxu1 %vm405_vm1, %v6067_v26  ;;  %4793 = vmatmul.mubr.msk.f32.gmra.mrb[82].mxu0 %vm405_vm1, %v2106_v45 }
 0x1db   :  { %4628 = vmatprep.mubr.msk.f32.mxu1 %vm5472_vm0, %v5473_v54  ;;  %4826 = vmatprep.mubr.msk.f32.mxu0 %vm5472_vm0, %v5473_v54 }
 0x1dd   :  { %v6466_v18 = vld [vmem:[#allocation4 + $0x20] sm:$0xf] }
 0x1de   :  { %4629 = vmatmul.mubr.msk.f32.gmra.mrb[56].mxu1 %vm405_vm1, %v6204_v13  ;;  %4827 = vmatmul.mubr.msk.f32.vlgmr.msra.gmra.mrb[84].mxu0 %vm405_vm1, %v6238_v11  ;;  %2377 = vst.msk [vmem:[#allocation4 + $0x20] sm:$0xf] %vm439_vm2, %v2376_v55  ;;  %v4025_v13 = vld [vmem:[%s7432_s3 + $0xe8] sm:$0xff] }
 0x1df   :  { %4631 = vmatprep.mubr.msk.f32.mxu1 %vm5472_vm0, %v5473_v54  ;;  %4829 = vmatprep.mubr.msk.f32.mxu0 %vm5472_vm0, %v5473_v54  ;;  %v5161_v11 = vpack.c.bf16 %v4025_v13, %v4024_v20  ;;  %v2517_v20 = vld [vmem:[#allocation4 + $0x8] sm:$0xff] }
 0x1e0   :  { %v2381_v26 = vld [vmem:[#allocation4 + $0x18] sm:$0xff] }
 0x1e1   :  { %2511 = vst.msk [vmem:[#allocation4 + $0x18] sm:$0xf] %vm439_vm2, %v2510_v5  ;;  %2513 = vst.msk [vmem:[#allocation4 + $0x1c] sm:$0xf] %vm439_vm2, %v2512_v16  ;;  %v2516_v5 = vld [vmem:[#allocation4] sm:$0xff] }
 0x1e2   :  { %4632 = vmatmul.mubr.msk.f32.gmra.mrb[58].mxu1 %vm405_vm1, %v6229_v62  ;;  %4830 = vmatmul.mubr.msk.f32.gmra.mrb[86].mxu0 %vm405_vm1, %v6336_v33  ;;  %v5164_v33 = vpack.c.bf16 %v4027_v27, %v4026_v28 }
 0x1e3   :  { %4642 = vmatprep.mubr.msk.f32.mxu1 %vm5472_vm0, %v5473_v54  ;;  %4832 = vmatprep.mubr.msk.f32.mxu0 %vm5472_vm0, %v5473_v54 }
 0x1e5   :  { %v2382_v62 = vld [vmem:[#allocation4 + $0x20] sm:$0xf] }
 0x1e6   :  { %4643 = vmatmul.mubr.msk.f32.vlgmr.msra.gmra.mrb[60].mxu1 %vm405_vm1, %v5990_v59  ;;  %4833 = vmatmul.mubr.msk.f32.gmra.mrb[88].mxu0 %vm405_vm1, %v6367_v21  ;;  %2515 = vst.msk [vmem:[#allocation4 + $0x20] sm:$0xf] %vm439_vm2, %v2514_v56  ;;  %v4033_v59 = vld [vmem:[%s7432_s3 + $0x100] sm:$0xff]  ;;  %v4036_v21 = vld [vmem:[%s7432_s3 + $0x118] sm:$0xff] }
 0x1e7   :  { %5162 = vmatpush3.bf16.msra.mxu1 %v5161_v11  ;;  %4645 = vmatprep.mubr.msk.f32.mxu1 %vm5472_vm0, %v5473_v54  ;;  %v2518_v56 = vld [vmem:[#allocation4 + $0x10] sm:$0xff] }
 0x1e8   :  { %5163 = vmatprep.subr.bf16.mxu1 %v5471_v3  ;;  %4835 = vmatprep.mubr.msk.f32.mxu0 %vm5472_vm0, %v5473_v54 }
 0x1ea   :  { %4646 = vmatmul.mubr.msk.f32.gmra.mrb[62].mxu1 %vm405_vm1, %v6065_v25  ;;  %4836 = vmatmul.mubr.msk.f32.gmra.mrb[90].mxu0 %vm405_vm1, %v2381_v26  ;;  %v4034_v25 = vld [vmem:[%s7432_s3 + $0x108] sm:$0xff] }
 0x1eb   :  { %4648 = vmatprep.mubr.msk.f32.mxu1 %vm5472_vm0, %v5473_v54  ;;  %5165 = vmatpush3.bf16.msra.mxu1 %v5164_v33  ;;  %v2519_v33 = vld [vmem:[#allocation4 + $0x18] sm:$0xff] }
 0x1ec   :  { %5166 = vmatprep.subr.bf16.mxu1 %v5471_v3  ;;  %4838 = vmatprep.mubr.msk.f32.mxu0 %vm5472_vm0, %v5473_v54 }
 0x1ee   :  { %4649 = vmatmul.mubr.msk.f32.gmra.mrb[64].mxu1 %vm405_vm1, %v6111_v14  ;;  %4839 = vmatmul.mubr.msk.f32.gmra.mrb[92].mxu0 %vm405_vm1, %v2382_v62  ;;  %v5167_v14 = vpack.c.bf16 %v4034_v25, %v4033_v59 }
 0x1ef   :  { %4651 = vmatprep.mubr.msk.f32.mxu1 %vm5472_vm0, %v5473_v54  ;;  %4899 = vmatprep.mubr.msk.f32.mxu0 %vm5472_vm0, %v5473_v54 }
 0x1f2   :  { %4652 = vmatmul.mubr.msk.f32.gmra.mrb[66].mxu1 %vm405_vm1, %v6234_v4  ;;  %v4035_v4 = vld [vmem:[%s7432_s3 + $0x110] sm:$0xff] }
 0x1f3   :  { %4654 = vmatprep.mubr.msk.f32.mxu1 %vm5472_vm0, %v5473_v54 }
 0x1f6   :  { %4655 = vmatmul.mubr.msk.f32.gmra.mrb[68].mxu1 %vm405_vm1, %v6263_v29  ;;  %v5170_v29 = vpack.c.bf16 %v4036_v21, %v4035_v4 }
 0x1f7   :  { %4665 = vmatprep.mubr.msk.f32.mxu1 %vm5472_vm0, %v5473_v54 }
 0x1fa   :  { %4666 = vmatmul.mubr.msk.f32.vlgmr.msra.gmra.mrb[70].mxu1 %vm405_vm1, %v6006_v17  ;;  %v4042_v17 = vld [vmem:[%s7432_s3 + $0x120] sm:$0xff] }
 0x1fb   :  { %5168 = vmatpush3.bf16.msra.mxu1 %v5167_v14  ;;  %4668 = vmatprep.mubr.msk.f32.mxu1 %vm5472_vm0, %v5473_v54  ;;  %v2520_v14 = vld [vmem:[#allocation4 + $0x20] sm:$0xf] }
 0x1fc   :  { %5169 = vmatprep.subr.bf16.mxu1 %v5471_v3 }
 0x1fe   :  { %4669 = vmatmul.mubr.msk.f32.gmra.mrb[72].mxu1 %vm405_vm1, %v6109_v12  ;;  %v4043_v12 = vld [vmem:[%s7432_s3 + $0x128] sm:$0xff] }
 0x1ff   :  { %4671 = vmatprep.mubr.msk.f32.mxu1 %vm5472_vm0, %v5473_v54  ;;  %5171 = vmatpush3.bf16.msra.mxu1 %v5170_v29  ;;  %v5173_v0 = vpack.c.bf16 %v4043_v12, %v4042_v17 }
 0x200   :  { %5172 = vmatprep.subr.bf16.mxu1 %v5471_v3 }
 0x202   :  { %4672 = vmatmul.mubr.msk.f32.gmra.mrb[74].mxu1 %vm405_vm1, %v6143_v46 }
 0x203   :  { %4674 = vmatprep.mubr.msk.f32.mxu1 %vm5472_vm0, %v5473_v54 }
 0x206   :  { %4675 = vmatmul.mubr.msk.f32.gmra.mrb[76].mxu1 %vm405_vm1, %v6268_v32 }
 0x207   :  { %4677 = vmatprep.mubr.msk.f32.mxu1 %vm5472_vm0, %v5473_v54 }
 0x20a   :  { %4678 = vmatmul.mubr.msk.f32.gmra.mrb[78].mxu1 %vm405_vm1, %v6293_v60  ;;  %v6570_v46 = vpop.f32.mrb[0].mxu1  ;;  %v5176_v60 = vpack.c.bf16 %v4045_v39, %v4044_v37 }
 0x20b   :  { %4688 = vmatprep.mubr.msk.f32.mxu1 %vm5472_vm0, %v5473_v54  ;;  %v4506_v32 = vpop.f32.mrb[1].mxu1 }
 0x20e   :  { %4689 = vmatmul.mubr.msk.f32.vlgmr.msra.gmra.mrb[80].mxu1 %vm405_vm1, %v6024_v40  ;;  %v4060_v40 = vld [vmem:[%s7432_s3 + $0x160] sm:$0xff] }
 0x20f   :  { %5174 = vmatpush3.bf16.msra.mxu1 %v5173_v0  ;;  %4691 = vmatprep.mubr.msk.f32.mxu1 %vm5472_vm0, %v5473_v54 }
 0x210   :  { %5175 = vmatprep.subr.bf16.mxu1 %v5471_v3 }
 0x212   :  { %4692 = vmatmul.mubr.msk.f32.gmra.mrb[82].mxu1 %vm405_vm1, %v6145_v47  ;;  %v4061_v47 = vld [vmem:[%s7432_s3 + $0x168] sm:$0xff] }
 0x213   :  { %4694 = vmatprep.mubr.msk.f32.mxu1 %vm5472_vm0, %v5473_v54  ;;  %5177 = vmatpush3.bf16.msra.mxu1 %v5176_v60 }
 0x214   :  { %5184 = vmatprep.subr.bf16.mxu1 %v5471_v3 }
 0x216   :  { %4695 = vmatmul.mubr.msk.f32.gmra.mrb[84].mxu1 %vm405_vm1, %v6182_v23  ;;  %v5185_v23 = vpack.c.bf16 %v4061_v47, %v4060_v40 }
 0x217   :  { %4697 = vmatprep.mubr.msk.f32.mxu1 %vm5472_vm0, %v5473_v54 }
 0x21a   :  { %4698 = vmatmul.mubr.msk.f32.gmra.mrb[86].mxu1 %vm405_vm1, %v6298_v50  ;;  %v4062_v50 = vld [vmem:[%s7432_s3 + $0x170] sm:$0xff] }
 0x21b   :  { %4700 = vmatprep.mubr.msk.f32.mxu1 %vm5472_vm0, %v5473_v54 }
 0x21e   :  { %4701 = vmatmul.mubr.msk.f32.gmra.mrb[88].mxu1 %vm405_vm1, %v6317_v63  ;;  %v5188_v63 = vpack.c.bf16 %v4063_v42, %v4062_v50 }
 0x21f   :  { %4711 = vmatprep.mubr.msk.f32.mxu1 %vm5472_vm0, %v5473_v54 }
 0x222   :  { %4712 = vmatmul.mubr.msk.f32.vlgmr.msra.gmra.mrb[90].mxu1 %vm405_vm1, %v6047_v8 }
 0x223   :  { %5186 = vmatpush3.bf16.msra.mxu1 %v5185_v23  ;;  %4714 = vmatprep.mubr.msk.f32.mxu1 %vm5472_vm0, %v5473_v54 }
 0x224   :  { %5187 = vmatprep.subr.bf16.mxu1 %v5471_v3 }
 0x226   :  { %4715 = vmatmul.mubr.msk.f32.gmra.mrb[92].mxu1 %vm405_vm1, %v6180_v22  ;;  %v580_v61 = vpop.f32.mrb[2].mxu1 }
 0x227   :  { %4717 = vmatprep.mubr.msk.f32.mxu1 %vm5472_vm0, %v5473_v54  ;;  %v4509_v10 = vpop.f32.mrb[3].mxu1  ;;  %5189 = vmatpush3.bf16.msra.mxu1 %v5188_v63 }
 0x228   :  { %5196 = vmatprep.subr.bf16.mxu1 %v5471_v3 }
 0x22a   :  { %4718 = vmatmul.mubr.msk.f32.gmra.mrb[94].mxu1 %vm405_vm1, %v6215_v52  ;;  %v5197_v52 = vpack.c.bf16 %v4079_v44, %v4078_v9 }
 0x22b   :  { %4720 = vmatprep.mubr.msk.f32.mxu1 %vm5472_vm0, %v5473_v54 }
 0x22e   :  { %4721 = vmatmul.mubr.msk.f32.gmra.mrb[96].mxu1 %vm405_vm1, %v6322_v31  ;;  %v4080_v31 = vld [vmem:[%s7432_s3 + $0x1b0] sm:$0xff] }
 0x22f   :  { %v585_v8 = vpop.f32.mrb[4].mxu1  ;;  %4723 = vmatprep.mubr.msk.f32.mxu1 %vm5472_vm0, %v5473_v54 }
 0x230   :  { %v4512_v22 = vpop.f32.mrb[5].mxu1 }
 0x232   :  { %4724 = vmatmul.mubr.msk.f32.gmra.mrb[98].mxu1 %vm405_vm1, %v6352_v53  ;;  %v5200_v53 = vpack.c.bf16 %v4081_v24, %v4080_v31 }
 0x233   :  { %4757 = vmatprep.mubr.msk.f32.mxu1 %vm5472_vm0, %v5473_v54 }
 0x236   :  { %4758 = vmatmul.mubr.msk.f32.vlgmr.msra.gmra.mrb[100].mxu1 %vm405_vm1, %v6130_v36  ;;  %v4096_v36 = vld [vmem:[%s7432_s3 + $0x1e0] sm:$0xff] }
 0x237   :  { %5198 = vmatpush3.bf16.msra.mxu1 %v5197_v52  ;;  %4760 = vmatprep.mubr.msk.f32.mxu1 %vm5472_vm0, %v5473_v54 }
 0x238   :  { %5199 = vmatprep.subr.bf16.mxu1 %v5471_v3 }
 0x23a   :  { %4761 = vmatmul.mubr.msk.f32.gmra.mrb[102].mxu1 %vm405_vm1, %v6246_v19  ;;  %v4097_v19 = vld [vmem:[%s7432_s3 + $0x1e8] sm:$0xff] }
 0x23b   :  { %4763 = vmatprep.mubr.msk.f32.mxu1 %vm5472_vm0, %v5473_v54  ;;  %5201 = vmatpush3.bf16.msra.mxu1 %v5200_v53 }
 0x23c   :  { %5208 = vmatprep.subr.bf16.mxu1 %v5471_v3 }
 0x23e   :  { %4764 = vmatmul.mubr.msk.f32.gmra.mrb[104].mxu1 %vm405_vm1, %v6284_v58  ;;  %v5209_v58 = vpack.c.bf16 %v4097_v19, %v4096_v36 }
 0x23f   :  { %4766 = vmatprep.mubr.msk.f32.mxu1 %vm5472_vm0, %v5473_v54 }
 0x242   :  { %4767 = vmatmul.mubr.msk.f32.gmra.mrb[106].mxu1 %vm405_vm1, %v6388_v51  ;;  %v4098_v51 = vld [vmem:[%s7432_s3 + $0x1f0] sm:$0xff] }
 0x243   :  { %4769 = vmatprep.mubr.msk.f32.mxu1 %vm5472_vm0, %v5473_v54 }
 0x246   :  { %4770 = vmatmul.mubr.msk.f32.gmra.mrb[108].mxu1 %vm405_vm1, %v6415_v49  ;;  %v5212_v49 = vpack.c.bf16 %v4099_v7, %v4098_v51 }
 0x247   :  { %4803 = vmatprep.mubr.msk.f32.mxu1 %vm5472_vm0, %v5473_v54 }
 0x24a   :  { %4804 = vmatmul.mubr.msk.f32.vlgmr.msra.gmra.mrb[110].mxu1 %vm405_vm1, %v6208_v43 }
 0x24b   :  { %5210 = vmatpush3.bf16.msra.mxu1 %v5209_v58  ;;  %v590_v57 = vpop.f32.mrb[6].mxu1  ;;  %4806 = vmatprep.mubr.msk.f32.mxu1 %vm5472_vm0, %v5473_v54 }
 0x24c   :  { %v4515_v34 = vpop.f32.mrb[7].mxu1  ;;  %5211 = vmatprep.subr.bf16.mxu1 %v5471_v3 }
 0x24e   :  { %4807 = vmatmul.mubr.msk.f32.gmra.mrb[112].mxu1 %vm405_vm1, %v6309_v6 }
 0x24f   :  { %4809 = vmatprep.mubr.msk.f32.mxu1 %vm5472_vm0, %v5473_v54  ;;  %5213 = vmatpush3.bf16.msra.mxu1 %v5212_v49 }
 0x250   :  { %5214 = vmatprep.subr.bf16.mxu1 %v5471_v3 }
 0x251   :  { %v595_v38 = vpop.f32.mrb[8].mxu1 }
 0x252   :  { %v4518_v43 = vpop.f32.mrb[9].mxu1  ;;  %4810 = vmatmul.mubr.msk.f32.gmra.mrb[114].mxu1 %vm405_vm1, %v6338_v35  ;;  %v6694_v48 = vpop.f32.mrb[64].mxu0 }
 0x253   :  { %4812 = vmatprep.mubr.msk.f32.mxu1 %vm5472_vm0, %v5473_v54  ;;  %v4736_v1 = vpop.f32.mrb[65].mxu0 }
 0x255   :  { %v680_v2 = vpop.f32.mrb[10].mxu1 }
 0x256   :  { %v681_v6 = vadd.f32 %v680_v2, %v6570_v46  ;;  %v4529_v15 = vpop.f32.mrb[11].mxu1  ;;  %4813 = vmatmul.mubr.msk.f32.gmra.mrb[116].mxu1 %vm405_vm1, %v6454_v41 }
 0x257   :  { %4815 = vmatprep.mubr.msk.f32.mxu1 %vm5472_vm0, %v5473_v54 }
 0x259   :  { %v685_v30 = vpop.f32.mrb[12].mxu1 }
 0x25a   :  { %v686_v45 = vadd.f32 %v685_v30, %v580_v61  ;;  %v4532_v55 = vpop.f32.mrb[13].mxu1  ;;  %4816 = vmatmul.mubr.msk.f32.gmra.mrb[118].mxu1 %vm405_vm1, %v6466_v18 }
 0x25b   :  { %4849 = vmatprep.mubr.msk.f32.mxu1 %vm5472_vm0, %v5473_v54 }
 0x25d   :  { %v690_v35 = vpop.f32.mrb[14].mxu1 }
 0x25e   :  { %v691_v16 = vadd.f32 %v690_v35, %v585_v8  ;;  %v4535_v26 = vpop.f32.mrb[15].mxu1  ;;  %4850 = vmatmul.mubr.msk.f32.vlgmr.msra.gmra.mrb[120].mxu1 %vm405_vm1, %v2516_v5 }
 0x25f   :  { %4852 = vmatprep.mubr.msk.f32.mxu1 %vm5472_vm0, %v5473_v54 }
 0x261   :  { %v695_v41 = vpop.f32.mrb[16].mxu1 }
 0x262   :  { %v696_v13 = vadd.f32 %v695_v41, %v590_v57  ;;  %v4538_v11 = vpop.f32.mrb[17].mxu1  ;;  %4853 = vmatmul.mubr.msk.f32.gmra.mrb[122].mxu1 %vm405_vm1, %v2517_v20 }
 0x263   :  { %4855 = vmatprep.mubr.msk.f32.mxu1 %vm5472_vm0, %v5473_v54 }
 0x265   :  { %v700_v18 = vpop.f32.mrb[18].mxu1 }
 0x266   :  { %v701_v28 = vadd.f32 %v700_v18, %v595_v38  ;;  %v4541_v27 = vpop.f32.mrb[19].mxu1  ;;  %4856 = vmatmul.mubr.msk.f32.gmra.mrb[124].mxu1 %vm405_vm1, %v2518_v56 }
 0x267   :  { %4858 = vmatprep.mubr.msk.f32.mxu1 %vm5472_vm0, %v5473_v54 }
 0x269   :  { %v813_v62 = vpop.f32.mrb[20].mxu1 }
 0x26a   :  { %v837_v59 = vadd.f32 %v813_v62, %v681_v6  ;;  %v4552_v25 = vpop.f32.mrb[21].mxu1  ;;  %4859 = vmatmul.mubr.msk.f32.gmra.mrb[126].mxu1 %vm405_vm1, %v2519_v33 }
 0x26b   :  { %4861 = vmatprep.mubr.msk.f32.mxu1 %vm5472_vm0, %v5473_v54 }
 0x26d   :  { %v818_v4 = vpop.f32.mrb[22].mxu1 }
 0x26e   :  { %v838_v21 = vadd.f32 %v818_v4, %v686_v45  ;;  %v4555_v29 = vpop.f32.mrb[23].mxu1  ;;  %4862 = vmatmul.mubr.msk.f32.gmra.mrb[128].mxu1 %vm405_vm1, %v2520_v14  ;;  %v6720_v17 = vpop.f32.mrb[66].mxu0 }
 0x26f   :  { %v4739_v12 = vpop.f32.mrb[67].mxu0  ;;  %4880 = vmatprep.mubr.msk.f32.mxu1 %vm5472_vm0, %v5473_v54 }
 0x271   :  { %v823_v46 = vpop.f32.mrb[24].mxu1 }
 0x272   :  { %v839_v32 = vadd.f32 %v823_v46, %v691_v16  ;;  %v4558_v0 = vpop.f32.mrb[25].mxu1 }
 0x275   :  { %v828_v37 = vpop.f32.mrb[26].mxu1 }
 0x276   :  { %v840_v39 = vadd.f32 %v828_v37, %v696_v13  ;;  %v4561_v60 = vpop.f32.mrb[27].mxu1 }
 0x277   :  { %v6724_v40 = vpop.f32.mrb[68].mxu0 }
 0x278   :  { %v4742_v47 = vpop.f32.mrb[69].mxu0 }
 0x279   :  { %v833_v23 = vpop.f32.mrb[28].mxu1 }
 0x27a   :  { %v841_v50 = vadd.f32 %v833_v23, %v701_v28  ;;  %v4564_v42 = vpop.f32.mrb[29].mxu1 }
 0x27d   :  { %v951_v63 = vpop.f32.mrb[30].mxu1 }
 0x27e   :  { %v975_v61 = vadd.f32 %v951_v63, %v837_v59  ;;  %v4575_v10 = vpop.f32.mrb[31].mxu1 }
 0x281   :  { %v956_v8 = vpop.f32.mrb[32].mxu1 }
 0x282   :  { %v976_v22 = vadd.f32 %v956_v8, %v838_v21  ;;  %v4578_v9 = vpop.f32.mrb[33].mxu1 }
 0x285   :  { %v961_v44 = vpop.f32.mrb[34].mxu1 }
 0x286   :  { %v977_v52 = vadd.f32 %v961_v44, %v839_v32  ;;  %v4581_v31 = vpop.f32.mrb[35].mxu1  ;;  %v2663_v44 = vld [vmem:[%s7434_s5] sm:$0xff] }
 0x289   :  { %v966_v24 = vpop.f32.mrb[36].mxu1 }
 0x28a   :  { %v978_v53 = vadd.f32 %v966_v24, %v840_v39  ;;  %v4584_v36 = vpop.f32.mrb[37].mxu1 }
 0x28d   :  { %v971_v19 = vpop.f32.mrb[38].mxu1 }
 0x28e   :  { %v979_v58 = vadd.f32 %v971_v19, %v841_v50  ;;  %v4587_v51 = vpop.f32.mrb[39].mxu1 }
 0x28f   :  { %v2665_v51 = vld [vmem:[%s7434_s5 + $0x10] sm:$0xff] }
 0x291   :  { %v1089_v7 = vpop.f32.mrb[40].mxu1 }
 0x292   :  { %v1113_v57 = vadd.f32 %v1089_v7, %v975_v61  ;;  %v4598_v49 = vpop.f32.mrb[41].mxu1  ;;  %v2666_v7 = vld [vmem:[%s7434_s5 + $0x18] sm:$0xff] }
 0x294   :  { %v6726_v34 = vpop.f32.mrb[70].mxu0 }
 0x295   :  { %v4745_v38 = vpop.f32.mrb[71].mxu0  ;;  %v1094_v43 = vpop.f32.mrb[42].mxu1 }
 0x296   :  { %v1114_v1 = vadd.f32 %v1094_v43, %v976_v22  ;;  %v4601_v2 = vpop.f32.mrb[43].mxu1  ;;  %v5230_v43 = vpack.c.bf16 %v2666_v7, %v2665_v51 }
 0x297   :  { %v4107_v2 = vld [vmem:[%s7434_s5 + $0x48] sm:$0xff] }
 0x299   :  { %v1099_v6 = vpop.f32.mrb[44].mxu1  ;;  %v6728_v15 = vpop.f32.mrb[72].mxu0 }
 0x29a   :  { %v1115_v30 = vadd.f32 %v1099_v6, %v977_v52  ;;  %v4604_v45 = vpop.f32.mrb[45].mxu1  ;;  %v4748_v55 = vpop.f32.mrb[73].mxu0  ;;  %v2664_v52 = vld [vmem:[%s7434_s5 + $0x8] sm:$0xff] }
 0x29b   :  { %v5227_v36 = vpack.c.bf16 %v2664_v52, %v2663_v44  ;;  %v2667_v55 = vld [vmem:[%s7434_s5 + $0x20] sm:$0xff] }
 0x29d   :  { %v1104_v35 = vpop.f32.mrb[46].mxu1  ;;  %v6730_v5 = vpop.f32.mrb[74].mxu0  ;;  %5228 = vmatpush3.bf16.msra.mxu0 %v5227_v36 }
 0x29e   :  { %v1116_v16 = vadd.f32 %v1104_v35, %v978_v53  ;;  %v4607_v26 = vpop.f32.mrb[47].mxu1  ;;  %v4782_v41 = vpop.f32.mrb[75].mxu0  ;;  %5229 = vmatprep.subr.bf16.mxu0 %v5471_v3  ;;  %v2668_v35 = vld [vmem:[%s7434_s5 + $0x28] sm:$0xff] }
 0x29f   :  { %v5233_v41 = vpack.c.bf16 %v2668_v35, %v2667_v55 }
 0x2a1   :  { %v1109_v20 = vpop.f32.mrb[48].mxu1  ;;  %v6732_v13 = vpop.f32.mrb[76].mxu0  ;;  %5231 = vmatpush3.bf16.msra.mxu0 %v5230_v43 }
 0x2a2   :  { %v1117_v11 = vadd.f32 %v1109_v20, %v979_v58  ;;  %v4610_v18 = vpop.f32.mrb[49].mxu1  ;;  %v4785_v56 = vpop.f32.mrb[77].mxu0  ;;  %5232 = vmatprep.subr.bf16.mxu0 %v5471_v3 }
 0x2a3   :  { %v4109_v18 = vld [vmem:[%s7434_s5 + $0x58] sm:$0xff] }
 0x2a5   :  { %v1227_v28 = vpop.f32.mrb[50].mxu1  ;;  %v6734_v27 = vpop.f32.mrb[78].mxu0  ;;  %5234 = vmatpush3.bf16.msra.mxu0 %v5233_v41 }
 0x2a6   :  { %v1251_v62 = vadd.f32 %v1227_v28, %v1113_v57  ;;  %v4621_v33 = vpop.f32.mrb[51].mxu1  ;;  %v4788_v59 = vpop.f32.mrb[79].mxu0  ;;  %5235 = vmatprep.subr.bf16.mxu0 %v5471_v3 }
 0x2a7   :  { %v2670_v33 = vld [vmem:[%s7434_s5 + $0x38] sm:$0xff] }
 0x2a9   :  { %v1232_v25 = vpop.f32.mrb[52].mxu1  ;;  %v6736_v14 = vpop.f32.mrb[80].mxu0 }
 0x2aa   :  { %v1252_v4 = vadd.f32 %v1232_v25, %v1114_v1  ;;  %v4624_v21 = vpop.f32.mrb[53].mxu1  ;;  %v4791_v29 = vpop.f32.mrb[81].mxu0  ;;  %v4106_v1 = vld [vmem:[%s7434_s5 + $0x40] sm:$0xff] }
 0x2ab   :  { %v5215_v45 = vpack.c.bf16 %v4107_v2, %v4106_v1  ;;  %v4110_v21 = vld [vmem:[%s7434_s5 + $0x60] sm:$0xff]  ;;  %v4111_v29 = vld [vmem:[%s7434_s5 + $0x68] sm:$0xff] }
 0x2ad   :  { %v1237_v12 = vpop.f32.mrb[54].mxu1  ;;  %v6738_v46 = vpop.f32.mrb[82].mxu0  ;;  %5216 = vmatpush3.bf16.msra.mxu1 %v5215_v45 }
 0x2ae   :  { %v1253_v32 = vadd.f32 %v1237_v12, %v1115_v30  ;;  %v4627_v0 = vpop.f32.mrb[55].mxu1  ;;  %v4794_v37 = vpop.f32.mrb[83].mxu0  ;;  %5217 = vmatprep.subr.bf16.mxu1 %v5471_v3 }
 0x2b1   :  { %v1242_v39 = vpop.f32.mrb[56].mxu1  ;;  %v6740_v60 = vpop.f32.mrb[84].mxu0 }
 0x2b2   :  { %v1254_v47 = vadd.f32 %v1242_v39, %v1116_v16  ;;  %v4630_v23 = vpop.f32.mrb[57].mxu1  ;;  %v4828_v50 = vpop.f32.mrb[85].mxu0  ;;  %v4112_v39 = vld [vmem:[%s7434_s5 + $0x70] sm:$0xff] }
 0x2b5   :  { %v1247_v42 = vpop.f32.mrb[58].mxu1  ;;  %v6742_v63 = vpop.f32.mrb[86].mxu0 }
 0x2b6   :  { %v1255_v61 = vadd.f32 %v1247_v42, %v1117_v11  ;;  %v4633_v10 = vpop.f32.mrb[59].mxu1  ;;  %v4831_v8 = vpop.f32.mrb[87].mxu0  ;;  %v4108_v11 = vld [vmem:[%s7434_s5 + $0x50] sm:$0xff] }
 0x2b7   :  { %v5218_v28 = vpack.c.bf16 %v4109_v18, %v4108_v11 }
 0x2b9   :  { %v1365_v22 = vpop.f32.mrb[60].mxu1  ;;  %v6744_v9 = vpop.f32.mrb[88].mxu0  ;;  %5219 = vmatpush3.bf16.msra.mxu1 %v5218_v28 }
 0x2ba   :  { %v1389_v31 = vadd.f32 %v1365_v22, %v1251_v62  ;;  %v4644_v24 = vpop.f32.mrb[61].mxu1  ;;  %v4834_v53 = vpop.f32.mrb[89].mxu0  ;;  %v2669_v62 = vld [vmem:[%s7434_s5 + $0x30] sm:$0xff]  ;;  %5220 = vmatprep.subr.bf16.mxu1 %v5471_v3 }
 0x2bd   :  { %v1370_v19 = vpop.f32.mrb[62].mxu1  ;;  %v6752_v58 = vpop.f32.mrb[90].mxu0 }
 0x2be   :  { %v1390_v57 = vadd.f32 %v1370_v19, %v1252_v4  ;;  %v4647_v49 = vpop.f32.mrb[63].mxu1  ;;  %v4837_v38 = vpop.f32.mrb[91].mxu0  ;;  %v5236_v4 = vpack.c.bf16 %v2670_v33, %v2669_v62 }
 0x2c0   :  { %5237 = vmatpush3.bf16.msra.mxu0 %v5236_v4 }
 0x2c1   :  { %v1375_v6 = vpop.f32.mrb[64].mxu1  ;;  %v6767_v30 = vpop.f32.mrb[92].mxu0  ;;  %5250 = vmatprep.subr.bf16.mxu0 %v5471_v3 }
 0x2c2   :  { %v1391_v16 = vadd.f32 %v1375_v6, %v1253_v32  ;;  %v4650_v26 = vpop.f32.mrb[65].mxu1  ;;  %v4840_v20 = vpop.f32.mrb[93].mxu0  ;;  %v5221_v32 = vpack.c.bf16 %v4111_v29, %v4110_v21 }
 0x2c4   :  { %5222 = vmatpush3.bf16.msra.mxu1 %v5221_v32 }
 0x2c5   :  { %v1380_v56 = vpop.f32.mrb[66].mxu1  ;;  %5223 = vmatprep.subr.bf16.mxu1 %v5471_v3 }
 0x2c6   :  { %v1392_v59 = vadd.f32 %v1380_v56, %v1254_v47  ;;  %v4653_v25 = vpop.f32.mrb[67].mxu1  ;;  %v4113_v47 = vld [vmem:[%s7434_s5 + $0x78] sm:$0xff] }
 0x2c7   :  { %v5224_v50 = vpack.c.bf16 %v4113_v47, %v4112_v39 }
 0x2c9   :  { %v1385_v12 = vpop.f32.mrb[68].mxu1  ;;  %5225 = vmatpush3.bf16.msra.mxu1 %v5224_v50 }
 0x2ca   :  { %v1393_v0 = vadd.f32 %v1385_v12, %v1255_v61  ;;  %v4656_v37 = vpop.f32.mrb[69].mxu1  ;;  %5238 = vmatprep.subr.bf16.mxu1 %v5471_v3 }
 0x2cd   :  { %v1503_v23 = vpop.f32.mrb[70].mxu1 }
 0x2ce   :  { %v1527_v42 = vadd.f32 %v1503_v23, %v1389_v31  ;;  %v4667_v10 = vpop.f32.mrb[71].mxu1 }
 0x2d1   :  { %v1508_v61 = vpop.f32.mrb[72].mxu1 }
 0x2d2   :  { %v1528_v8 = vadd.f32 %v1508_v61, %v1390_v57  ;;  %v4670_v22 = vpop.f32.mrb[73].mxu1 }
 0x2d5   :  { %v1513_v44 = vpop.f32.mrb[74].mxu1 }
 0x2d6   :  { %v1529_v52 = vadd.f32 %v1513_v44, %v1391_v16  ;;  %v4673_v24 = vpop.f32.mrb[75].mxu1 }
 0x2d9   :  { %v1518_v53 = vpop.f32.mrb[76].mxu1 }
 0x2da   :  { %v1530_v36 = vadd.f32 %v1518_v53, %v1392_v59  ;;  %v4676_v19 = vpop.f32.mrb[77].mxu1 }
 0x2dd   :  { %v1523_v51 = vpop.f32.mrb[78].mxu1 }
 0x2de   :  { %v1531_v7 = vadd.f32 %v1523_v51, %v1393_v0  ;;  %v4679_v49 = vpop.f32.mrb[79].mxu1 }
 0x2e1   :  { %v1641_v38 = vpop.f32.mrb[80].mxu1 }
 0x2e2   :  { %v1665_v43 = vadd.f32 %v1641_v38, %v1527_v42  ;;  %v4690_v1 = vpop.f32.mrb[81].mxu1 }
 0x2e5   :  { %v1646_v31 = vpop.f32.mrb[82].mxu1 }
 0x2e6   :  { %v1666_v2 = vadd.f32 %v1646_v31, %v1528_v8  ;;  %v4693_v6 = vpop.f32.mrb[83].mxu1 }
 0x2e9   :  { %v1651_v45 = vpop.f32.mrb[84].mxu1 }
 0x2ea   :  { %v1667_v55 = vadd.f32 %v1651_v45, %v1529_v52  ;;  %v4696_v35 = vpop.f32.mrb[85].mxu1 }
 0x2ed   :  { %v1656_v57 = vpop.f32.mrb[86].mxu1 }
 0x2ee   :  { %v1668_v26 = vadd.f32 %v1656_v57, %v1530_v36  ;;  %v4699_v41 = vpop.f32.mrb[87].mxu1 }
 0x2f1   :  { %v1661_v16 = vpop.f32.mrb[88].mxu1 }
 0x2f2   :  { %v1669_v20 = vadd.f32 %v1661_v16, %v1531_v7  ;;  %v4702_v11 = vpop.f32.mrb[89].mxu1 }
 0x2f5   :  { %v1779_v18 = vpop.f32.mrb[90].mxu1 }
 0x2f6   :  { %v1803_v56 = vadd.f32 %v1779_v18, %v1665_v43  ;;  %v4713_v28 = vpop.f32.mrb[91].mxu1 }
 0x2f8   :  { %v1941_v62 = vadd.f32 %v6694_v48, %v1803_v56 }
 0x2f9   :  { %v1784_v33 = vpop.f32.mrb[92].mxu1 }
 0x2fa   :  { %v1804_v59 = vadd.f32 %v1784_v33, %v1666_v2  ;;  %v4716_v25 = vpop.f32.mrb[93].mxu1 }
 0x2fc   :  { %v1942_v4 = vadd.f32 %v6720_v17, %v1804_v59 }
 0x2fd   :  { %v1789_v21 = vpop.f32.mrb[94].mxu1 }
 0x2fe   :  { %v1805_v29 = vadd.f32 %v1789_v21, %v1667_v55  ;;  %v4719_v12 = vpop.f32.mrb[95].mxu1 }
 0x300   :  { %v1943_v32 = vadd.f32 %v6724_v40, %v1805_v29 }
 0x301   :  { %v1794_v0 = vpop.f32.mrb[96].mxu1 }
 0x302   :  { %v1806_v37 = vadd.f32 %v1794_v0, %v1668_v26  ;;  %v4722_v39 = vpop.f32.mrb[97].mxu1 }
 0x304   :  { %v1944_v47 = vadd.f32 %v6726_v34, %v1806_v37 }
 0x305   :  { %v1799_v23 = vpop.f32.mrb[98].mxu1 }
 0x306   :  { %v1807_v50 = vadd.f32 %v1799_v23, %v1669_v20  ;;  %v4725_v42 = vpop.f32.mrb[99].mxu1 }
 0x308   :  { %v1945_v48 = vadd.f32 %v6728_v15, %v1807_v50 }
 0x309   :  { %v2055_v10 = vpop.f32.mrb[100].mxu1 }
 0x30a   :  { %v2079_v61 = vadd.f32 %v2055_v10, %v1941_v62  ;;  %v4759_v8 = vpop.f32.mrb[101].mxu1 }
 0x30b   :  { %v4125_v8 = vld [vmem:[%s7434_s5 + $0xc0] sm:$0xff] }
 0x30c   :  { %v2217_v17 = vadd.f32 %v6730_v5, %v2079_v61 }
 0x30d   :  { %v2060_v22 = vpop.f32.mrb[102].mxu1 }
 0x30e   :  { %v2080_v44 = vadd.f32 %v2060_v22, %v1942_v4  ;;  %v4762_v52 = vpop.f32.mrb[103].mxu1 }
 0x310   :  { %v2218_v40 = vadd.f32 %v6732_v13, %v2080_v44 }
 0x311   :  { %v2065_v24 = vpop.f32.mrb[104].mxu1 }
 0x312   :  { %v2081_v53 = vadd.f32 %v2065_v24, %v1943_v32  ;;  %v4765_v36 = vpop.f32.mrb[105].mxu1  ;;  %v4127_v24 = vld [vmem:[%s7434_s5 + $0xd0] sm:$0xff] }
 0x314   :  { %v2219_v34 = vadd.f32 %v6734_v27, %v2081_v53  ;;  %v4128_v53 = vld [vmem:[%s7434_s5 + $0xd8] sm:$0xff] }
 0x315   :  { %v2070_v19 = vpop.f32.mrb[106].mxu1 }
 0x316   :  { %v2082_v51 = vadd.f32 %v2070_v19, %v1944_v47  ;;  %v4768_v7 = vpop.f32.mrb[107].mxu1  ;;  %v4116_v19 = vld [vmem:[%s7434_s5 + $0x80] sm:$0xff] }
 0x317   :  { %v4117_v7 = vld [vmem:[%s7434_s5 + $0x88] sm:$0xff] }
 0x318   :  { %v2220_v15 = vadd.f32 %v6736_v14, %v2082_v51  ;;  %v5254_v51 = vpack.c.bf16 %v4128_v53, %v4127_v24  ;;  %v4155_v24 = vld [vmem:[%s7434_s5 + $0x198] sm:$0xff]  ;;  %v4163_v53 = vld [vmem:[%s7434_s5 + $0x1d0] sm:$0xff] }
 0x319   :  { %v2075_v49 = vpop.f32.mrb[108].mxu1 }
 0x31a   :  { %v2083_v38 = vadd.f32 %v2075_v49, %v1945_v48  ;;  %v4771_v43 = vpop.f32.mrb[109].mxu1  ;;  %v4130_v49 = vld [vmem:[%s7434_s5 + $0xe8] sm:$0xff] }
 0x31b   :  { %v4118_v43 = vld [vmem:[%s7434_s5 + $0x90] sm:$0xff] }
 0x31c   :  { %v2221_v5 = vadd.f32 %v6738_v46, %v2083_v38  ;;  %v5239_v38 = vpack.c.bf16 %v4117_v7, %v4116_v19 }
 0x31d   :  { %v2331_v1 = vpop.f32.mrb[110].mxu1 }
 0x31e   :  { %v2355_v31 = vadd.f32 %v2331_v1, %v2217_v17  ;;  %v4805_v2 = vpop.f32.mrb[111].mxu1  ;;  %v4126_v17 = vld [vmem:[%s7434_s5 + $0xc8] sm:$0xff]  ;;  %v4119_v1 = vld [vmem:[%s7434_s5 + $0x98] sm:$0xff] }
 0x31f   :  { %v5251_v52 = vpack.c.bf16 %v4126_v17, %v4125_v8  ;;  %v4132_v2 = vld [vmem:[%s7434_s5 + $0xf8] sm:$0xff]  ;;  %v4153_v8 = vld [vmem:[%s7434_s5 + $0x188] sm:$0xff]  ;;  %v4161_v17 = vld [vmem:[%s7434_s5 + $0x1c0] sm:$0xff] }
 0x320   :  { %v2493_v13 = vadd.f32 %v6740_v60, %v2355_v31  ;;  %v4131_v31 = vld [vmem:[%s7434_s5 + $0xf0] sm:$0xff] }
 0x321   :  { %v2336_v6 = vpop.f32.mrb[112].mxu1 }
 0x322   :  { %v2356_v45 = vadd.f32 %v2336_v6, %v2218_v40  ;;  %v4808_v55 = vpop.f32.mrb[113].mxu1 }
 0x323   :  { %v5260_v55 = vpack.c.bf16 %v4132_v2, %v4131_v31  ;;  %v4158_v31 = vld [vmem:[%s7434_s5 + $0x1b0] sm:$0xff]  ;;  %v4159_v2 = vld [vmem:[%s7434_s5 + $0x1b8] sm:$0xff] }
 0x324   :  { %v2494_v27 = vadd.f32 %v6742_v63, %v2356_v45  ;;  %v4105_v63 = vld [vmem:[%s7433_s4] ss:$0 sm:$0xff]  ;;  %v5242_v45 = vpack.c.bf16 %v4119_v1, %v4118_v43  ;;  %v4166_v43 = vld [vmem:[%s7434_s5 + $0x1e8] sm:$0xff] }
 0x325   :  { %v2341_v35 = vpop.f32.mrb[114].mxu1 }
 0x326   :  { %v2357_v57 = vadd.f32 %v2341_v35, %v2219_v34  ;;  %v4811_v26 = vpop.f32.mrb[115].mxu1  ;;  %v4121_v35 = vld [vmem:[%s7434_s5 + $0xa8] sm:$0xff] }
 0x327   :  { %v4122_v26 = vld [vmem:[%s7434_s5 + $0xb0] sm:$0xff] }
 0x328   :  { %v2495_v14 = vadd.f32 %v6744_v9, %v2357_v57 }
 0x329   :  { %v2346_v41 = vpop.f32.mrb[116].mxu1 }
 0x32a   :  { %v2358_v16 = vadd.f32 %v2346_v41, %v2220_v15  ;;  %v4814_v20 = vpop.f32.mrb[117].mxu1  ;;  %v4129_v15 = vld [vmem:[%s7434_s5 + $0xe0] sm:$0xff] }
 0x32c   :  { %v2496_v46 = vadd.f32 %v6752_v58, %v2358_v16 }
 0x32d   :  { %v2351_v11 = vpop.f32.mrb[118].mxu1 }
 0x32e   :  { %v2359_v18 = vadd.f32 %v2351_v11, %v2221_v5  ;;  %v4817_v56 = vpop.f32.mrb[119].mxu1  ;;  %v5257_v5 = vpack.c.bf16 %v4130_v49, %v4129_v15  ;;  %v4135_v11 = vld [vmem:[%s7434_s5 + $0x108] sm:$0xff]  ;;  %v4156_v15 = vld [vmem:[%s7434_s5 + $0x1a0] sm:$0xff] }
 0x32f   :  { %v4144_v56 = vld [vmem:[%s7434_s5 + $0x148] sm:$0xff] }
 0x330   :  { %v2497_v60 = vadd.f32 %v6767_v30, %v2359_v18  ;;  %v4143_v18 = vld [vmem:[%s7434_s5 + $0x140] sm:$0xff]  ;;  %v4157_v49 = vld [vmem:[%s7434_s5 + $0x1a8] sm:$0xff] }
 0x331   :  { %v2607_v28 = vpop.f32.mrb[120].mxu1 }
 0x332   :  { %v2631_v62 = vadd.f32 %v2607_v28, %v2493_v13  ;;  %v4851_v33 = vpop.f32.mrb[121].mxu1  ;;  %v5275_v28 = vpack.c.bf16 %v4144_v56, %v4143_v18  ;;  %v4174_v18 = vld [vmem:[%s7434_s5 + $0x220] sm:$0xff]  ;;  %v4175_v56 = vld [vmem:[%s7434_s5 + $0x228] sm:$0xff] }
 0x333   :  { %v4145_v33 = vld [vmem:[%s7434_s5 + $0x150] sm:$0xff] }
 0x334   :  { %v2643_v59 = vadd.f32 %v4105_v63, %v2631_v62  ;;  %v4137_v62 = vld [vmem:[%s7434_s5 + $0x118] sm:$0xff] }
 0x335   :  { %v2612_v9 = vpop.f32.mrb[122].mxu1 }
 0x336   :  { %v2648_v25 = vmax.f32 %v2643_v59, 0.0  ;;  %v2632_v4 = vadd.f32 %v2612_v9, %v2494_v27  ;;  %v4854_v21 = vpop.f32.mrb[123].mxu1  ;;  %v4120_v27 = vld [vmem:[%s7434_s5 + $0xa0] sm:$0xff]  ;;  %v4146_v59 = vld [vmem:[%s7434_s5 + $0x158] sm:$0xff] }
 0x337   :  { %v5245_v57 = vpack.c.bf16 %v4121_v35, %v4120_v27  ;;  %v5278_v21 = vpack.c.bf16 %v4146_v59, %v4145_v33  ;;  %v5296_v27 = vpack.c.bf16 %v4159_v2, %v4158_v31  ;;  %v3446_v59 = vld [vmem:[%s7436_s7 + $0x8] sm:$0xff]  ;;  %v3476_v2 = vld [vmem:[%s7436_s7 + $0xf8] sm:$0xff] }
 0x338   :  { %2654 = vst.msk [vmem:[#allocation3] sm:$0xff] %vm2653_vm3, %v2648_v25  ;;  %v2644_v58 = vadd.f32 %v4105_v63, %v2632_v4 }
 0x339   :  { %v2617_v29 = vpop.f32.mrb[124].mxu1 }
 0x33a   :  { %v2649_v12 = vmax.f32 %v2644_v58, 0.0  ;;  %v2633_v32 = vadd.f32 %v2617_v29, %v2495_v14  ;;  %v4857_v30 = vpop.f32.mrb[125].mxu1  ;;  %v4123_v14 = vld [vmem:[%s7434_s5 + $0xb8] sm:$0xff]  ;;  %v4138_v58 = vld [vmem:[%s7434_s5 + $0x120] sm:$0xff]  ;;  %v4139_v29 = vld [vmem:[%s7434_s5 + $0x128] sm:$0xff] }
 0x33b   :  { %v5248_v20 = vpack.c.bf16 %v4123_v14, %v4122_v26  ;;  %v5269_v30 = vpack.c.bf16 %v4139_v29, %v4138_v58  ;;  %v4171_v26 = vld [vmem:[%s7434_s5 + $0x208] sm:$0xff]  ;;  %v3445_v58 = vld [vmem:[%s7436_s7] sm:$0xff] }
 0x33c   :  { %2655 = vst.msk [vmem:[#allocation3 + $0x8] sm:$0xff] %vm2653_vm3, %v2649_v12  ;;  %v2645_v0 = vadd.f32 %v4105_v63, %v2633_v32  ;;  %v4147_v12 = vld [vmem:[%s7434_s5 + $0x160] sm:$0xff]  ;;  %v4148_v32 = vld [vmem:[%s7434_s5 + $0x168] sm:$0xff] }
 0x33d   :  { %v2622_v37 = vpop.f32.mrb[126].mxu1  ;;  %v3449_v29 = vld [vmem:[%s7436_s7 + $0x20] sm:$0xff] }
 0x33e   :  { %v2650_v39 = vmax.f32 %v2645_v0, 0.0  ;;  %v2634_v47 = vadd.f32 %v2622_v37, %v2496_v46  ;;  %v4860_v23 = vpop.f32.mrb[127].mxu1  ;;  %v4134_v46 = vld [vmem:[%s7434_s5 + $0x100] sm:$0xff]  ;;  %v5281_v0 = vpack.c.bf16 %v4148_v32, %v4147_v12  ;;  %v4140_v37 = vld [vmem:[%s7434_s5 + $0x130] sm:$0xff]  ;;  %v5324_v32 = vpack.c.bf16 %v3449_v29, %v3445_v58 }
 0x33f   :  { %v2660_v50 = vld [vmem:[#allocation3] sm:$0xf]  ;;  %v2671_v36 = vld [vmem:[#allocation3 + $0x4] sm:$0xf]  ;;  %v4150_v23 = vld [vmem:[%s7434_s5 + $0x178] sm:$0xff] }
 0x340   :  { %2656 = vst.msk [vmem:[#allocation3 + $0x10] sm:$0xff] %vm2653_vm3, %v2650_v39  ;;  %v2646_v42 = vadd.f32 %v4105_v63, %v2634_v47  ;;  %v4141_v39 = vld [vmem:[%s7434_s5 + $0x138] sm:$0xff]  ;;  %v4149_v47 = vld [vmem:[%s7434_s5 + $0x170] sm:$0xff] }
 0x341   :  { %2661 = vst.msk [vmem:[#allocation5] sm:$0xf] %vm2658_vm4, %v2660_v50  ;;  %v2627_v48 = vpop.f32.mrb[128].mxu1 }
 0x342   :  { %v2651_v10 = vmax.f32 %v2646_v42, 0.0  ;;  %v2635_v61 = vadd.f32 %v2627_v48, %v2497_v60  ;;  %v4863_v22 = vpop.f32.mrb[129].mxu1  ;;  %v5263_v60 = vpack.c.bf16 %v4135_v11, %v4134_v46  ;;  %v5272_v48 = vpack.c.bf16 %v4141_v39, %v4140_v37  ;;  %v3454_v39 = vld [vmem:[%s7436_s7 + $0x48] sm:$0xff] }
 0x343   :  { %v2829_v13 = vld [vmem:[#allocation3 + $0x8] sm:$0xf]  ;;  %v2915_v16 = vld [vmem:[#allocation3 + $0xc] sm:$0xf] }
 0x344   :  { %2657 = vst.msk [vmem:[#allocation3 + $0x18] sm:$0xff] %vm2653_vm3, %v2651_v10  ;;  %v2647_v44 = vadd.f32 %v4105_v63, %v2635_v61  ;;  %v4136_v63 = vld [vmem:[%s7434_s5 + $0x110] sm:$0xff]  ;;  %v5284_v10 = vpack.c.bf16 %v4150_v23, %v4149_v47  ;;  %v4152_v61 = vld [vmem:[%s7434_s5 + $0x180] sm:$0xff]  ;;  %v4162_v22 = vld [vmem:[%s7434_s5 + $0x1c8] sm:$0xff] }
 0x345   :  { %v5266_v4 = vpack.c.bf16 %v4137_v62, %v4136_v63  ;;  %v4177_v63 = vld [vmem:[%s7434_s5 + $0x238] sm:$0xff]  ;;  %v3458_v47 = vld [vmem:[%s7436_s7 + $0x68] sm:$0xff] }
 0x346   :  { %v2652_v40 = vmax.f32 %v2647_v44, 0.0  ;;  %v5287_v44 = vpack.c.bf16 %v4153_v8, %v4152_v61  ;;  %v3456_v23 = vld [vmem:[%s7436_s7 + $0x58] sm:$0xff]  ;;  %v3457_v61 = vld [vmem:[%s7436_s7 + $0x60] sm:$0xff]  ;;  %v3455_v8 = vld [vmem:[%s7436_s7 + $0x50] sm:$0xff] }
 0x347   :  { %v3001_v25 = vld [vmem:[#allocation3 + $0x10] sm:$0xf]  ;;  %v3087_v50 = vld [vmem:[#allocation3 + $0x14] sm:$0xf] }
 0x348   :  { %v2662_v34 = vld [vmem:[#allocation5] sm:$0xf]  ;;  %2659 = vst.msk [vmem:[#allocation3 + $0x20] sm:$0xf] %vm2658_vm4, %v2652_v40 }
 0x349   :  { %4900 = vmatmul.mubr.msk.f32.vlgmr.msra.gmra.mrb[94].mxu0 %vm2653_vm3, %v2662_v34  ;;  %2672 = vst.msk [vmem:[#allocation5] sm:$0xf] %vm2658_vm4, %v2671_v36  ;;  %v4154_v40 = vld [vmem:[%s7434_s5 + $0x190] sm:$0xff]  ;;  %v4164_v36 = vld [vmem:[%s7434_s5 + $0x1d8] sm:$0xff] }
 0x34a   :  { %5252 = vmatpush3.bf16.msra.mxu0 %v5251_v52  ;;  %4937 = vmatprep.mubr.msk.f32.mxu0 %vm5472_vm0, %v5473_v54  ;;  %v5299_v52 = vpack.c.bf16 %v4162_v22, %v4161_v17  ;;  %v5302_v7 = vpack.c.bf16 %v4164_v36, %v4163_v53  ;;  %v3459_v17 = vld [vmem:[%s7436_s7 + $0x70] sm:$0xff]  ;;  %v3468_v36 = vld [vmem:[%s7436_s7 + $0xb8] sm:$0xff] }
 0x34b   :  { %5253 = vmatprep.subr.bf16.mxu0 %v5471_v3  ;;  %v3173_v34 = vld [vmem:[#allocation3 + $0x18] sm:$0xf] }
 0x34e   :  { %5255 = vmatpush3.bf16.msra.mxu0 %v5254_v51  ;;  %v5290_v51 = vpack.c.bf16 %v4155_v24, %v4154_v40  ;;  %v3466_v40 = vld [vmem:[%s7436_s7 + $0xa8] sm:$0xff]  ;;  %v3464_v24 = vld [vmem:[%s7436_s7 + $0x98] sm:$0xff] }
 0x34f   :  { %5256 = vmatprep.subr.bf16.mxu0 %v5471_v3 }
 0x350   :  { %v2673_v6 = vld [vmem:[#allocation5] sm:$0xf] }
 0x351   :  { %4881 = vmatmul.mubr.msk.f32.vlgmr.msra.gmra.mrb[130].mxu1 %vm2653_vm3, %v2673_v6  ;;  %2830 = vst.msk [vmem:[#allocation5] sm:$0xf] %vm2658_vm4, %v2829_v13  ;;  %v4167_v13 = vld [vmem:[%s7434_s5 + $0x1f0] sm:$0xff]  ;;  %v4168_v6 = vld [vmem:[%s7434_s5 + $0x1f8] sm:$0xff] }
 0x352   :  { %5240 = vmatpush3.bf16.msra.mxu1 %v5239_v38  ;;  %5258 = vmatpush3.bf16.msra.mxu0 %v5257_v5  ;;  %v4165_v38 = vld [vmem:[%s7434_s5 + $0x1e0] sm:$0xff]  ;;  %v5293_v5 = vpack.c.bf16 %v4157_v49, %v4156_v15  ;;  %v5308_v35 = vpack.c.bf16 %v4168_v6, %v4167_v13  ;;  %v3463_v15 = vld [vmem:[%s7436_s7 + $0x90] sm:$0xff] }
 0x353   :  { %5241 = vmatprep.subr.bf16.mxu1 %v5471_v3  ;;  %5259 = vmatprep.subr.bf16.mxu0 %v5471_v3  ;;  %v5305_v1 = vpack.c.bf16 %v4166_v43, %v4165_v38  ;;  %v3467_v49 = vld [vmem:[%s7436_s7 + $0xb0] sm:$0xff]  ;;  %v3470_v43 = vld [vmem:[%s7436_s7 + $0xc8] sm:$0xff]  ;;  %v3469_v13 = vld [vmem:[%s7436_s7 + $0xc0] sm:$0xff] }
 0x354   :  { %4918 = vmatprep.mubr.msk.f32.mxu1 %vm5472_vm0, %v5473_v54  ;;  %v5348_v38 = vpack.c.bf16 %v3467_v49, %v3463_v15  ;;  %v3473_v6 = vld [vmem:[%s7436_s7 + $0xe0] sm:$0xff]  ;;  %v3646_v15 = vld [vmem:[%s7438_s9 + $0x10] sm:$0xff]  ;;  %v3647_v49 = vld [vmem:[%s7438_s9 + $0x18] sm:$0xff] }
 0x356   :  { %5243 = vmatpush3.bf16.msra.mxu1 %v5242_v45  ;;  %5261 = vmatpush3.bf16.msra.mxu0 %v5260_v55  ;;  %v3259_v45 = vld [vmem:[#allocation3 + $0x1c] sm:$0xf] }
 0x357   :  { %5244 = vmatprep.subr.bf16.mxu1 %v5471_v3  ;;  %5274 = vmatprep.subr.bf16.mxu0 %v5471_v3 }
 0x358   :  { %v2831_v41 = vld [vmem:[#allocation5] sm:$0xf] }
 0x359   :  { %2916 = vst.msk [vmem:[#allocation5] sm:$0xf] %vm2658_vm4, %v2915_v16  ;;  %v4173_v16 = vld [vmem:[%s7434_s5 + $0x218] sm:$0xff] }
 0x35a   :  { %5246 = vmatpush3.bf16.msra.mxu1 %v5245_v57  ;;  %v4170_v57 = vld [vmem:[%s7434_s5 + $0x200] sm:$0xff] }
 0x35b   :  { %5247 = vmatprep.subr.bf16.mxu1 %v5471_v3  ;;  %v5311_v14 = vpack.c.bf16 %v4171_v26, %v4170_v57  ;;  %v3660_v26 = vld [vmem:[%s7438_s9 + $0x80] sm:$0xff] }
 0x35e   :  { %5249 = vmatpush3.bf16.msra.mxu1 %v5248_v20  ;;  %v3345_v20 = vld [vmem:[#allocation3 + $0x20] sm:$0xf] }
 0x35f   :  { %5262 = vmatprep.subr.bf16.mxu1 %v5471_v3 }
 0x360   :  { %v2917_v9 = vld [vmem:[#allocation5] sm:$0xf] }
 0x361   :  { %4919 = vmatmul.mubr.msk.f32.vlgmr.msra.gmra.mrb[132].mxu1 %vm2653_vm3, %v2831_v41  ;;  %4938 = vmatmul.mubr.msk.f32.vlgmr.msra.gmra.mrb[96].mxu0 %vm2653_vm3, %v2917_v9  ;;  %3002 = vst.msk [vmem:[#allocation5] sm:$0xf] %vm2658_vm4, %v3001_v25  ;;  %v4172_v41 = vld [vmem:[%s7434_s5 + $0x210] sm:$0xff]  ;;  %v3450_v9 = vld [vmem:[%s7436_s7 + $0x28] sm:$0xff]  ;;  %v3448_v25 = vld [vmem:[%s7436_s7 + $0x18] sm:$0xff] }
 0x362   :  { %5264 = vmatpush3.bf16.msra.mxu1 %v5263_v60  ;;  %5276 = vmatpush3.bf16.msra.mxu0 %v5275_v28  ;;  %v5314_v11 = vpack.c.bf16 %v4173_v16, %v4172_v41  ;;  %v5317_v60 = vpack.c.bf16 %v4175_v56, %v4174_v18  ;;  %v4176_v28 = vld [vmem:[%s7434_s5 + $0x230] sm:$0xff]  ;;  %v3692_v41 = vld [vmem:[%s7438_s9 + $0x180] sm:$0xff] }
 0x363   :  { %5265 = vmatprep.subr.bf16.mxu1 %v5471_v3  ;;  %5277 = vmatprep.subr.bf16.mxu0 %v5471_v3  ;;  %v5320_v62 = vpack.c.bf16 %v4177_v63, %v4176_v28 }
 0x364   :  { %4956 = vmatprep.mubr.msk.f32.mxu1 %vm5472_vm0, %v5473_v54  ;;  %4975 = vmatprep.mubr.msk.f32.mxu0 %vm5472_vm0, %v5473_v54 }
 0x366   :  { %5267 = vmatpush3.bf16.msra.mxu1 %v5266_v4  ;;  %5279 = vmatpush3.bf16.msra.mxu0 %v5278_v21  ;;  %v5322_v4 = vpack.c.bf16 %v3450_v9, %v3446_v59  ;;  %v3452_v21 = vld [vmem:[%s7436_s7 + $0x38] sm:$0xff] }
 0x367   :  { %5268 = vmatprep.subr.bf16.mxu1 %v5471_v3  ;;  %5280 = vmatprep.subr.bf16.mxu0 %v5471_v3  ;;  %v5338_v12 = vpack.c.bf16 %v3452_v21, %v3448_v25 }
 0x368   :  { %v3003_v42 = vld [vmem:[#allocation5] sm:$0xf] }
 0x369   :  { %3088 = vst.msk [vmem:[#allocation5] sm:$0xf] %vm2658_vm4, %v3087_v50  ;;  %v5326_v50 = vpack.c.bf16 %v3458_v47, %v3454_v39 }
 0x36a   :  { %5270 = vmatpush3.bf16.msra.mxu1 %v5269_v30  ;;  %5282 = vmatpush3.bf16.msra.mxu0 %v5281_v0  ;;  %v3447_v30 = vld [vmem:[%s7436_s7 + $0x10] sm:$0xff] }
 0x36b   :  { %5271 = vmatprep.subr.bf16.mxu1 %v5471_v3  ;;  %5283 = vmatprep.subr.bf16.mxu0 %v5471_v3  ;;  %v3451_v0 = vld [vmem:[%s7436_s7 + $0x30] sm:$0xff] }
 0x36c   :  { %v5340_v37 = vpack.c.bf16 %v3451_v0, %v3447_v30 }
 0x36e   :  { %5273 = vmatpush3.bf16.msra.mxu1 %v5272_v48  ;;  %5285 = vmatpush3.bf16.msra.mxu0 %v5284_v10  ;;  %v3453_v48 = vld [vmem:[%s7436_s7 + $0x40] sm:$0xff] }
 0x36f   :  { %5286 = vmatprep.subr.bf16.mxu1 %v5471_v3  ;;  %5298 = vmatprep.subr.bf16.mxu0 %v5471_v3  ;;  %v5328_v22 = vpack.c.bf16 %v3457_v61, %v3453_v48 }
 0x370   :  { %v3089_v19 = vld [vmem:[#allocation5] sm:$0xf] }
 0x371   :  { %4957 = vmatmul.mubr.msk.f32.vlgmr.msra.gmra.mrb[134].mxu1 %vm2653_vm3, %v3003_v42  ;;  %4976 = vmatmul.mubr.msk.f32.vlgmr.msra.gmra.mrb[98].mxu0 %vm2653_vm3, %v3089_v19  ;;  %3174 = vst.msk [vmem:[#allocation5] sm:$0xf] %vm2658_vm4, %v3173_v34  ;;  %v3460_v42 = vld [vmem:[%s7436_s7 + $0x78] sm:$0xff]  ;;  %v3461_v34 = vld [vmem:[%s7436_s7 + $0x80] sm:$0xff] }
 0x372   :  { %5288 = vmatpush3.bf16.msra.mxu1 %v5287_v44  ;;  %5300 = vmatpush3.bf16.msra.mxu0 %v5299_v52  ;;  %v5342_v10 = vpack.c.bf16 %v3460_v42, %v3456_v23  ;;  %v5344_v44 = vpack.c.bf16 %v3459_v17, %v3455_v8  ;;  %v3462_v52 = vld [vmem:[%s7436_s7 + $0x88] sm:$0xff]  ;;  %v3465_v19 = vld [vmem:[%s7436_s7 + $0xa0] sm:$0xff] }
 0x373   :  { %5289 = vmatprep.subr.bf16.mxu1 %v5471_v3  ;;  %5301 = vmatprep.subr.bf16.mxu0 %v5471_v3  ;;  %v5330_v53 = vpack.c.bf16 %v3466_v40, %v3462_v52  ;;  %v4179_v42 = vld [vmem:[%s7435_s6] ss:$0 sm:$0xff]  ;;  %v3677_v40 = vld [vmem:[%s7438_s9 + $0x108] sm:$0xff] }
 0x374   :  { %4994 = vmatprep.mubr.msk.f32.mxu1 %vm5472_vm0, %v5473_v54  ;;  %5013 = vmatprep.mubr.msk.f32.mxu0 %vm5472_vm0, %v5473_v54  ;;  %v3644_v17 = vld [vmem:[%s7438_s9] sm:$0xff] }
 0x375   :  { %v3676_v52 = vld [vmem:[%s7438_s9 + $0x100] sm:$0xff] }
 0x376   :  { %5291 = vmatpush3.bf16.msra.mxu1 %v5290_v51  ;;  %5303 = vmatpush3.bf16.msra.mxu0 %v5302_v7  ;;  %v5346_v51 = vpack.c.bf16 %v3468_v36, %v3464_v24  ;;  %v5332_v7 = vpack.c.bf16 %v3465_v19, %v3461_v34  ;;  %v3662_v24 = vld [vmem:[%s7438_s9 + $0x90] sm:$0xff]  ;;  %v3695_v34 = vld [vmem:[%s7438_s9 + $0x198] sm:$0xff] }
 0x377   :  { %5292 = vmatprep.subr.bf16.mxu1 %v5471_v3  ;;  %5304 = vmatprep.subr.bf16.mxu0 %v5471_v3  ;;  %v3694_v36 = vld [vmem:[%s7438_s9 + $0x190] sm:$0xff] }
 0x378   :  { %v3175_v55 = vld [vmem:[#allocation5] sm:$0xf] }
 0x379   :  { %3260 = vst.msk [vmem:[#allocation5] sm:$0xf] %vm2658_vm4, %v3259_v45 }
 0x37a   :  { %5294 = vmatpush3.bf16.msra.mxu1 %v5293_v5  ;;  %5306 = vmatpush3.bf16.msra.mxu0 %v5305_v1  ;;  %v3474_v5 = vld [vmem:[%s7436_s7 + $0xe8] sm:$0xff]  ;;  %v3472_v1 = vld [vmem:[%s7436_s7 + $0xd8] sm:$0xff] }
 0x37b   :  { %5295 = vmatprep.subr.bf16.mxu1 %v5471_v3  ;;  %5307 = vmatprep.subr.bf16.mxu0 %v5471_v3  ;;  %v5334_v31 = vpack.c.bf16 %v3474_v5, %v3470_v43  ;;  %v5350_v45 = vpack.c.bf16 %v3476_v2, %v3472_v1  ;;  %v5390_v5 = vpack.c.bf16 %v3695_v34, %v3694_v36  ;;  %v3678_v1 = vld [vmem:[%s7438_s9 + $0x110] sm:$0xff]  ;;  %v3664_v2 = vld [vmem:[%s7438_s9 + $0xa0] sm:$0xff]  ;;  %v3705_v34 = vld [vmem:[%s7438_s9 + $0x1e8] sm:$0xff] }
 0x37c   :  { %v3704_v36 = vld [vmem:[%s7438_s9 + $0x1e0] sm:$0xff] }
 0x37e   :  { %5297 = vmatpush3.bf16.msra.mxu1 %v5296_v27  ;;  %5309 = vmatpush3.bf16.msra.mxu0 %v5308_v35  ;;  %v3471_v27 = vld [vmem:[%s7436_s7 + $0xd0] sm:$0xff] }
 0x37f   :  { %5310 = vmatprep.subr.bf16.mxu1 %v5471_v3  ;;  %5323 = vmatprep.subr.bf16.mxu0 %v5322_v4  ;;  %v3475_v35 = vld [vmem:[%s7436_s7 + $0xf0] sm:$0xff] }
 0x380   :  { %v3261_v46 = vld [vmem:[#allocation5] sm:$0xf]  ;;  %v5352_v57 = vpack.c.bf16 %v3475_v35, %v3471_v27  ;;  %v3648_v35 = vld [vmem:[%s7438_s9 + $0x20] sm:$0xff] }
 0x381   :  { %4995 = vmatmul.mubr.msk.f32.vlgmr.msra.gmra.mrb[136].mxu1 %vm2653_vm3, %v3175_v55  ;;  %5014 = vmatmul.mubr.msk.f32.vlgmr.msra.gmra.mrb[100].mxu0 %vm2653_vm3, %v3261_v46  ;;  %3346 = vst.msk [vmem:[#allocation5] sm:$0xf] %vm2658_vm4, %v3345_v20  ;;  %v5336_v55 = vpack.c.bf16 %v3473_v6, %v3469_v13  ;;  %v3693_v20 = vld [vmem:[%s7438_s9 + $0x188] sm:$0xff]  ;;  %v3696_v6 = vld [vmem:[%s7438_s9 + $0x1a0] sm:$0xff] }
 0x382   :  { %5312 = vmatpush3.bf16.msra.mxu1 %v5311_v14  ;;  %5032 = vmatprep.mubr.msk.f32.mxu1 %vm5472_vm0, %v5473_v54  ;;  %v3661_v14 = vld [vmem:[%s7438_s9 + $0x88] sm:$0xff]  ;;  %v5386_v46 = vpack.c.bf16 %v3693_v20, %v3692_v41  ;;  %v3680_v41 = vld [vmem:[%s7438_s9 + $0x120] sm:$0xff]  ;;  %v3666_v20 = vld [vmem:[%s7438_s9 + $0xb0] sm:$0xff] }
 0x383   :  { %5313 = vmatprep.subr.bf16.mxu1 %v5471_v3  ;;  %3566 = vmatprep.mubr.f32.mxu0 %v5473_v54  ;;  %v5354_v16 = vpack.c.bf16 %v3661_v14, %v3660_v26  ;;  %v3665_v13 = vld [vmem:[%s7438_s9 + $0xa8] sm:$0xff] }
 0x384   :  { %5325 = vmatpush1.bf16.msra.mxu0 %v5324_v32  ;;  %v5362_v26 = vpack.c.bf16 %v3665_v13, %v3664_v2  ;;  %v3674_v2 = vld [vmem:[%s7438_s9 + $0xf0] sm:$0xff]  ;;  %v3675_v13 = vld [vmem:[%s7438_s9 + $0xf8] sm:$0xff] }
 0x385   :  { %5327 = vmatprep.subr.bf16.mxu0 %v5326_v50 }
 0x386   :  { %5315 = vmatpush3.bf16.msra.mxu1 %v5314_v11 }
 0x387   :  { %5316 = vmatprep.subr.bf16.mxu1 %v5471_v3 }
 0x388   :  { %v3347_v33 = vld [vmem:[#allocation5] sm:$0xf]  ;;  %5329 = vmatpush1.bf16.msra.mxu0 %v5328_v22  ;;  %v3645_v22 = vld [vmem:[%s7438_s9 + $0x8] sm:$0xff] }
 0x389   :  { %5331 = vmatprep.subr.bf16.mxu0 %v5330_v53  ;;  %v3663_v53 = vld [vmem:[%s7438_s9 + $0x98] sm:$0xff] }
 0x38a   :  { %5318 = vmatpush3.bf16.msra.mxu1 %v5317_v60  ;;  %v5358_v43 = vpack.c.bf16 %v3663_v53, %v3662_v24  ;;  %v3672_v24 = vld [vmem:[%s7438_s9 + $0xe0] sm:$0xff]  ;;  %v3673_v53 = vld [vmem:[%s7438_s9 + $0xe8] sm:$0xff] }
 0x38b   :  { %5319 = vmatprep.subr.bf16.mxu1 %v5471_v3 }
 0x38c   :  { %5333 = vmatpush1.bf16.msra.mxu0 %v5332_v7  ;;  %v5388_v7 = vpack.c.bf16 %v3677_v40, %v3676_v52  ;;  %v3686_v52 = vld [vmem:[%s7438_s9 + $0x150] sm:$0xff]  ;;  %v3687_v40 = vld [vmem:[%s7438_s9 + $0x158] sm:$0xff] }
 0x38d   :  { %5335 = vmatprep.subr.bf16.mxu0 %v5334_v31  ;;  %v3679_v31 = vld [vmem:[%s7438_s9 + $0x118] sm:$0xff] }
 0x38e   :  { %5321 = vmatpush3.bf16.msra.mxu1 %v5320_v62  ;;  %v5392_v27 = vpack.c.bf16 %v3679_v31, %v3678_v1 }
 0x38f   :  { %5339 = vmatprep.subr.bf16.mxu1 %v5338_v12 }
 0x390   :  { %5337 = vmatpush1.bf16.msra.mxu0 %v5336_v55  ;;  %v5360_v55 = vpack.c.bf16 %v3647_v49, %v3646_v15  ;;  %v5378_v15 = vpack.c.bf16 %v3673_v53, %v3672_v24  ;;  %v5410_v49 = vpack.c.bf16 %v3705_v34, %v3704_v36  ;;  %v3867_v24 = vld [vmem:[%s7440_s11 + $0x60] sm:$0xff]  ;;  %v3868_v53 = vld [vmem:[%s7440_s11 + $0x68] sm:$0xff]  ;;  %v3869_v34 = vld [vmem:[%s7440_s11 + $0x70] sm:$0xff] }
 0x391   :  { %5033 = vmatmul.mubr.msk.f32.vlgmr.msra.gmra.mrb[138].mxu1 %vm2653_vm3, %v3347_v33  ;;  %5355 = vmatprep.subr.bf16.mxu0 %v5354_v16  ;;  %v3681_v16 = vld [vmem:[%s7438_s9 + $0x128] sm:$0xff]  ;;  %v5437_v36 = vpack.c.bf16 %v3868_v53, %v3867_v24 }
 0x392   :  { %3637 = vmatprep.mubr.f32.mxu1 %v5473_v54  ;;  %5341 = vmatpush1.bf16.msra.mxu1 %v5340_v37 }
 0x393   :  { %5343 = vmatprep.subr.bf16.mxu1 %v5342_v10 }
 0x396   :  { %5345 = vmatpush1.bf16.msra.mxu1 %v5344_v44 }
 0x397   :  { %5347 = vmatprep.subr.bf16.mxu1 %v5346_v51  ;;  %v5356_v51 = vpack.c.bf16 %v3645_v22, %v3644_v17  ;;  %v3655_v17 = vld [vmem:[%s7438_s9 + $0x58] sm:$0xff] }
 0x39a   :  { %5349 = vmatpush1.bf16.msra.mxu1 %v5348_v38 }
 0x39b   :  { %5351 = vmatprep.subr.bf16.mxu1 %v5350_v45  ;;  %v3697_v45 = vld [vmem:[%s7438_s9 + $0x1a8] sm:$0xff] }
 0x39c   :  { %v5394_v14 = vpack.c.bf16 %v3697_v45, %v3696_v6  ;;  %v3706_v6 = vld [vmem:[%s7438_s9 + $0x1f0] sm:$0xff]  ;;  %v5382_v45 = vpack.c.bf16 %v3675_v13, %v3674_v2  ;;  %v4183_v2 = vld [vmem:[%s7441_s12] ss:$0 sm:$0xff] }
 0x39e   :  { %5353 = vmatpush1.bf16.msra.mxu1 %v5352_v57  ;;  %v3649_v57 = vld [vmem:[%s7438_s9 + $0x28] sm:$0xff] }
 0x39f   :  { %5387 = vmatprep.subr.bf16.mxu1 %v5386_v46  ;;  %v3667_v46 = vld [vmem:[%s7438_s9 + $0xb8] sm:$0xff] }
 0x41c   :  { %v2825_v11 = vpop.f32.mrb[94].mxu0 }
 0x41d   :  { %v4901_v18 = vpop.f32.mrb[95].mxu0 }
 0x41e   :  { %v3699_v18 = vld [vmem:[%s7438_s9 + $0x1b8] sm:$0xff] }
 0x424   :  { %v2752_v56 = vpop.f32.mrb[130].mxu1 }
 0x425   :  { %v2826_v60 = vadd.f32 %v2825_v11, %v2752_v56  ;;  %v4882_v28 = vpop.f32.mrb[131].mxu1  ;;  %v3698_v11 = vld [vmem:[%s7438_s9 + $0x1b0] sm:$0xff]  ;;  %v5364_v56 = vpack.c.bf16 %v3649_v57, %v3648_v35  ;;  %v3659_v35 = vld [vmem:[%s7438_s9 + $0x78] sm:$0xff] }
 0x426   :  { %v3650_v28 = vld [vmem:[%s7438_s9 + $0x30] sm:$0xff] }
 0x434   :  { %v2910_v63 = vpop.f32.mrb[132].mxu1  ;;  %v2996_v62 = vpop.f32.mrb[96].mxu0 }
 0x435   :  { %v2914_v33 = vadd.f32 %v2910_v63, %v2826_v60  ;;  %v4920_v59 = vpop.f32.mrb[133].mxu1  ;;  %v4939_v9 = vpop.f32.mrb[97].mxu0  ;;  %v5396_v60 = vpack.c.bf16 %v3681_v16, %v3680_v41  ;;  %v3651_v63 = vld [vmem:[%s7438_s9 + $0x38] sm:$0xff] }
 0x436   :  { %v3682_v59 = vld [vmem:[%s7438_s9 + $0x130] sm:$0xff]  ;;  %v3683_v9 = vld [vmem:[%s7438_s9 + $0x138] sm:$0xff] }
 0x437   :  { %v3000_v25 = vadd.f32 %v2996_v62, %v2914_v33  ;;  %v5366_v62 = vpack.c.bf16 %v3667_v46, %v3666_v20  ;;  %v5398_v33 = vpack.c.bf16 %v3699_v18, %v3698_v11  ;;  %v3691_v41 = vld [vmem:[%s7438_s9 + $0x178] sm:$0xff]  ;;  %v3479_v20 = vlaneseq }
 0x439   :  { %v3480_v46 = vshrl.u32 %v3479_v20, 7 }
 0x43b   :  { %v3485_v11 = vsub.s32 1, %v3480_v46  ;;  %v3493_v18 = vsub.s32 3, %v3480_v46 }
 0x444   :  { %v3082_v4 = vpop.f32.mrb[134].mxu1  ;;  %v3168_v21 = vpop.f32.mrb[98].mxu0 }
 0x445   :  { %v3086_v58 = vadd.f32 %v3082_v4, %v3000_v25  ;;  %v4958_v29 = vpop.f32.mrb[135].mxu1  ;;  %v4977_v12 = vpop.f32.mrb[99].mxu0  ;;  %v3668_v25 = vld [vmem:[%s7438_s9 + $0xc0] sm:$0xff]  ;;  %v3669_v4 = vld [vmem:[%s7438_s9 + $0xc8] sm:$0xff] }
 0x446   :  { %v5368_v29 = vpack.c.bf16 %v3651_v63, %v3650_v28  ;;  %v5400_v12 = vpack.c.bf16 %v3683_v9, %v3682_v59  ;;  %v3489_v28 = vsub.s32 2, %v3480_v46  ;;  %v3855_v9 = vld [vmem:[%s7440_s11] sm:$0xff] }
 0x447   :  { %v3172_v32 = vadd.f32 %v3168_v21, %v3086_v58  ;;  %v3700_v21 = vld [vmem:[%s7438_s9 + $0x1c0] sm:$0xff]  ;;  %v3701_v58 = vld [vmem:[%s7438_s9 + $0x1c8] sm:$0xff] }
 0x454   :  { %v3254_v30 = vpop.f32.mrb[136].mxu1  ;;  %v3340_v0 = vpop.f32.mrb[100].mxu0 }
 0x455   :  { %v3258_v37 = vadd.f32 %v3254_v30, %v3172_v32  ;;  %v4996_v39 = vpop.f32.mrb[137].mxu1  ;;  %v5015_v47 = vpop.f32.mrb[101].mxu0  ;;  %v3652_v32 = vld [vmem:[%s7438_s9 + $0x40] sm:$0xff]  ;;  %v3653_v30 = vld [vmem:[%s7438_s9 + $0x48] sm:$0xff] }
 0x456   :  { %v3684_v39 = vld [vmem:[%s7438_s9 + $0x140] sm:$0xff]  ;;  %v3685_v47 = vld [vmem:[%s7438_s9 + $0x148] sm:$0xff] }
 0x457   :  { %v3344_v23 = vadd.f32 %v3340_v0, %v3258_v37  ;;  %v5370_v0 = vpack.c.bf16 %v3669_v4, %v3668_v25  ;;  %v5402_v37 = vpack.c.bf16 %v3701_v58, %v3700_v21  ;;  %v3856_v25 = vld [vmem:[%s7440_s11 + $0x8] sm:$0xff] }
 0x464   :  { %v3426_v50 = vpop.f32.mrb[138].mxu1 }
 0x465   :  { %v3430_v48 = vadd.f32 %v3426_v50, %v3344_v23  ;;  %v5034_v10 = vpop.f32.mrb[139].mxu1  ;;  %v3670_v23 = vld [vmem:[%s7438_s9 + $0xd0] sm:$0xff]  ;;  %v3671_v50 = vld [vmem:[%s7438_s9 + $0xd8] sm:$0xff] }
 0x466   :  { %v5372_v10 = vpack.c.bf16 %v3653_v30, %v3652_v32  ;;  %v5374_v22 = vpack.c.bf16 %v3671_v50, %v3670_v23  ;;  %v5419_v30 = vpack.c.bf16 %v3856_v25, %v3855_v9  ;;  %v3859_v50 = vld [vmem:[%s7440_s11 + $0x20] sm:$0xff] }
 0x467   :  { %v3438_v61 = vadd.f32 %v4179_v42, %v3430_v48  ;;  %v3702_v42 = vld [vmem:[%s7438_s9 + $0x1d0] sm:$0xff]  ;;  %v3703_v48 = vld [vmem:[%s7438_s9 + $0x1d8] sm:$0xff] }
 0x469   :  { %v3439_v8 = vmax.f32 %v3438_v61, 0.0  ;;  %v5404_v61 = vpack.c.bf16 %v3685_v47, %v3684_v39  ;;  %v3857_v39 = vld [vmem:[%s7440_s11 + $0x10] sm:$0xff]  ;;  %v3858_v47 = vld [vmem:[%s7440_s11 + $0x18] sm:$0xff] }
 0x46a   :  { %v5422_v23 = vpack.c.bf16 %v3858_v47, %v3857_v39 }
 0x46b   :  { %v3441_v44 = vrot.slane %v3439_v8, 2 }
 0x46d   :  { %v3443_v19 = vadd.f32 %v3441_v44, %v3439_v8  ;;  %v3654_v8 = vld [vmem:[%s7438_s9 + $0x50] sm:$0xff]  ;;  %v5406_v44 = vpack.c.bf16 %v3703_v48, %v3702_v42  ;;  %v3860_v42 = vld [vmem:[%s7440_s11 + $0x28] sm:$0xff] }
 0x46e   :  { %v5425_v48 = vpack.c.bf16 %v3860_v42, %v3859_v50 }
 0x46f   :  { %v3444_v38 = vmul.f32 0.5, %v3443_v19  ;;  %v5376_v19 = vpack.c.bf16 %v3655_v17, %v3654_v8  ;;  %v3863_v8 = vld [vmem:[%s7440_s11 + $0x40] sm:$0xff]  ;;  %v3864_v17 = vld [vmem:[%s7440_s11 + $0x48] sm:$0xff] }
 0x471   :  { %4180 = vmatmul.mubr.msk.f32.vlgmr.msra.gmra.mrb[102].mxu0 %vm2653_vm3, %v3444_v38  ;;  %4181 = vmatmul.mubr.msk.f32.vlgmr.msra.gmra.mrb[140].mxu1 %vm2653_vm3, %v3444_v38  ;;  %v3657_v38 = vld [vmem:[%s7438_s9 + $0x68] sm:$0xff] }
 0x472   :  { %5357 = vmatpush3.bf16.msra.mxu0 %v5356_v51  ;;  %5389 = vmatpush3.bf16.msra.mxu1 %v5388_v7  ;;  %v5408_v51 = vpack.c.bf16 %v3687_v40, %v3686_v52  ;;  %v3656_v7 = vld [vmem:[%s7438_s9 + $0x60] sm:$0xff]  ;;  %v3866_v52 = vld [vmem:[%s7440_s11 + $0x58] sm:$0xff] }
 0x473   :  { %5359 = vmatprep.subr.bf16.mxu0 %v5358_v43  ;;  %5391 = vmatprep.subr.bf16.mxu1 %v5390_v5  ;;  %v3688_v43 = vld [vmem:[%s7438_s9 + $0x160] sm:$0xff]  ;;  %v3689_v5 = vld [vmem:[%s7438_s9 + $0x168] sm:$0xff]  ;;  %v5380_v1 = vpack.c.bf16 %v3657_v38, %v3656_v7 }
 0x474   :  { %v5412_v31 = vpack.c.bf16 %v3689_v5, %v3688_v43 }
 0x476   :  { %5361 = vmatpush3.bf16.msra.mxu0 %v5360_v55  ;;  %5393 = vmatpush3.bf16.msra.mxu1 %v5392_v27  ;;  %v3707_v55 = vld [vmem:[%s7438_s9 + $0x1f8] sm:$0xff]  ;;  %v3658_v27 = vld [vmem:[%s7438_s9 + $0x70] sm:$0xff] }
 0x477   :  { %5363 = vmatprep.subr.bf16.mxu0 %v5362_v26  ;;  %5395 = vmatprep.subr.bf16.mxu1 %v5394_v14  ;;  %v5414_v57 = vpack.c.bf16 %v3707_v55, %v3706_v6  ;;  %v5384_v26 = vpack.c.bf16 %v3659_v35, %v3658_v27  ;;  %v3690_v14 = vld [vmem:[%s7438_s9 + $0x170] sm:$0xff] }
 0x478   :  { %v5416_v16 = vpack.c.bf16 %v3691_v41, %v3690_v14 }
 0x47a   :  { %5365 = vmatpush3.bf16.msra.mxu0 %v5364_v56  ;;  %5397 = vmatpush3.bf16.msra.mxu1 %v5396_v60  ;;  %v3477_v56 = vld [vmem:[%s7437_s8] sm:$0xf]  ;;  %v3481_v60 = vsub.s32 0, %v3480_v46 }
 0x47b   :  { %5367 = vmatprep.subr.bf16.mxu0 %v5366_v62  ;;  %5399 = vmatprep.subr.bf16.mxu1 %v5398_v33  ;;  %v3486_v63 = vrot.slane %v3477_v56, %v3485_v11  ;;  %v3494_v62 = vrot.slane %v3477_v56, %v3493_v18  ;;  %v3490_v59 = vrot.slane %v3477_v56, %v3489_v28 }
 0x47c   :  { %v3482_v33 = vrot.slane %v3477_v56, %v3481_v60 }
 0x47e   :  { %5369 = vmatpush3.bf16.msra.mxu0 %v5368_v29  ;;  %5401 = vmatpush3.bf16.msra.mxu1 %v5400_v12 }
 0x47f   :  { %5371 = vmatprep.subr.bf16.mxu0 %v5370_v0  ;;  %5403 = vmatprep.subr.bf16.mxu1 %v5402_v37 }
 0x482   :  { %5373 = vmatpush3.bf16.msra.mxu0 %v5372_v10  ;;  %5405 = vmatpush3.bf16.msra.mxu1 %v5404_v61  ;;  %v3861_v10 = vld [vmem:[%s7440_s11 + $0x30] sm:$0xff] }
 0x483   :  { %5375 = vmatprep.subr.bf16.mxu0 %v5374_v22  ;;  %5407 = vmatprep.subr.bf16.mxu1 %v5406_v44  ;;  %v5431_v22 = vpack.c.bf16 %v3864_v17, %v3863_v8  ;;  %v3865_v44 = vld [vmem:[%s7440_s11 + $0x50] sm:$0xff] }
 0x484   :  { %v5434_v40 = vpack.c.bf16 %v3866_v52, %v3865_v44 }
 0x486   :  { %5377 = vmatpush3.bf16.msra.mxu0 %v5376_v19  ;;  %5409 = vmatpush3.bf16.msra.mxu1 %v5408_v51  ;;  %v3870_v19 = vld [vmem:[%s7440_s11 + $0x78] sm:$0xff] }
 0x487   :  { %5379 = vmatprep.subr.bf16.mxu0 %v5378_v15  ;;  %5411 = vmatprep.subr.bf16.mxu1 %v5410_v49  ;;  %v5440_v51 = vpack.c.bf16 %v3870_v19, %v3869_v34  ;;  %v4182_v49 = vld [vmem:[%s7439_s10] ss:$0 sm:$0xff] }
 0x48a   :  { %5381 = vmatpush3.bf16.msra.mxu0 %v5380_v1  ;;  %5413 = vmatpush3.bf16.msra.mxu1 %v5412_v31 }
 0x48b   :  { %5383 = vmatprep.subr.bf16.mxu0 %v5382_v45  ;;  %5415 = vmatprep.subr.bf16.mxu1 %v5414_v57 }
 0x48e   :  { %5385 = vmatpush3.bf16.msra.mxu0 %v5384_v26  ;;  %5417 = vmatpush3.bf16.msra.mxu1 %v5416_v16 }
 0x48f   :  { %5418 = vmatprep.subr.bf16.mxu0 %v5471_v3 }
 0x544   :  { %v3568_v4 = vpop.f32.mrb[102].mxu0  ;;  %v3639_v21 = vpop.f32.mrb[140].mxu1 }
 0x545   :  { %v3570_v58 = vpop.f32.mrb[103].mxu0  ;;  %v3641_v29 = vpop.f32.mrb[141].mxu1  ;;  %v3569_v0 = vadd.f32 %v3568_v4, %v3482_v33  ;;  %v3640_v37 = vadd.f32 %v3639_v21, %v3490_v59 }
 0x546   :  { %v3571_v12 = vadd.f32 %v3570_v58, %v3486_v63  ;;  %v3642_v32 = vadd.f32 %v3641_v29, %v3494_v62 }
 0x548   :  { %3779 = vmatprep.mubr.f32.mxu0 %v3571_v12  ;;  %3849 = vmatprep.mubr.f32.mxu1 %v3642_v32 }
 0x549   :  { %3780 = vmatmul.mubr.f32.vlgmr.msra.gmra.mrb[104].mxu0 %v3569_v0  ;;  %3850 = vmatmul.mubr.f32.vlgmr.msra.gmra.mrb[142].mxu1 %v3640_v37 }
 0x54a   :  { %5420 = vmatpush3.bf16.msra.mxu0 %v5419_v30  ;;  %5067 = vmatprep.mubr.msk.f32.mxu0 %vm5472_vm0, %v5473_v54  ;;  %v3862_v54 = vld [vmem:[%s7440_s11 + $0x38] sm:$0xff]  ;;  %s5474_s11 = smov [#allocation6]  }
 0x54b   :  { %5421 = vmatprep.subr.bf16.mxu0 %v5471_v3  ;;  %v5428_v61 = vpack.c.bf16 %v3862_v54, %v3861_v10  ;;  %s3956_s3 = sshll.u32 %s5474_s11, 4  ;;  %s3957_s3 = int_to_ptr.vmem [resolvable:$true] %s3956_s3 }
 0x54c   :  { %s5447_s10 = scalar_lea.vmem %s3957_s3, 32  ;;  %p5452_p1 = scmp.lt.s32.totalorder %s3957_s3, %s3957_s3 }
 0x54d   :  { %p5448_p0 = scmp.ne.s32.totalorder %s3957_s3, %s5447_s10  ;;  %p5453_p2 = scmp.lt.s32.totalorder %s5447_s10, %s5447_s10 }
 0x54e   :  { %5423 = vmatpush3.bf16.msra.mxu0 %v5422_v23 }
 0x54f   :  { %5424 = vmatprep.subr.bf16.mxu0 %v5471_v3  ;;  %p5454_p3 = por %p5453_p2, %p5452_p1 }
 0x551   :  { %p5455_p4 = pnand %p5454_p3, %p5448_p0 }
 0x552   :  { %5426 = vmatpush3.bf16.msra.mxu0 %v5425_v48 }
 0x553   :  { %5427 = vmatprep.subr.bf16.mxu0 %v5471_v3 }
 0x556   :  { %5429 = vmatpush3.bf16.msra.mxu0 %v5428_v61 }
 0x557   :  { %5430 = vmatprep.subr.bf16.mxu0 %v5471_v3 }
 0x55a   :  { %5432 = vmatpush3.bf16.msra.mxu0 %v5431_v22 }
 0x55b   :  { %5433 = vmatprep.subr.bf16.mxu0 %v5471_v3 }
 0x55e   :  { %5435 = vmatpush3.bf16.msra.mxu0 %v5434_v40 }
 0x55f   :  { %5436 = vmatprep.subr.bf16.mxu0 %v5471_v3 }
 0x562   :  { %5438 = vmatpush3.bf16.msra.mxu0 %v5437_v36 }
 0x563   :  { %5439 = vmatprep.subr.bf16.mxu0 %v5471_v3 }
 0x566   :  { %5441 = vmatpush3.bf16.msra.mxu0 %v5440_v51 }
 0x61c   :  { %v4441_v7 = vpop.f32.mrb[104].mxu0  ;;  %v4476_v15 = vpop.f32.mrb[142].mxu1 }
 0x61d   :  { %v4442_v38 = vpop.f32.mrb[105].mxu0  ;;  %v4477_v43 = vpop.f32.mrb[143].mxu1 }
 0x61e   :  { %v4443_v5 = vadd.f32 %v4442_v38, %v4441_v7  ;;  %v4478_v3 = vadd.f32 %v4477_v43, %v4476_v15 }
 0x620   :  { %v3782_v1 = vadd.f32 %v4443_v5, %v4182_v49 }
 0x622   :  { %v3852_v31 = vadd.f32 %v4478_v3, %v3782_v1 }
 0x624   :  { %5068 = vmatmul.mubr.f32.vlgmr.msra.gmra.mrb[106].mxu0 %v3852_v31 }
 0x6f7   :  { %v3944_v13 = vpop.f32.mrb[106].mxu0 }
 0x6f8   :  { %v3945_v6 = vadd.f32 %v4183_v2, %v3944_v13  ;;  %v5069_v45 = vpop.f32.mrb[107].mxu0 }
 0x6fa   :  { %3949 = vst.msk [vmem:[#allocation6] sm:$0x3] %vm3948_vm5, %v3945_v6 }
 0x6fb   :  { %5458 = shalt.err (!%p5455_p4)
}
 0x6fc   :  { %s5459_s21 = scalar_lea.hbm %s7442_s13, 32 }
 0x6fd   :  { %p5460_p5 = scmp.ne.s32.totalorder %s7442_s13, %s5459_s21  ;;  %p5463_p6 = scmp.lt.u32.totalorder %s5459_s21, %s7442_s13 }
 0x6ff   :  { %p5465_p7 = pnand %p5463_p6, %p5460_p5 }
 0x701   :  { %5468 = shalt.err (!%p5465_p7)
}
 0x702   :  { %3959 = dma.vmem_to_hbm [thread:$0]  %s3957_s3, 32, %s7442_s13, [#allocation7]  }
 0x703   :  { %5469 = dma.done.wait [#allocation7], 32  }
 0x704   :  { %5470 = vsyncadd [#allocation7], 4294967264 }
 0x705   :  { %3963 = vsyncpa [#allocation7], 1 }

</bundles_post_ra>
